<compile_context>
chip_gen: v7x
topology: tpu7x:2x2x1
jax: 0.10.0
libtpu: 0.0.40
codegen_flags: <defaults>
</compile_context>

<pallas_src>
import functools

import jax
import jax.numpy as jnp
from jax import lax
from jax.experimental import pallas as pl
from jax.experimental.pallas import tpu as pltpu


_PARAM_NAMES = ("w123", "b123", "wf2", "b2b", "wf3", "b3b", "w4", "b4")
_VMEM_LIMIT_BYTES = 48 * 1024 * 1024      # < v7x 64 MiB physical; >> 16/32 MiB scoped default
_VMEM_WORKSET_BUDGET = 20 * 1024 * 1024   # per-grid-step activation/temporary budget
_MAX_ROWS = 2048                          # hard cap on rows per grid step


# --------------------------- fused inception kernel --------------------------

def _fused_inception_kernel(L, bb, x_ref, *refs):
    """All three InceptionModules + global average pool for `bb` whole sequences.

    x_ref : (bb*L, Cin) bf16, rows ordered (batch, position), channels-last
    refs  : 24 parameter refs (8 per module, see _PARAM_NAMES) followed by
    o_ref : (1, bb, 4*Cout3) f32 per-sequence channel means (global average pool)
    """
    o_ref = refs[-1]
    prefs = refs[:-1]
    TM = bb * L
    bf16 = jnp.bfloat16
    f32 = jnp.float32

    # Position of each row inside its length-L sequence.  Built from a 3-D iota so the
    # reshape only merges leading dims (no lane relayout, no div/mod).  Masks for every
    # shift distance are computed once and reused across all branches of all modules.
    l_idx = lax.broadcasted_iota(jnp.int32, (bb, L, 1), 1).reshape(TM, 1)
    valid = {d: (l_idx + d >= 0) & (l_idx + d < L) for d in (-2, -1, 1, 2)}

    def shift_rows(h, d, fill):
        # result[i] = h[i + d] within each length-L segment, `fill` outside.
        # Static slice + concat + masked select (VPU work only, no MXU, no O(L^2)).
        if d == 0:
            return h
        fv = jnp.asarray(fill, h.dtype)
        pad = jnp.full((abs(d), h.shape[1]), fv, h.dtype)
        if d > 0:
            s = jnp.concatenate([h[d:, :], pad], axis=0)
        else:
            s = jnp.concatenate([pad, h[:TM + d, :]], axis=0)
        return jnp.where(valid[d], s, fv)

    def module(x16, w123_ref, b123_ref, wf2_ref, b2b_ref, wf3_ref, b3b_ref,
               w4_ref, b4_ref):
        Cout = w4_ref.shape[1]

        # fused 1x1 convs that read x: [branch1 | branch2-in | branch3-in]
        h123 = jnp.dot(x16, w123_ref[...], preferred_element_type=f32)
        h123 = jnp.maximum(h123 + b123_ref[...], 0.0)          # (TM, 3*Cout) f32
        y1 = h123[:, :Cout].astype(bf16)
        # cast to bf16 *before* the shifts: shifting/masking commute with the cast,
        # and it halves the largest temporaries (H2/H3) and the select traffic.
        h2 = h123[:, Cout:2 * Cout].astype(bf16)
        h3 = h123[:, 2 * Cout:].astype(bf16)

        # branch2: conv(k=3, pad=1) as one matmul over row-shifted taps
        H2 = jnp.concatenate([shift_rows(h2, k - 1, 0.0) for k in range(3)], axis=-1)
        y2 = jnp.dot(H2, wf2_ref[...], preferred_element_type=f32)
        y2 = jnp.maximum(y2 + b2b_ref[...], 0.0).astype(bf16)

        # branch3: conv(k=5, pad=2) as one matmul over row-shifted taps
        H3 = jnp.concatenate([shift_rows(h3, k - 2, 0.0) for k in range(5)], axis=-1)
        y3 = jnp.dot(H3, wf3_ref[...], preferred_element_type=f32)
        y3 = jnp.maximum(y3 + b3b_ref[...], 0.0).astype(bf16)

        # branch4: maxpool(k=3, s=1, pad=1) kept entirely in bf16 (max is exact), then 1x1
        ninf = float("-inf")
        pooled = jnp.maximum(jnp.maximum(shift_rows(x16, -1, ninf), x16),
                             shift_rows(x16, 1, ninf))
        y4 = jnp.dot(pooled, w4_ref[...], preferred_element_type=f32)
        y4 = jnp.maximum(y4 + b4_ref[...], 0.0).astype(bf16)

        # channel-concatenated module output, already bf16 (lane-dense, half traffic)
        return jnp.concatenate([y1, y2, y3, y4], axis=-1)

    h = x_ref[...]
    h = module(h, *prefs[0:8])
    h = module(h, *prefs[8:16])
    h = module(h, *prefs[16:24])

    # global average pool over L for each of the bb sequences in this block
    C = h.shape[1]
    pooled = jnp.sum(h.astype(f32).reshape(bb, L, C), axis=1) * (1.0 / L)
    o_ref[...] = pooled.reshape(1, bb, C)


def _estimate_bytes_per_row(cin, couts):
    """Rough peak VMEM bytes per activation row inside the fused kernel."""
    total = 2 * cin                       # bf16 input block
    c = cin
    for co in couts:
        total += 12 * co                  # h123 (f32)
        total += 6 * co + 10 * co         # H2, H3 (bf16 tap stacks)
        total += 16 * co                  # y1..y4 at their f32 stage
        total += 2 * c                    # maxpool temp (bf16)
        total += 8 * co                   # module output (bf16)
        c = 4 * co
    return total


def _pick_batch_block(B, L, bytes_per_row,
                      budget=_VMEM_WORKSET_BUDGET, hard_cap=_MAX_ROWS):
    """Largest bb (divisor of B) s.t. bb*L rows fit the VMEM working-set budget,
    keeping >= 2 grid steps so v7x can shard the parallel axis over both TCs."""
    max_rows = max(8, min(hard_cap, budget // max(1, bytes_per_row)))
    min_grid = 2 if B >= 2 else 1
    for align in (16, 8):                 # prefer bf16-native 16-row sublane alignment
        for bb in range(B, 0, -1):
            rows = bb * L
            if B % bb or B // bb < min_grid or rows > max_rows or rows % align:
                continue
            return bb
    if L % 8 == 0:
        return 1
    # TODO(synk): L-tile with a +/-2-row halo when L is not 8-aligned and B*L is large.
    return B


def _inception_stack(x_flat, packed, B, L):
    """Three fused InceptionModules + global average pool.  x_flat: (B*L, Cin) bf16.

    Returns (B, 4*Cout3) f32 per-sequence channel means."""
    M, Cin = x_flat.shape
    couts = [packed[m]["w4"].shape[1] for m in ("inc1", "inc2", "inc3")]
    c_final = 4 * couts[-1]

    bb = _pick_batch_block(B, L, _estimate_bytes_per_row(Cin, couts))
    TM = bb * L
    G = B // bb

    args = []
    in_specs = [pl.BlockSpec((TM, Cin), lambda i: (i, 0))]
    for m in ("inc1", "inc2", "inc3"):
        for name in _PARAM_NAMES:
            arr = packed[m][name]
            args.append(arr)
            in_specs.append(pl.BlockSpec(arr.shape, lambda i: (0, 0)))

    pooled = pl.pallas_call(
        functools.partial(_fused_inception_kernel, L, bb),
        out_shape=jax.ShapeDtypeStruct((G, bb, c_final), jnp.float32),
        grid=(G,),
        in_specs=in_specs,
        out_specs=pl.BlockSpec((1, bb, c_final), lambda i: (i, 0, 0)),
        compiler_params=pltpu.CompilerParams(
            dimension_semantics=("parallel",),
            vmem_limit_bytes=_VMEM_LIMIT_BYTES),
    )(x_flat, *args)
    return pooled.reshape(B, c_final)


# ------------------------------- model head ---------------------------------

def _head_kernel(x_ref, w1_ref, b1_ref, w2_ref, b2_ref, o_ref):
    h = jnp.dot(x_ref[...], w1_ref[...], preferred_element_type=jnp.float32)
    h = jnp.maximum(h + b1_ref[...], 0.0)
    o_ref[...] = (jnp.dot(h, w2_ref[...], preferred_element_type=jnp.float32)
                  + b2_ref[...]).astype(o_ref.dtype)


def _head(pooled, p):
    """pooled: (B, C) f32 global-average-pooled features -> (B, num_classes) logits."""
    B, _ = pooled.shape
    NC = p["wfc2"].shape[1]
    full = lambda shape: pl.BlockSpec(shape, lambda i: (0,) * len(shape))
    return pl.pallas_call(
        _head_kernel,
        out_shape=jax.ShapeDtypeStruct((B, NC), jnp.float32),
        grid=(1,),
        in_specs=[full(pooled.shape), full(p["wfc1"].shape), full(p["bfc1"].shape),
                  full(p["wfc2"].shape), full(p["bfc2"].shape)],
        out_specs=full((B, NC)),
        compiler_params=pltpu.CompilerParams(
            dimension_semantics=("arbitrary",)),
    )(pooled, p["wfc1"], p["bfc1"], p["wfc2"], p["bfc2"])


@jax.jit
def inception1d_forward(x, packed):
    """x: (B, C_in, L) float32 (PyTorch NCL).  Returns (B, num_classes) float32."""
    B, Cin, L = x.shape
    # single tiny layout change at the network boundary; everything after is
    # channels-last (B*L, C) rows with no further activation transposes.
    h = jnp.transpose(x, (0, 2, 1)).reshape(B * L, Cin).astype(jnp.bfloat16)
    pooled = _inception_stack(h, packed, B, L)
    return _head(pooled, packed["head"])


# --------------------------- parameter construction -------------------------

def _uniform(key, shape, fan_in):
    bound = 1.0 / jnp.sqrt(fan_in)
    return jax.random.uniform(key, shape, jnp.float32, -bound, bound)


def init_inception_params(key, cin, cout):
    ks = jax.random.split(key, 12)
    return {
        "W1":  _uniform(ks[0], (cout, cin, 1), cin),   "b1":  _uniform(ks[1], (cout,), cin),
        "W2a": _uniform(ks[2], (cout, cin, 1), cin),   "b2a": _uniform(ks[3], (cout,), cin),
        "W2b": _uniform(ks[4], (cout, cout, 3), cout * 3),
        "b2b": _uniform(ks[5], (cout,), cout * 3),
        "W3a": _uniform(ks[6], (cout, cin, 1), cin),   "b3a": _uniform(ks[7], (cout,), cin),
        "W3b": _uniform(ks[8], (cout, cout, 5), cout * 5),
        "b3b": _uniform(ks[9], (cout,), cout * 5),
        "W4":  _uniform(ks[10], (cout, cin, 1), cin),  "b4":  _uniform(ks[11], (cout,), cin),
    }


def init_params(key, in_channels, num_classes, out_channels=32):
    k1, k2, k3, k4, k5, k6, k7 = jax.random.split(key, 7)
    c1, c2, c3 = out_channels, out_channels * 2, out_channels * 4
    return {
        "inc1": init_inception_params(k1, in_channels, c1),   # -> 4*c1 channels
        "inc2": init_inception_params(k2, c1 * 4, c2),        # -> 4*c2 channels
        "inc3": init_inception_params(k3, c2 * 4, c3),        # -> 4*c3 channels
        "Wfc1": _uniform(k4, (128, c3 * 4), c3 * 4), "bfc1": _uniform(k5, (128,), c3 * 4),
        "Wfc2": _uniform(k6, (num_classes, 128), 128), "bfc2": _uniform(k7, (num_classes,), 128),
    }


def pack_params(params):
    """Torch-layout params -> fused, kernel-layout (bf16 weights / f32 biases)."""
    bf16, f32 = jnp.bfloat16, jnp.float32

    def pack_inc(p):
        cout = p["W1"].shape[0]
        w123 = jnp.concatenate(
            [p["W1"][:, :, 0].T, p["W2a"][:, :, 0].T, p["W3a"][:, :, 0].T], axis=1)
        b123 = jnp.concatenate([p["b1"], p["b2a"], p["b3a"]])[None, :]
        wf2 = jnp.transpose(p["W2b"], (2, 1, 0)).reshape(3 * cout, cout)
        wf3 = jnp.transpose(p["W3b"], (2, 1, 0)).reshape(5 * cout, cout)
        return {
            "w123": w123.astype(bf16), "b123": b123.astype(f32),
            "wf2": wf2.astype(bf16),   "b2b": p["b2b"][None, :].astype(f32),
            "wf3": wf3.astype(bf16),   "b3b": p["b3b"][None, :].astype(f32),
            "w4": p["W4"][:, :, 0].T.astype(bf16), "b4": p["b4"][None, :].astype(f32),
        }

    return {
        "inc1": pack_inc(params["inc1"]),
        "inc2": pack_inc(params["inc2"]),
        "inc3": pack_inc(params["inc3"]),
        "head": {
            "wfc1": params["Wfc1"].T.astype(f32), "bfc1": params["bfc1"][None, :].astype(f32),
            "wfc2": params["Wfc2"].T.astype(f32), "bfc2": params["bfc2"][None, :].astype(f32),
        },
    }


# ----------------------------- pure-JAX reference ----------------------------

def reference_forward(x, params):
    dn = ("NCH", "OIH", "NCH")

    def conv(inp, w, b, pad):
        y = lax.conv_general_dilated(inp, w, window_strides=(1,),
                                     padding=[(pad, pad)], dimension_numbers=dn)
        return jnp.maximum(y + b[None, :, None], 0.0)

    def inception(inp, p):
        b1 = conv(inp, p["W1"], p["b1"], 0)
        b2 = conv(conv(inp, p["W2a"], p["b2a"], 0), p["W2b"], p["b2b"], 1)
        b3 = conv(conv(inp, p["W3a"], p["b3a"], 0), p["W3b"], p["b3b"], 2)
        pooled = lax.reduce_window(inp, -jnp.inf, lax.max,
                                   window_dimensions=(1, 1, 3),
                                   window_strides=(1, 1, 1),
                                   padding=((0, 0), (0, 0), (1, 1)))
        b4 = conv(pooled, p["W4"], p["b4"], 0)
        return jnp.concatenate([b1, b2, b3, b4], axis=1)

    h = inception(x, params["inc1"])
    h = inception(h, params["inc2"])
    h = inception(h, params["inc3"])
    pooled = jnp.mean(h, axis=2)                         # AdaptiveAvgPool1d(1)
    hfc = jnp.maximum(pooled @ params["Wfc1"].T + params["bfc1"], 0.0)
    return hfc @ params["Wfc2"].T + params["bfc2"]


if __name__ == "__main__":
    B, Cin, L = 2, 4, 16
    num_classes = 10
    out_channels = 32

    key = jax.random.PRNGKey(0)
    pkey, xkey = jax.random.split(key)
    params = init_params(pkey, Cin, num_classes, out_channels)
    packed = pack_params(params)
    x = jax.random.normal(xkey, (B, Cin, L), jnp.float32)

    out = jax.block_until_ready(inception1d_forward(x, packed))
    ref = jax.block_until_ready(reference_forward(x, params))

    assert out.shape == (B, num_classes), out.shape
    err = float(jnp.max(jnp.abs(out - ref)))
    # bf16 matmul operands (f32 accumulation) vs the f32 reference.
    assert err < 2e-2, f"max abs err {err}"
    print("KERNEL_OK")
</pallas_src>

<mosaic_0001>
module attributes {stable_mosaic.version = 11 : i64} {
  func.func @_head_kernel(%arg0: i32, %arg1: memref<2x512xf32, #tpu.memory_space<vmem>>, %arg2: memref<512x128xf32, #tpu.memory_space<vmem>>, %arg3: memref<1x128xf32, #tpu.memory_space<vmem>>, %arg4: memref<128x10xf32, #tpu.memory_space<vmem>>, %arg5: memref<1x10xf32, #tpu.memory_space<vmem>>, %arg6: memref<2x10xf32, #tpu.memory_space<vmem>>) attributes {dimension_semantics = [#tpu.dimension_semantics<arbitrary>], iteration_bounds = array<i64: 1>, scalar_prefetch = 0 : i64, scratch_operands = 0 : i64, tpu.core_type = #tpu.core_type<tc>, window_params = [{pipeline_mode = #tpu.pipeline_mode<synchronous>, transform_indices = @transform_0, window_bounds = array<i64: 2, 512>}, {pipeline_mode = #tpu.pipeline_mode<synchronous>, transform_indices = @transform_1, window_bounds = array<i64: 512, 128>}, {pipeline_mode = #tpu.pipeline_mode<synchronous>, transform_indices = @transform_2, window_bounds = array<i64: 1, 128>}, {pipeline_mode = #tpu.pipeline_mode<synchronous>, transform_indices = @transform_3, window_bounds = array<i64: 128, 10>}, {pipeline_mode = #tpu.pipeline_mode<synchronous>, transform_indices = @transform_4, window_bounds = array<i64: 1, 10>}, {pipeline_mode = #tpu.pipeline_mode<synchronous>, transform_indices = @transform_5, window_bounds = array<i64: 2, 10>}]} {
    %c0 = arith.constant 0 : index
    %c0_0 = arith.constant 0 : index
    %0 = vector.load %arg1[%c0, %c0_0] : memref<2x512xf32, #tpu.memory_space<vmem>>, vector<2x512xf32>
    %c0_1 = arith.constant 0 : index
    %c0_2 = arith.constant 0 : index
    %1 = vector.load %arg2[%c0_1, %c0_2] : memref<512x128xf32, #tpu.memory_space<vmem>>, vector<512x128xf32>
    %cst = arith.constant dense<0.000000e+00> : vector<2x128xf32>
    %2 = tpu.matmul %0, %1, %cst {dimension_numbers = #tpu.dot_dimension_numbers<[1], [0], [0], [1], [0, 0, 1, 1], [], []>} : vector<2x512xf32>, vector<512x128xf32>, vector<2x128xf32> -> vector<2x128xf32>
    %c0_3 = arith.constant 0 : index
    %c0_4 = arith.constant 0 : index
    %3 = vector.load %arg3[%c0_3, %c0_4] : memref<1x128xf32, #tpu.memory_space<vmem>>, vector<1x128xf32>
    %4 = vector.broadcast %3 : vector<1x128xf32> to vector<2x128xf32>
    %5 = arith.addf %2, %4 : vector<2x128xf32>
    %cst_5 = arith.constant 0.000000e+00 : f32
    %6 = vector.broadcast %cst_5 : f32 to vector<2x128xf32>
    %7 = arith.maximumf %5, %6 : vector<2x128xf32>
    %c0_6 = arith.constant 0 : index
    %c0_7 = arith.constant 0 : index
    %8 = vector.load %arg4[%c0_6, %c0_7] : memref<128x10xf32, #tpu.memory_space<vmem>>, vector<128x10xf32>
    %cst_8 = arith.constant dense<0.000000e+00> : vector<2x10xf32>
    %9 = tpu.matmul %7, %8, %cst_8 {dimension_numbers = #tpu.dot_dimension_numbers<[1], [0], [0], [1], [0, 0, 1, 1], [], []>} : vector<2x128xf32>, vector<128x10xf32>, vector<2x10xf32> -> vector<2x10xf32>
    %c0_9 = arith.constant 0 : index
    %c0_10 = arith.constant 0 : index
    %10 = vector.load %arg5[%c0_9, %c0_10] : memref<1x10xf32, #tpu.memory_space<vmem>>, vector<1x10xf32>
    %11 = vector.broadcast %10 : vector<1x10xf32> to vector<2x10xf32>
    %12 = arith.addf %9, %11 : vector<2x10xf32>
    %c0_11 = arith.constant 0 : index
    %c0_12 = arith.constant 0 : index
    %13 = vector.load %arg6[%c0_11, %c0_12] : memref<2x10xf32, #tpu.memory_space<vmem>>, vector<2x10xf32>
    tpu.vector_store %arg6[%c0_11, %c0_12], %12 {strides = array<i32>} : memref<2x10xf32, #tpu.memory_space<vmem>>, vector<2x10xf32>,
    return
  }
  func.func @transform_0(%arg0: i32) -> (i32, i32) {
    %c0_i32 = arith.constant 0 : i32
    %c0_i32_0 = arith.constant 0 : i32
    %c0_i32_1 = arith.constant 0 : i32
    return %c0_i32, %c0_i32_0 : i32, i32
  }
  func.func @transform_1(%arg0: i32) -> (i32, i32) {
    %c0_i32 = arith.constant 0 : i32
    %c0_i32_0 = arith.constant 0 : i32
    %c0_i32_1 = arith.constant 0 : i32
    return %c0_i32, %c0_i32_0 : i32, i32
  }
  func.func @transform_2(%arg0: i32) -> (i32, i32) {
    %c0_i32 = arith.constant 0 : i32
    %c0_i32_0 = arith.constant 0 : i32
    %c0_i32_1 = arith.constant 0 : i32
    return %c0_i32, %c0_i32_0 : i32, i32
  }
  func.func @transform_3(%arg0: i32) -> (i32, i32) {
    %c0_i32 = arith.constant 0 : i32
    %c0_i32_0 = arith.constant 0 : i32
    %c0_i32_1 = arith.constant 0 : i32
    return %c0_i32, %c0_i32_0 : i32, i32
  }
  func.func @transform_4(%arg0: i32) -> (i32, i32) {
    %c0_i32 = arith.constant 0 : i32
    %c0_i32_0 = arith.constant 0 : i32
    %c0_i32_1 = arith.constant 0 : i32
    return %c0_i32, %c0_i32_0 : i32, i32
  }
  func.func @transform_5(%arg0: i32) -> (i32, i32) {
    %c0_i32 = arith.constant 0 : i32
    %c0_i32_0 = arith.constant 0 : i32
    %c0_i32_1 = arith.constant 0 : i32
    return %c0_i32, %c0_i32_0 : i32, i32
  }
}

module attributes {stable_mosaic.version = 11 : i64} {
  func.func @_fused_inception_kernel(%arg0: i32, %arg1: memref<16x4xbf16, #tpu.memory_space<vmem>>, %arg2: memref<4x96xbf16, #tpu.memory_space<vmem>>, %arg3: memref<1x96xf32, #tpu.memory_space<vmem>>, %arg4: memref<96x32xbf16, #tpu.memory_space<vmem>>, %arg5: memref<1x32xf32, #tpu.memory_space<vmem>>, %arg6: memref<160x32xbf16, #tpu.memory_space<vmem>>, %arg7: memref<1x32xf32, #tpu.memory_space<vmem>>, %arg8: memref<4x32xbf16, #tpu.memory_space<vmem>>, %arg9: memref<1x32xf32, #tpu.memory_space<vmem>>, %arg10: memref<128x192xbf16, #tpu.memory_space<vmem>>, %arg11: memref<1x192xf32, #tpu.memory_space<vmem>>, %arg12: memref<192x64xbf16, #tpu.memory_space<vmem>>, %arg13: memref<1x64xf32, #tpu.memory_space<vmem>>, %arg14: memref<320x64xbf16, #tpu.memory_space<vmem>>, %arg15: memref<1x64xf32, #tpu.memory_space<vmem>>, %arg16: memref<128x64xbf16, #tpu.memory_space<vmem>>, %arg17: memref<1x64xf32, #tpu.memory_space<vmem>>, %arg18: memref<256x384xbf16, #tpu.memory_space<vmem>>, %arg19: memref<1x384xf32, #tpu.memory_space<vmem>>, %arg20: memref<384x128xbf16, #tpu.memory_space<vmem>>, %arg21: memref<1x128xf32, #tpu.memory_space<vmem>>, %arg22: memref<640x128xbf16, #tpu.memory_space<vmem>>, %arg23: memref<1x128xf32, #tpu.memory_space<vmem>>, %arg24: memref<256x128xbf16, #tpu.memory_space<vmem>>, %arg25: memref<1x128xf32, #tpu.memory_space<vmem>>, %arg26: memref<1x1x512xf32, #tpu.memory_space<vmem>>) attributes {dimension_semantics = [#tpu.dimension_semantics<parallel>], iteration_bounds = array<i64: 2>, scalar_prefetch = 0 : i64, scratch_operands = 0 : i64, tpu.core_type = #tpu.core_type<tc>, window_params = [{transform_indices = @transform_0, window_bounds = array<i64: 16, 4>}, {pipeline_mode = #tpu.pipeline_mode<synchronous>, transform_indices = @transform_1, window_bounds = array<i64: 4, 96>}, {pipeline_mode = #tpu.pipeline_mode<synchronous>, transform_indices = @transform_2, window_bounds = array<i64: 1, 96>}, {pipeline_mode = #tpu.pipeline_mode<synchronous>, transform_indices = @transform_3, window_bounds = array<i64: 96, 32>}, {pipeline_mode = #tpu.pipeline_mode<synchronous>, transform_indices = @transform_4, window_bounds = array<i64: 1, 32>}, {pipeline_mode = #tpu.pipeline_mode<synchronous>, transform_indices = @transform_5, window_bounds = array<i64: 160, 32>}, {pipeline_mode = #tpu.pipeline_mode<synchronous>, transform_indices = @transform_6, window_bounds = array<i64: 1, 32>}, {pipeline_mode = #tpu.pipeline_mode<synchronous>, transform_indices = @transform_7, window_bounds = array<i64: 4, 32>}, {pipeline_mode = #tpu.pipeline_mode<synchronous>, transform_indices = @transform_8, window_bounds = array<i64: 1, 32>}, {pipeline_mode = #tpu.pipeline_mode<synchronous>, transform_indices = @transform_9, window_bounds = array<i64: 128, 192>}, {pipeline_mode = #tpu.pipeline_mode<synchronous>, transform_indices = @transform_10, window_bounds = array<i64: 1, 192>}, {pipeline_mode = #tpu.pipeline_mode<synchronous>, transform_indices = @transform_11, window_bounds = array<i64: 192, 64>}, {pipeline_mode = #tpu.pipeline_mode<synchronous>, transform_indices = @transform_12, window_bounds = array<i64: 1, 64>}, {pipeline_mode = #tpu.pipeline_mode<synchronous>, transform_indices = @transform_13, window_bounds = array<i64: 320, 64>}, {pipeline_mode = #tpu.pipeline_mode<synchronous>, transform_indices = @transform_14, window_bounds = array<i64: 1, 64>}, {pipeline_mode = #tpu.pipeline_mode<synchronous>, transform_indices = @transform_15, window_bounds = array<i64: 128, 64>}, {pipeline_mode = #tpu.pipeline_mode<synchronous>, transform_indices = @transform_16, window_bounds = array<i64: 1, 64>}, {pipeline_mode = #tpu.pipeline_mode<synchronous>, transform_indices = @transform_17, window_bounds = array<i64: 256, 384>}, {pipeline_mode = #tpu.pipeline_mode<synchronous>, transform_indices = @transform_18, window_bounds = array<i64: 1, 384>}, {pipeline_mode = #tpu.pipeline_mode<synchronous>, transform_indices = @transform_19, window_bounds = array<i64: 384, 128>}, {pipeline_mode = #tpu.pipeline_mode<synchronous>, transform_indices = @transform_20, window_bounds = array<i64: 1, 128>}, {pipeline_mode = #tpu.pipeline_mode<synchronous>, transform_indices = @transform_21, window_bounds = array<i64: 640, 128>}, {pipeline_mode = #tpu.pipeline_mode<synchronous>, transform_indices = @transform_22, window_bounds = array<i64: 1, 128>}, {pipeline_mode = #tpu.pipeline_mode<synchronous>, transform_indices = @transform_23, window_bounds = array<i64: 256, 128>}, {pipeline_mode = #tpu.pipeline_mode<synchronous>, transform_indices = @transform_24, window_bounds = array<i64: 1, 128>}, {transform_indices = @transform_25, window_bounds = array<i64: 1, 1, 512>}]} {
    %0 = tpu.iota {dimensions = array<i32: 1>} : vector<1x16x1xi32>
    %1 = vector.shape_cast %0 : vector<1x16x1xi32> to vector<16x1xi32>
    %c-2_i32 = arith.constant -2 : i32
    %2 = vector.broadcast %c-2_i32 : i32 to vector<16x1xi32>
    %3 = arith.addi %1, %2 : vector<16x1xi32>
    %c0_i32 = arith.constant 0 : i32
    %4 = vector.broadcast %c0_i32 : i32 to vector<16x1xi32>
    %5 = arith.cmpi sge, %3, %4 : vector<16x1xi32>
    %c-2_i32_0 = arith.constant -2 : i32
    %6 = vector.broadcast %c-2_i32_0 : i32 to vector<16x1xi32>
    %7 = arith.addi %1, %6 : vector<16x1xi32>
    %c16_i32 = arith.constant 16 : i32
    %8 = vector.broadcast %c16_i32 : i32 to vector<16x1xi32>
    %9 = arith.cmpi slt, %7, %8 : vector<16x1xi32>
    %10 = arith.andi %5, %9 : vector<16x1xi1>
    %c-1_i32 = arith.constant -1 : i32
    %11 = vector.broadcast %c-1_i32 : i32 to vector<16x1xi32>
    %12 = arith.addi %1, %11 : vector<16x1xi32>
    %c0_i32_1 = arith.constant 0 : i32
    %13 = vector.broadcast %c0_i32_1 : i32 to vector<16x1xi32>
    %14 = arith.cmpi sge, %12, %13 : vector<16x1xi32>
    %c-1_i32_2 = arith.constant -1 : i32
    %15 = vector.broadcast %c-1_i32_2 : i32 to vector<16x1xi32>
    %16 = arith.addi %1, %15 : vector<16x1xi32>
    %c16_i32_3 = arith.constant 16 : i32
    %17 = vector.broadcast %c16_i32_3 : i32 to vector<16x1xi32>
    %18 = arith.cmpi slt, %16, %17 : vector<16x1xi32>
    %19 = arith.andi %14, %18 : vector<16x1xi1>
    %c1_i32 = arith.constant 1 : i32
    %20 = vector.broadcast %c1_i32 : i32 to vector<16x1xi32>
    %21 = arith.addi %1, %20 : vector<16x1xi32>
    %c0_i32_4 = arith.constant 0 : i32
    %22 = vector.broadcast %c0_i32_4 : i32 to vector<16x1xi32>
    %23 = arith.cmpi sge, %21, %22 : vector<16x1xi32>
    %c1_i32_5 = arith.constant 1 : i32
    %24 = vector.broadcast %c1_i32_5 : i32 to vector<16x1xi32>
    %25 = arith.addi %1, %24 : vector<16x1xi32>
    %c16_i32_6 = arith.constant 16 : i32
    %26 = vector.broadcast %c16_i32_6 : i32 to vector<16x1xi32>
    %27 = arith.cmpi slt, %25, %26 : vector<16x1xi32>
    %28 = arith.andi %23, %27 : vector<16x1xi1>
    %c2_i32 = arith.constant 2 : i32
    %29 = vector.broadcast %c2_i32 : i32 to vector<16x1xi32>
    %30 = arith.addi %1, %29 : vector<16x1xi32>
    %c0_i32_7 = arith.constant 0 : i32
    %31 = vector.broadcast %c0_i32_7 : i32 to vector<16x1xi32>
    %32 = arith.cmpi sge, %30, %31 : vector<16x1xi32>
    %c2_i32_8 = arith.constant 2 : i32
    %33 = vector.broadcast %c2_i32_8 : i32 to vector<16x1xi32>
    %34 = arith.addi %1, %33 : vector<16x1xi32>
    %c16_i32_9 = arith.constant 16 : i32
    %35 = vector.broadcast %c16_i32_9 : i32 to vector<16x1xi32>
    %36 = arith.cmpi slt, %34, %35 : vector<16x1xi32>
    %37 = arith.andi %32, %36 : vector<16x1xi1>
    %c0 = arith.constant 0 : index
    %c0_10 = arith.constant 0 : index
    %38 = vector.load %arg1[%c0, %c0_10] : memref<16x4xbf16, #tpu.memory_space<vmem>>, vector<16x4xbf16>
    %c0_11 = arith.constant 0 : index
    %c0_12 = arith.constant 0 : index
    %39 = vector.load %arg2[%c0_11, %c0_12] : memref<4x96xbf16, #tpu.memory_space<vmem>>, vector<4x96xbf16>
    %cst = arith.constant dense<0.000000e+00> : vector<16x96xf32>
    %40 = tpu.matmul %38, %39, %cst {dimension_numbers = #tpu.dot_dimension_numbers<[1], [0], [0], [1], [0, 0, 1, 1], [], []>} : vector<16x4xbf16>, vector<4x96xbf16>, vector<16x96xf32> -> vector<16x96xf32>
    %c0_13 = arith.constant 0 : index
    %c0_14 = arith.constant 0 : index
    %41 = vector.load %arg3[%c0_13, %c0_14] : memref<1x96xf32, #tpu.memory_space<vmem>>, vector<1x96xf32>
    %42 = vector.broadcast %41 : vector<1x96xf32> to vector<16x96xf32>
    %43 = arith.addf %40, %42 : vector<16x96xf32>
    %cst_15 = arith.constant 0.000000e+00 : f32
    %44 = vector.broadcast %cst_15 : f32 to vector<16x96xf32>
    %45 = arith.maximumf %43, %44 : vector<16x96xf32>
    %46 = vector.extract_strided_slice %45 {offsets = [0, 0], sizes = [16, 32], strides = [1, 1]} : vector<16x96xf32> to vector<16x32xf32>
    %47 = arith.truncf %46 : vector<16x32xf32> to vector<16x32xbf16>
    %48 = vector.extract_strided_slice %45 {offsets = [0, 32], sizes = [16, 32], strides = [1, 1]} : vector<16x96xf32> to vector<16x32xf32>
    %49 = arith.truncf %48 : vector<16x32xf32> to vector<16x32xbf16>
    %50 = vector.extract_strided_slice %45 {offsets = [0, 64], sizes = [16, 32], strides = [1, 1]} : vector<16x96xf32> to vector<16x32xf32>
    %51 = arith.truncf %50 : vector<16x32xf32> to vector<16x32xbf16>
    %cst_16 = arith.constant 0.000000e+00 : bf16
    %52 = vector.broadcast %cst_16 : bf16 to vector<1x32xbf16>
    %53 = vector.extract_strided_slice %49 {offsets = [0, 0], sizes = [15, 32], strides = [1, 1]} : vector<16x32xbf16> to vector<15x32xbf16>
    %54 = tpu.concatenate %52, %53 in 0 : vector<1x32xbf16>, vector<15x32xbf16> -> vector<16x32xbf16>
    %cst_17 = arith.constant 0.000000e+00 : bf16
    %55 = vector.shape_cast %19 : vector<16x1xi1> to vector<16x1xi1>
    %56 = vector.broadcast %55 : vector<16x1xi1> to vector<16x32xi1>
    %57 = vector.broadcast %cst_17 : bf16 to vector<16x32xbf16>
    %58 = arith.select %56, %54, %57 : vector<16x32xi1>, vector<16x32xbf16>
    %cst_18 = arith.constant 0.000000e+00 : bf16
    %59 = vector.broadcast %cst_18 : bf16 to vector<1x32xbf16>
    %60 = vector.extract_strided_slice %49 {offsets = [1, 0], sizes = [15, 32], strides = [1, 1]} : vector<16x32xbf16> to vector<15x32xbf16>
    %61 = tpu.concatenate %60, %59 in 0 : vector<15x32xbf16>, vector<1x32xbf16> -> vector<16x32xbf16>
    %cst_19 = arith.constant 0.000000e+00 : bf16
    %62 = vector.shape_cast %28 : vector<16x1xi1> to vector<16x1xi1>
    %63 = vector.broadcast %62 : vector<16x1xi1> to vector<16x32xi1>
    %64 = vector.broadcast %cst_19 : bf16 to vector<16x32xbf16>
    %65 = arith.select %63, %61, %64 : vector<16x32xi1>, vector<16x32xbf16>
    %66 = tpu.concatenate %58, %49, %65 in 1 : vector<16x32xbf16>, vector<16x32xbf16>, vector<16x32xbf16> -> vector<16x96xbf16>
    %c0_20 = arith.constant 0 : index
    %c0_21 = arith.constant 0 : index
    %67 = vector.load %arg4[%c0_20, %c0_21] : memref<96x32xbf16, #tpu.memory_space<vmem>>, vector<96x32xbf16>
    %cst_22 = arith.constant dense<0.000000e+00> : vector<16x32xf32>
    %68 = tpu.matmul %66, %67, %cst_22 {dimension_numbers = #tpu.dot_dimension_numbers<[1], [0], [0], [1], [0, 0, 1, 1], [], []>} : vector<16x96xbf16>, vector<96x32xbf16>, vector<16x32xf32> -> vector<16x32xf32>
    %c0_23 = arith.constant 0 : index
    %c0_24 = arith.constant 0 : index
    %69 = vector.load %arg5[%c0_23, %c0_24] : memref<1x32xf32, #tpu.memory_space<vmem>>, vector<1x32xf32>
    %70 = vector.broadcast %69 : vector<1x32xf32> to vector<16x32xf32>
    %71 = arith.addf %68, %70 : vector<16x32xf32>
    %cst_25 = arith.constant 0.000000e+00 : f32
    %72 = vector.broadcast %cst_25 : f32 to vector<16x32xf32>
    %73 = arith.maximumf %71, %72 : vector<16x32xf32>
    %74 = arith.truncf %73 : vector<16x32xf32> to vector<16x32xbf16>
    %cst_26 = arith.constant 0.000000e+00 : bf16
    %75 = vector.broadcast %cst_26 : bf16 to vector<2x32xbf16>
    %76 = vector.extract_strided_slice %51 {offsets = [0, 0], sizes = [14, 32], strides = [1, 1]} : vector<16x32xbf16> to vector<14x32xbf16>
    %77 = tpu.concatenate %75, %76 in 0 : vector<2x32xbf16>, vector<14x32xbf16> -> vector<16x32xbf16>
    %cst_27 = arith.constant 0.000000e+00 : bf16
    %78 = vector.shape_cast %10 : vector<16x1xi1> to vector<16x1xi1>
    %79 = vector.broadcast %78 : vector<16x1xi1> to vector<16x32xi1>
    %80 = vector.broadcast %cst_27 : bf16 to vector<16x32xbf16>
    %81 = arith.select %79, %77, %80 : vector<16x32xi1>, vector<16x32xbf16>
    %cst_28 = arith.constant 0.000000e+00 : bf16
    %82 = vector.broadcast %cst_28 : bf16 to vector<1x32xbf16>
    %83 = vector.extract_strided_slice %51 {offsets = [0, 0], sizes = [15, 32], strides = [1, 1]} : vector<16x32xbf16> to vector<15x32xbf16>
    %84 = tpu.concatenate %82, %83 in 0 : vector<1x32xbf16>, vector<15x32xbf16> -> vector<16x32xbf16>
    %cst_29 = arith.constant 0.000000e+00 : bf16
    %85 = vector.shape_cast %19 : vector<16x1xi1> to vector<16x1xi1>
    %86 = vector.broadcast %85 : vector<16x1xi1> to vector<16x32xi1>
    %87 = vector.broadcast %cst_29 : bf16 to vector<16x32xbf16>
    %88 = arith.select %86, %84, %87 : vector<16x32xi1>, vector<16x32xbf16>
    %cst_30 = arith.constant 0.000000e+00 : bf16
    %89 = vector.broadcast %cst_30 : bf16 to vector<1x32xbf16>
    %90 = vector.extract_strided_slice %51 {offsets = [1, 0], sizes = [15, 32], strides = [1, 1]} : vector<16x32xbf16> to vector<15x32xbf16>
    %91 = tpu.concatenate %90, %89 in 0 : vector<15x32xbf16>, vector<1x32xbf16> -> vector<16x32xbf16>
    %cst_31 = arith.constant 0.000000e+00 : bf16
    %92 = vector.shape_cast %28 : vector<16x1xi1> to vector<16x1xi1>
    %93 = vector.broadcast %92 : vector<16x1xi1> to vector<16x32xi1>
    %94 = vector.broadcast %cst_31 : bf16 to vector<16x32xbf16>
    %95 = arith.select %93, %91, %94 : vector<16x32xi1>, vector<16x32xbf16>
    %cst_32 = arith.constant 0.000000e+00 : bf16
    %96 = vector.broadcast %cst_32 : bf16 to vector<2x32xbf16>
    %97 = vector.extract_strided_slice %51 {offsets = [2, 0], sizes = [14, 32], strides = [1, 1]} : vector<16x32xbf16> to vector<14x32xbf16>
    %98 = tpu.concatenate %97, %96 in 0 : vector<14x32xbf16>, vector<2x32xbf16> -> vector<16x32xbf16>
    %cst_33 = arith.constant 0.000000e+00 : bf16
    %99 = vector.shape_cast %37 : vector<16x1xi1> to vector<16x1xi1>
    %100 = vector.broadcast %99 : vector<16x1xi1> to vector<16x32xi1>
    %101 = vector.broadcast %cst_33 : bf16 to vector<16x32xbf16>
    %102 = arith.select %100, %98, %101 : vector<16x32xi1>, vector<16x32xbf16>
    %103 = tpu.concatenate %81, %88, %51, %95, %102 in 1 : vector<16x32xbf16>, vector<16x32xbf16>, vector<16x32xbf16>, vector<16x32xbf16>, vector<16x32xbf16> -> vector<16x160xbf16>
    %c0_34 = arith.constant 0 : index
    %c0_35 = arith.constant 0 : index
    %104 = vector.load %arg6[%c0_34, %c0_35] : memref<160x32xbf16, #tpu.memory_space<vmem>>, vector<160x32xbf16>
    %cst_36 = arith.constant dense<0.000000e+00> : vector<16x32xf32>
    %105 = tpu.matmul %103, %104, %cst_36 {dimension_numbers = #tpu.dot_dimension_numbers<[1], [0], [0], [1], [0, 0, 1, 1], [], []>} : vector<16x160xbf16>, vector<160x32xbf16>, vector<16x32xf32> -> vector<16x32xf32>
    %c0_37 = arith.constant 0 : index
    %c0_38 = arith.constant 0 : index
    %106 = vector.load %arg7[%c0_37, %c0_38] : memref<1x32xf32, #tpu.memory_space<vmem>>, vector<1x32xf32>
    %107 = vector.broadcast %106 : vector<1x32xf32> to vector<16x32xf32>
    %108 = arith.addf %105, %107 : vector<16x32xf32>
    %cst_39 = arith.constant 0.000000e+00 : f32
    %109 = vector.broadcast %cst_39 : f32 to vector<16x32xf32>
    %110 = arith.maximumf %108, %109 : vector<16x32xf32>
    %111 = arith.truncf %110 : vector<16x32xf32> to vector<16x32xbf16>
    %cst_40 = arith.constant 0xFF80 : bf16
    %112 = vector.broadcast %cst_40 : bf16 to vector<1x4xbf16>
    %113 = vector.extract_strided_slice %38 {offsets = [0, 0], sizes = [15, 4], strides = [1, 1]} : vector<16x4xbf16> to vector<15x4xbf16>
    %114 = tpu.concatenate %112, %113 in 0 : vector<1x4xbf16>, vector<15x4xbf16> -> vector<16x4xbf16>
    %cst_41 = arith.constant 0xFF80 : bf16
    %115 = vector.shape_cast %19 : vector<16x1xi1> to vector<16x1xi1>
    %116 = vector.broadcast %115 : vector<16x1xi1> to vector<16x4xi1>
    %117 = vector.broadcast %cst_41 : bf16 to vector<16x4xbf16>
    %118 = arith.select %116, %114, %117 : vector<16x4xi1>, vector<16x4xbf16>
    %119 = arith.maximumf %118, %38 : vector<16x4xbf16>
    %cst_42 = arith.constant 0xFF80 : bf16
    %120 = vector.broadcast %cst_42 : bf16 to vector<1x4xbf16>
    %121 = vector.extract_strided_slice %38 {offsets = [1, 0], sizes = [15, 4], strides = [1, 1]} : vector<16x4xbf16> to vector<15x4xbf16>
    %122 = tpu.concatenate %121, %120 in 0 : vector<15x4xbf16>, vector<1x4xbf16> -> vector<16x4xbf16>
    %cst_43 = arith.constant 0xFF80 : bf16
    %123 = vector.shape_cast %28 : vector<16x1xi1> to vector<16x1xi1>
    %124 = vector.broadcast %123 : vector<16x1xi1> to vector<16x4xi1>
    %125 = vector.broadcast %cst_43 : bf16 to vector<16x4xbf16>
    %126 = arith.select %124, %122, %125 : vector<16x4xi1>, vector<16x4xbf16>
    %127 = arith.maximumf %119, %126 : vector<16x4xbf16>
    %c0_44 = arith.constant 0 : index
    %c0_45 = arith.constant 0 : index
    %128 = vector.load %arg8[%c0_44, %c0_45] : memref<4x32xbf16, #tpu.memory_space<vmem>>, vector<4x32xbf16>
    %cst_46 = arith.constant dense<0.000000e+00> : vector<16x32xf32>
    %129 = tpu.matmul %127, %128, %cst_46 {dimension_numbers = #tpu.dot_dimension_numbers<[1], [0], [0], [1], [0, 0, 1, 1], [], []>} : vector<16x4xbf16>, vector<4x32xbf16>, vector<16x32xf32> -> vector<16x32xf32>
    %c0_47 = arith.constant 0 : index
    %c0_48 = arith.constant 0 : index
    %130 = vector.load %arg9[%c0_47, %c0_48] : memref<1x32xf32, #tpu.memory_space<vmem>>, vector<1x32xf32>
    %131 = vector.broadcast %130 : vector<1x32xf32> to vector<16x32xf32>
    %132 = arith.addf %129, %131 : vector<16x32xf32>
    %cst_49 = arith.constant 0.000000e+00 : f32
    %133 = vector.broadcast %cst_49 : f32 to vector<16x32xf32>
    %134 = arith.maximumf %132, %133 : vector<16x32xf32>
    %135 = arith.truncf %134 : vector<16x32xf32> to vector<16x32xbf16>
    %136 = tpu.concatenate %47, %74, %111, %135 in 1 : vector<16x32xbf16>, vector<16x32xbf16>, vector<16x32xbf16>, vector<16x32xbf16> -> vector<16x128xbf16>
    %c0_50 = arith.constant 0 : index
    %c0_51 = arith.constant 0 : index
    %137 = vector.load %arg10[%c0_50, %c0_51] : memref<128x192xbf16, #tpu.memory_space<vmem>>, vector<128x192xbf16>
    %cst_52 = arith.constant dense<0.000000e+00> : vector<16x192xf32>
    %138 = tpu.matmul %136, %137, %cst_52 {dimension_numbers = #tpu.dot_dimension_numbers<[1], [0], [0], [1], [0, 0, 1, 1], [], []>} : vector<16x128xbf16>, vector<128x192xbf16>, vector<16x192xf32> -> vector<16x192xf32>
    %c0_53 = arith.constant 0 : index
    %c0_54 = arith.constant 0 : index
    %139 = vector.load %arg11[%c0_53, %c0_54] : memref<1x192xf32, #tpu.memory_space<vmem>>, vector<1x192xf32>
    %140 = vector.broadcast %139 : vector<1x192xf32> to vector<16x192xf32>
    %141 = arith.addf %138, %140 : vector<16x192xf32>
    %cst_55 = arith.constant 0.000000e+00 : f32
    %142 = vector.broadcast %cst_55 : f32 to vector<16x192xf32>
    %143 = arith.maximumf %141, %142 : vector<16x192xf32>
    %144 = vector.extract_strided_slice %143 {offsets = [0, 0], sizes = [16, 64], strides = [1, 1]} : vector<16x192xf32> to vector<16x64xf32>
    %145 = arith.truncf %144 : vector<16x64xf32> to vector<16x64xbf16>
    %146 = vector.extract_strided_slice %143 {offsets = [0, 64], sizes = [16, 64], strides = [1, 1]} : vector<16x192xf32> to vector<16x64xf32>
    %147 = arith.truncf %146 : vector<16x64xf32> to vector<16x64xbf16>
    %148 = vector.extract_strided_slice %143 {offsets = [0, 128], sizes = [16, 64], strides = [1, 1]} : vector<16x192xf32> to vector<16x64xf32>
    %149 = arith.truncf %148 : vector<16x64xf32> to vector<16x64xbf16>
    %cst_56 = arith.constant 0.000000e+00 : bf16
    %150 = vector.broadcast %cst_56 : bf16 to vector<1x64xbf16>
    %151 = vector.extract_strided_slice %147 {offsets = [0, 0], sizes = [15, 64], strides = [1, 1]} : vector<16x64xbf16> to vector<15x64xbf16>
    %152 = tpu.concatenate %150, %151 in 0 : vector<1x64xbf16>, vector<15x64xbf16> -> vector<16x64xbf16>
    %cst_57 = arith.constant 0.000000e+00 : bf16
    %153 = vector.shape_cast %19 : vector<16x1xi1> to vector<16x1xi1>
    %154 = vector.broadcast %153 : vector<16x1xi1> to vector<16x64xi1>
    %155 = vector.broadcast %cst_57 : bf16 to vector<16x64xbf16>
    %156 = arith.select %154, %152, %155 : vector<16x64xi1>, vector<16x64xbf16>
    %cst_58 = arith.constant 0.000000e+00 : bf16
    %157 = vector.broadcast %cst_58 : bf16 to vector<1x64xbf16>
    %158 = vector.extract_strided_slice %147 {offsets = [1, 0], sizes = [15, 64], strides = [1, 1]} : vector<16x64xbf16> to vector<15x64xbf16>
    %159 = tpu.concatenate %158, %157 in 0 : vector<15x64xbf16>, vector<1x64xbf16> -> vector<16x64xbf16>
    %cst_59 = arith.constant 0.000000e+00 : bf16
    %160 = vector.shape_cast %28 : vector<16x1xi1> to vector<16x1xi1>
    %161 = vector.broadcast %160 : vector<16x1xi1> to vector<16x64xi1>
    %162 = vector.broadcast %cst_59 : bf16 to vector<16x64xbf16>
    %163 = arith.select %161, %159, %162 : vector<16x64xi1>, vector<16x64xbf16>
    %164 = tpu.concatenate %156, %147, %163 in 1 : vector<16x64xbf16>, vector<16x64xbf16>, vector<16x64xbf16> -> vector<16x192xbf16>
    %c0_60 = arith.constant 0 : index
    %c0_61 = arith.constant 0 : index
    %165 = vector.load %arg12[%c0_60, %c0_61] : memref<192x64xbf16, #tpu.memory_space<vmem>>, vector<192x64xbf16>
    %cst_62 = arith.constant dense<0.000000e+00> : vector<16x64xf32>
    %166 = tpu.matmul %164, %165, %cst_62 {dimension_numbers = #tpu.dot_dimension_numbers<[1], [0], [0], [1], [0, 0, 1, 1], [], []>} : vector<16x192xbf16>, vector<192x64xbf16>, vector<16x64xf32> -> vector<16x64xf32>
    %c0_63 = arith.constant 0 : index
    %c0_64 = arith.constant 0 : index
    %167 = vector.load %arg13[%c0_63, %c0_64] : memref<1x64xf32, #tpu.memory_space<vmem>>, vector<1x64xf32>
    %168 = vector.broadcast %167 : vector<1x64xf32> to vector<16x64xf32>
    %169 = arith.addf %166, %168 : vector<16x64xf32>
    %cst_65 = arith.constant 0.000000e+00 : f32
    %170 = vector.broadcast %cst_65 : f32 to vector<16x64xf32>
    %171 = arith.maximumf %169, %170 : vector<16x64xf32>
    %172 = arith.truncf %171 : vector<16x64xf32> to vector<16x64xbf16>
    %cst_66 = arith.constant 0.000000e+00 : bf16
    %173 = vector.broadcast %cst_66 : bf16 to vector<2x64xbf16>
    %174 = vector.extract_strided_slice %149 {offsets = [0, 0], sizes = [14, 64], strides = [1, 1]} : vector<16x64xbf16> to vector<14x64xbf16>
    %175 = tpu.concatenate %173, %174 in 0 : vector<2x64xbf16>, vector<14x64xbf16> -> vector<16x64xbf16>
    %cst_67 = arith.constant 0.000000e+00 : bf16
    %176 = vector.shape_cast %10 : vector<16x1xi1> to vector<16x1xi1>
    %177 = vector.broadcast %176 : vector<16x1xi1> to vector<16x64xi1>
    %178 = vector.broadcast %cst_67 : bf16 to vector<16x64xbf16>
    %179 = arith.select %177, %175, %178 : vector<16x64xi1>, vector<16x64xbf16>
    %cst_68 = arith.constant 0.000000e+00 : bf16
    %180 = vector.broadcast %cst_68 : bf16 to vector<1x64xbf16>
    %181 = vector.extract_strided_slice %149 {offsets = [0, 0], sizes = [15, 64], strides = [1, 1]} : vector<16x64xbf16> to vector<15x64xbf16>
    %182 = tpu.concatenate %180, %181 in 0 : vector<1x64xbf16>, vector<15x64xbf16> -> vector<16x64xbf16>
    %cst_69 = arith.constant 0.000000e+00 : bf16
    %183 = vector.shape_cast %19 : vector<16x1xi1> to vector<16x1xi1>
    %184 = vector.broadcast %183 : vector<16x1xi1> to vector<16x64xi1>
    %185 = vector.broadcast %cst_69 : bf16 to vector<16x64xbf16>
    %186 = arith.select %184, %182, %185 : vector<16x64xi1>, vector<16x64xbf16>
    %cst_70 = arith.constant 0.000000e+00 : bf16
    %187 = vector.broadcast %cst_70 : bf16 to vector<1x64xbf16>
    %188 = vector.extract_strided_slice %149 {offsets = [1, 0], sizes = [15, 64], strides = [1, 1]} : vector<16x64xbf16> to vector<15x64xbf16>
    %189 = tpu.concatenate %188, %187 in 0 : vector<15x64xbf16>, vector<1x64xbf16> -> vector<16x64xbf16>
    %cst_71 = arith.constant 0.000000e+00 : bf16
    %190 = vector.shape_cast %28 : vector<16x1xi1> to vector<16x1xi1>
    %191 = vector.broadcast %190 : vector<16x1xi1> to vector<16x64xi1>
    %192 = vector.broadcast %cst_71 : bf16 to vector<16x64xbf16>
    %193 = arith.select %191, %189, %192 : vector<16x64xi1>, vector<16x64xbf16>
    %cst_72 = arith.constant 0.000000e+00 : bf16
    %194 = vector.broadcast %cst_72 : bf16 to vector<2x64xbf16>
    %195 = vector.extract_strided_slice %149 {offsets = [2, 0], sizes = [14, 64], strides = [1, 1]} : vector<16x64xbf16> to vector<14x64xbf16>
    %196 = tpu.concatenate %195, %194 in 0 : vector<14x64xbf16>, vector<2x64xbf16> -> vector<16x64xbf16>
    %cst_73 = arith.constant 0.000000e+00 : bf16
    %197 = vector.shape_cast %37 : vector<16x1xi1> to vector<16x1xi1>
    %198 = vector.broadcast %197 : vector<16x1xi1> to vector<16x64xi1>
    %199 = vector.broadcast %cst_73 : bf16 to vector<16x64xbf16>
    %200 = arith.select %198, %196, %199 : vector<16x64xi1>, vector<16x64xbf16>
    %201 = tpu.concatenate %179, %186, %149, %193, %200 in 1 : vector<16x64xbf16>, vector<16x64xbf16>, vector<16x64xbf16>, vector<16x64xbf16>, vector<16x64xbf16> -> vector<16x320xbf16>
    %c0_74 = arith.constant 0 : index
    %c0_75 = arith.constant 0 : index
    %202 = vector.load %arg14[%c0_74, %c0_75] : memref<320x64xbf16, #tpu.memory_space<vmem>>, vector<320x64xbf16>
    %cst_76 = arith.constant dense<0.000000e+00> : vector<16x64xf32>
    %203 = tpu.matmul %201, %202, %cst_76 {dimension_numbers = #tpu.dot_dimension_numbers<[1], [0], [0], [1], [0, 0, 1, 1], [], []>} : vector<16x320xbf16>, vector<320x64xbf16>, vector<16x64xf32> -> vector<16x64xf32>
    %c0_77 = arith.constant 0 : index
    %c0_78 = arith.constant 0 : index
    %204 = vector.load %arg15[%c0_77, %c0_78] : memref<1x64xf32, #tpu.memory_space<vmem>>, vector<1x64xf32>
    %205 = vector.broadcast %204 : vector<1x64xf32> to vector<16x64xf32>
    %206 = arith.addf %203, %205 : vector<16x64xf32>
    %cst_79 = arith.constant 0.000000e+00 : f32
    %207 = vector.broadcast %cst_79 : f32 to vector<16x64xf32>
    %208 = arith.maximumf %206, %207 : vector<16x64xf32>
    %209 = arith.truncf %208 : vector<16x64xf32> to vector<16x64xbf16>
    %cst_80 = arith.constant 0xFF80 : bf16
    %210 = vector.broadcast %cst_80 : bf16 to vector<1x128xbf16>
    %211 = vector.extract_strided_slice %136 {offsets = [0, 0], sizes = [15, 128], strides = [1, 1]} : vector<16x128xbf16> to vector<15x128xbf16>
    %212 = tpu.concatenate %210, %211 in 0 : vector<1x128xbf16>, vector<15x128xbf16> -> vector<16x128xbf16>
    %cst_81 = arith.constant 0xFF80 : bf16
    %213 = vector.shape_cast %19 : vector<16x1xi1> to vector<16x1xi1>
    %214 = vector.broadcast %213 : vector<16x1xi1> to vector<16x128xi1>
    %215 = vector.broadcast %cst_81 : bf16 to vector<16x128xbf16>
    %216 = arith.select %214, %212, %215 : vector<16x128xi1>, vector<16x128xbf16>
    %217 = arith.maximumf %216, %136 : vector<16x128xbf16>
    %cst_82 = arith.constant 0xFF80 : bf16
    %218 = vector.broadcast %cst_82 : bf16 to vector<1x128xbf16>
    %219 = vector.extract_strided_slice %136 {offsets = [1, 0], sizes = [15, 128], strides = [1, 1]} : vector<16x128xbf16> to vector<15x128xbf16>
    %220 = tpu.concatenate %219, %218 in 0 : vector<15x128xbf16>, vector<1x128xbf16> -> vector<16x128xbf16>
    %cst_83 = arith.constant 0xFF80 : bf16
    %221 = vector.shape_cast %28 : vector<16x1xi1> to vector<16x1xi1>
    %222 = vector.broadcast %221 : vector<16x1xi1> to vector<16x128xi1>
    %223 = vector.broadcast %cst_83 : bf16 to vector<16x128xbf16>
    %224 = arith.select %222, %220, %223 : vector<16x128xi1>, vector<16x128xbf16>
    %225 = arith.maximumf %217, %224 : vector<16x128xbf16>
    %c0_84 = arith.constant 0 : index
    %c0_85 = arith.constant 0 : index
    %226 = vector.load %arg16[%c0_84, %c0_85] : memref<128x64xbf16, #tpu.memory_space<vmem>>, vector<128x64xbf16>
    %cst_86 = arith.constant dense<0.000000e+00> : vector<16x64xf32>
    %227 = tpu.matmul %225, %226, %cst_86 {dimension_numbers = #tpu.dot_dimension_numbers<[1], [0], [0], [1], [0, 0, 1, 1], [], []>} : vector<16x128xbf16>, vector<128x64xbf16>, vector<16x64xf32> -> vector<16x64xf32>
    %c0_87 = arith.constant 0 : index
    %c0_88 = arith.constant 0 : index
    %228 = vector.load %arg17[%c0_87, %c0_88] : memref<1x64xf32, #tpu.memory_space<vmem>>, vector<1x64xf32>
    %229 = vector.broadcast %228 : vector<1x64xf32> to vector<16x64xf32>
    %230 = arith.addf %227, %229 : vector<16x64xf32>
    %cst_89 = arith.constant 0.000000e+00 : f32
    %231 = vector.broadcast %cst_89 : f32 to vector<16x64xf32>
    %232 = arith.maximumf %230, %231 : vector<16x64xf32>
    %233 = arith.truncf %232 : vector<16x64xf32> to vector<16x64xbf16>
    %234 = tpu.concatenate %145, %172, %209, %233 in 1 : vector<16x64xbf16>, vector<16x64xbf16>, vector<16x64xbf16>, vector<16x64xbf16> -> vector<16x256xbf16>
    %c0_90 = arith.constant 0 : index
    %c0_91 = arith.constant 0 : index
    %235 = vector.load %arg18[%c0_90, %c0_91] : memref<256x384xbf16, #tpu.memory_space<vmem>>, vector<256x384xbf16>
    %cst_92 = arith.constant dense<0.000000e+00> : vector<16x384xf32>
    %236 = tpu.matmul %234, %235, %cst_92 {dimension_numbers = #tpu.dot_dimension_numbers<[1], [0], [0], [1], [0, 0, 1, 1], [], []>} : vector<16x256xbf16>, vector<256x384xbf16>, vector<16x384xf32> -> vector<16x384xf32>
    %c0_93 = arith.constant 0 : index
    %c0_94 = arith.constant 0 : index
    %237 = vector.load %arg19[%c0_93, %c0_94] : memref<1x384xf32, #tpu.memory_space<vmem>>, vector<1x384xf32>
    %238 = vector.broadcast %237 : vector<1x384xf32> to vector<16x384xf32>
    %239 = arith.addf %236, %238 : vector<16x384xf32>
    %cst_95 = arith.constant 0.000000e+00 : f32
    %240 = vector.broadcast %cst_95 : f32 to vector<16x384xf32>
    %241 = arith.maximumf %239, %240 : vector<16x384xf32>
    %242 = vector.extract_strided_slice %241 {offsets = [0, 0], sizes = [16, 128], strides = [1, 1]} : vector<16x384xf32> to vector<16x128xf32>
    %243 = arith.truncf %242 : vector<16x128xf32> to vector<16x128xbf16>
    %244 = vector.extract_strided_slice %241 {offsets = [0, 128], sizes = [16, 128], strides = [1, 1]} : vector<16x384xf32> to vector<16x128xf32>
    %245 = arith.truncf %244 : vector<16x128xf32> to vector<16x128xbf16>
    %246 = vector.extract_strided_slice %241 {offsets = [0, 256], sizes = [16, 128], strides = [1, 1]} : vector<16x384xf32> to vector<16x128xf32>
    %247 = arith.truncf %246 : vector<16x128xf32> to vector<16x128xbf16>
    %cst_96 = arith.constant 0.000000e+00 : bf16
    %248 = vector.broadcast %cst_96 : bf16 to vector<1x128xbf16>
    %249 = vector.extract_strided_slice %245 {offsets = [0, 0], sizes = [15, 128], strides = [1, 1]} : vector<16x128xbf16> to vector<15x128xbf16>
    %250 = tpu.concatenate %248, %249 in 0 : vector<1x128xbf16>, vector<15x128xbf16> -> vector<16x128xbf16>
    %cst_97 = arith.constant 0.000000e+00 : bf16
    %251 = vector.shape_cast %19 : vector<16x1xi1> to vector<16x1xi1>
    %252 = vector.broadcast %251 : vector<16x1xi1> to vector<16x128xi1>
    %253 = vector.broadcast %cst_97 : bf16 to vector<16x128xbf16>
    %254 = arith.select %252, %250, %253 : vector<16x128xi1>, vector<16x128xbf16>
    %cst_98 = arith.constant 0.000000e+00 : bf16
    %255 = vector.broadcast %cst_98 : bf16 to vector<1x128xbf16>
    %256 = vector.extract_strided_slice %245 {offsets = [1, 0], sizes = [15, 128], strides = [1, 1]} : vector<16x128xbf16> to vector<15x128xbf16>
    %257 = tpu.concatenate %256, %255 in 0 : vector<15x128xbf16>, vector<1x128xbf16> -> vector<16x128xbf16>
    %cst_99 = arith.constant 0.000000e+00 : bf16
    %258 = vector.shape_cast %28 : vector<16x1xi1> to vector<16x1xi1>
    %259 = vector.broadcast %258 : vector<16x1xi1> to vector<16x128xi1>
    %260 = vector.broadcast %cst_99 : bf16 to vector<16x128xbf16>
    %261 = arith.select %259, %257, %260 : vector<16x128xi1>, vector<16x128xbf16>
    %262 = tpu.concatenate %254, %245, %261 in 1 : vector<16x128xbf16>, vector<16x128xbf16>, vector<16x128xbf16> -> vector<16x384xbf16>
    %c0_100 = arith.constant 0 : index
    %c0_101 = arith.constant 0 : index
    %263 = vector.load %arg20[%c0_100, %c0_101] : memref<384x128xbf16, #tpu.memory_space<vmem>>, vector<384x128xbf16>
    %cst_102 = arith.constant dense<0.000000e+00> : vector<16x128xf32>
    %264 = tpu.matmul %262, %263, %cst_102 {dimension_numbers = #tpu.dot_dimension_numbers<[1], [0], [0], [1], [0, 0, 1, 1], [], []>} : vector<16x384xbf16>, vector<384x128xbf16>, vector<16x128xf32> -> vector<16x128xf32>
    %c0_103 = arith.constant 0 : index
    %c0_104 = arith.constant 0 : index
    %265 = vector.load %arg21[%c0_103, %c0_104] : memref<1x128xf32, #tpu.memory_space<vmem>>, vector<1x128xf32>
    %266 = vector.broadcast %265 : vector<1x128xf32> to vector<16x128xf32>
    %267 = arith.addf %264, %266 : vector<16x128xf32>
    %cst_105 = arith.constant 0.000000e+00 : f32
    %268 = vector.broadcast %cst_105 : f32 to vector<16x128xf32>
    %269 = arith.maximumf %267, %268 : vector<16x128xf32>
    %270 = arith.truncf %269 : vector<16x128xf32> to vector<16x128xbf16>
    %cst_106 = arith.constant 0.000000e+00 : bf16
    %271 = vector.broadcast %cst_106 : bf16 to vector<2x128xbf16>
    %272 = vector.extract_strided_slice %247 {offsets = [0, 0], sizes = [14, 128], strides = [1, 1]} : vector<16x128xbf16> to vector<14x128xbf16>
    %273 = tpu.concatenate %271, %272 in 0 : vector<2x128xbf16>, vector<14x128xbf16> -> vector<16x128xbf16>
    %cst_107 = arith.constant 0.000000e+00 : bf16
    %274 = vector.shape_cast %10 : vector<16x1xi1> to vector<16x1xi1>
    %275 = vector.broadcast %274 : vector<16x1xi1> to vector<16x128xi1>
    %276 = vector.broadcast %cst_107 : bf16 to vector<16x128xbf16>
    %277 = arith.select %275, %273, %276 : vector<16x128xi1>, vector<16x128xbf16>
    %cst_108 = arith.constant 0.000000e+00 : bf16
    %278 = vector.broadcast %cst_108 : bf16 to vector<1x128xbf16>
    %279 = vector.extract_strided_slice %247 {offsets = [0, 0], sizes = [15, 128], strides = [1, 1]} : vector<16x128xbf16> to vector<15x128xbf16>
    %280 = tpu.concatenate %278, %279 in 0 : vector<1x128xbf16>, vector<15x128xbf16> -> vector<16x128xbf16>
    %cst_109 = arith.constant 0.000000e+00 : bf16
    %281 = vector.shape_cast %19 : vector<16x1xi1> to vector<16x1xi1>
    %282 = vector.broadcast %281 : vector<16x1xi1> to vector<16x128xi1>
    %283 = vector.broadcast %cst_109 : bf16 to vector<16x128xbf16>
    %284 = arith.select %282, %280, %283 : vector<16x128xi1>, vector<16x128xbf16>
    %cst_110 = arith.constant 0.000000e+00 : bf16
    %285 = vector.broadcast %cst_110 : bf16 to vector<1x128xbf16>
    %286 = vector.extract_strided_slice %247 {offsets = [1, 0], sizes = [15, 128], strides = [1, 1]} : vector<16x128xbf16> to vector<15x128xbf16>
    %287 = tpu.concatenate %286, %285 in 0 : vector<15x128xbf16>, vector<1x128xbf16> -> vector<16x128xbf16>
    %cst_111 = arith.constant 0.000000e+00 : bf16
    %288 = vector.shape_cast %28 : vector<16x1xi1> to vector<16x1xi1>
    %289 = vector.broadcast %288 : vector<16x1xi1> to vector<16x128xi1>
    %290 = vector.broadcast %cst_111 : bf16 to vector<16x128xbf16>
    %291 = arith.select %289, %287, %290 : vector<16x128xi1>, vector<16x128xbf16>
    %cst_112 = arith.constant 0.000000e+00 : bf16
    %292 = vector.broadcast %cst_112 : bf16 to vector<2x128xbf16>
    %293 = vector.extract_strided_slice %247 {offsets = [2, 0], sizes = [14, 128], strides = [1, 1]} : vector<16x128xbf16> to vector<14x128xbf16>
    %294 = tpu.concatenate %293, %292 in 0 : vector<14x128xbf16>, vector<2x128xbf16> -> vector<16x128xbf16>
    %cst_113 = arith.constant 0.000000e+00 : bf16
    %295 = vector.shape_cast %37 : vector<16x1xi1> to vector<16x1xi1>
    %296 = vector.broadcast %295 : vector<16x1xi1> to vector<16x128xi1>
    %297 = vector.broadcast %cst_113 : bf16 to vector<16x128xbf16>
    %298 = arith.select %296, %294, %297 : vector<16x128xi1>, vector<16x128xbf16>
    %299 = tpu.concatenate %277, %284, %247, %291, %298 in 1 : vector<16x128xbf16>, vector<16x128xbf16>, vector<16x128xbf16>, vector<16x128xbf16>, vector<16x128xbf16> -> vector<16x640xbf16>
    %c0_114 = arith.constant 0 : index
    %c0_115 = arith.constant 0 : index
    %300 = vector.load %arg22[%c0_114, %c0_115] : memref<640x128xbf16, #tpu.memory_space<vmem>>, vector<640x128xbf16>
    %cst_116 = arith.constant dense<0.000000e+00> : vector<16x128xf32>
    %301 = tpu.matmul %299, %300, %cst_116 {dimension_numbers = #tpu.dot_dimension_numbers<[1], [0], [0], [1], [0, 0, 1, 1], [], []>} : vector<16x640xbf16>, vector<640x128xbf16>, vector<16x128xf32> -> vector<16x128xf32>
    %c0_117 = arith.constant 0 : index
    %c0_118 = arith.constant 0 : index
    %302 = vector.load %arg23[%c0_117, %c0_118] : memref<1x128xf32, #tpu.memory_space<vmem>>, vector<1x128xf32>
    %303 = vector.broadcast %302 : vector<1x128xf32> to vector<16x128xf32>
    %304 = arith.addf %301, %303 : vector<16x128xf32>
    %cst_119 = arith.constant 0.000000e+00 : f32
    %305 = vector.broadcast %cst_119 : f32 to vector<16x128xf32>
    %306 = arith.maximumf %304, %305 : vector<16x128xf32>
    %307 = arith.truncf %306 : vector<16x128xf32> to vector<16x128xbf16>
    %cst_120 = arith.constant 0xFF80 : bf16
    %308 = vector.broadcast %cst_120 : bf16 to vector<1x256xbf16>
    %309 = vector.extract_strided_slice %234 {offsets = [0, 0], sizes = [15, 256], strides = [1, 1]} : vector<16x256xbf16> to vector<15x256xbf16>
    %310 = tpu.concatenate %308, %309 in 0 : vector<1x256xbf16>, vector<15x256xbf16> -> vector<16x256xbf16>
    %cst_121 = arith.constant 0xFF80 : bf16
    %311 = vector.shape_cast %19 : vector<16x1xi1> to vector<16x1xi1>
    %312 = vector.broadcast %311 : vector<16x1xi1> to vector<16x256xi1>
    %313 = vector.broadcast %cst_121 : bf16 to vector<16x256xbf16>
    %314 = arith.select %312, %310, %313 : vector<16x256xi1>, vector<16x256xbf16>
    %315 = arith.maximumf %314, %234 : vector<16x256xbf16>
    %cst_122 = arith.constant 0xFF80 : bf16
    %316 = vector.broadcast %cst_122 : bf16 to vector<1x256xbf16>
    %317 = vector.extract_strided_slice %234 {offsets = [1, 0], sizes = [15, 256], strides = [1, 1]} : vector<16x256xbf16> to vector<15x256xbf16>
    %318 = tpu.concatenate %317, %316 in 0 : vector<15x256xbf16>, vector<1x256xbf16> -> vector<16x256xbf16>
    %cst_123 = arith.constant 0xFF80 : bf16
    %319 = vector.shape_cast %28 : vector<16x1xi1> to vector<16x1xi1>
    %320 = vector.broadcast %319 : vector<16x1xi1> to vector<16x256xi1>
    %321 = vector.broadcast %cst_123 : bf16 to vector<16x256xbf16>
    %322 = arith.select %320, %318, %321 : vector<16x256xi1>, vector<16x256xbf16>
    %323 = arith.maximumf %315, %322 : vector<16x256xbf16>
    %c0_124 = arith.constant 0 : index
    %c0_125 = arith.constant 0 : index
    %324 = vector.load %arg24[%c0_124, %c0_125] : memref<256x128xbf16, #tpu.memory_space<vmem>>, vector<256x128xbf16>
    %cst_126 = arith.constant dense<0.000000e+00> : vector<16x128xf32>
    %325 = tpu.matmul %323, %324, %cst_126 {dimension_numbers = #tpu.dot_dimension_numbers<[1], [0], [0], [1], [0, 0, 1, 1], [], []>} : vector<16x256xbf16>, vector<256x128xbf16>, vector<16x128xf32> -> vector<16x128xf32>
    %c0_127 = arith.constant 0 : index
    %c0_128 = arith.constant 0 : index
    %326 = vector.load %arg25[%c0_127, %c0_128] : memref<1x128xf32, #tpu.memory_space<vmem>>, vector<1x128xf32>
    %327 = vector.broadcast %326 : vector<1x128xf32> to vector<16x128xf32>
    %328 = arith.addf %325, %327 : vector<16x128xf32>
    %cst_129 = arith.constant 0.000000e+00 : f32
    %329 = vector.broadcast %cst_129 : f32 to vector<16x128xf32>
    %330 = arith.maximumf %328, %329 : vector<16x128xf32>
    %331 = arith.truncf %330 : vector<16x128xf32> to vector<16x128xbf16>
    %332 = tpu.concatenate %243, %270, %307, %331 in 1 : vector<16x128xbf16>, vector<16x128xbf16>, vector<16x128xbf16>, vector<16x128xbf16> -> vector<16x512xbf16>
    %333 = arith.extf %332 : vector<16x512xbf16> to vector<16x512xf32>
    %334 = vector.shape_cast %333 : vector<16x512xf32> to vector<1x16x512xf32>
    %cst_130 = arith.constant dense<0.000000e+00> : vector<1x512xf32>
    %335 = vector.multi_reduction <add>, %334, %cst_130 [1] : vector<1x16x512xf32> to vector<1x512xf32>
    %cst_131 = arith.constant 6.250000e-02 : f32
    %336 = vector.broadcast %cst_131 : f32 to vector<1x512xf32>
    %337 = arith.mulf %335, %336 : vector<1x512xf32>
    %338 = vector.shape_cast %337 : vector<1x512xf32> to vector<1x1x512xf32>
    %c0_132 = arith.constant 0 : index
    %c0_133 = arith.constant 0 : index
    %c0_134 = arith.constant 0 : index
    %339 = vector.load %arg26[%c0_132, %c0_133, %c0_134] : memref<1x1x512xf32, #tpu.memory_space<vmem>>, vector<1x1x512xf32>
    tpu.vector_store %arg26[%c0_132, %c0_133, %c0_134], %338 {strides = array<i32>} : memref<1x1x512xf32, #tpu.memory_space<vmem>>, vector<1x1x512xf32>,
    return
  }
  func.func @transform_0(%arg0: i32) -> (i32, i32) {
    %c0_i32 = arith.constant 0 : i32
    %c0_i32_0 = arith.constant 0 : i32
    return %arg0, %c0_i32 : i32, i32
  }
  func.func @transform_1(%arg0: i32) -> (i32, i32) {
    %c0_i32 = arith.constant 0 : i32
    %c0_i32_0 = arith.constant 0 : i32
    %c0_i32_1 = arith.constant 0 : i32
    return %c0_i32, %c0_i32_0 : i32, i32
  }
  func.func @transform_2(%arg0: i32) -> (i32, i32) {
    %c0_i32 = arith.constant 0 : i32
    %c0_i32_0 = arith.constant 0 : i32
    %c0_i32_1 = arith.constant 0 : i32
    return %c0_i32, %c0_i32_0 : i32, i32
  }
  func.func @transform_3(%arg0: i32) -> (i32, i32) {
    %c0_i32 = arith.constant 0 : i32
    %c0_i32_0 = arith.constant 0 : i32
    %c0_i32_1 = arith.constant 0 : i32
    return %c0_i32, %c0_i32_0 : i32, i32
  }
  func.func @transform_4(%arg0: i32) -> (i32, i32) {
    %c0_i32 = arith.constant 0 : i32
    %c0_i32_0 = arith.constant 0 : i32
    %c0_i32_1 = arith.constant 0 : i32
    return %c0_i32, %c0_i32_0 : i32, i32
  }
  func.func @transform_5(%arg0: i32) -> (i32, i32) {
    %c0_i32 = arith.constant 0 : i32
    %c0_i32_0 = arith.constant 0 : i32
    %c0_i32_1 = arith.constant 0 : i32
    return %c0_i32, %c0_i32_0 : i32, i32
  }
  func.func @transform_6(%arg0: i32) -> (i32, i32) {
    %c0_i32 = arith.constant 0 : i32
    %c0_i32_0 = arith.constant 0 : i32
    %c0_i32_1 = arith.constant 0 : i32
    return %c0_i32, %c0_i32_0 : i32, i32
  }
  func.func @transform_7(%arg0: i32) -> (i32, i32) {
    %c0_i32 = arith.constant 0 : i32
    %c0_i32_0 = arith.constant 0 : i32
    %c0_i32_1 = arith.constant 0 : i32
    return %c0_i32, %c0_i32_0 : i32, i32
  }
  func.func @transform_8(%arg0: i32) -> (i32, i32) {
    %c0_i32 = arith.constant 0 : i32
    %c0_i32_0 = arith.constant 0 : i32
    %c0_i32_1 = arith.constant 0 : i32
    return %c0_i32, %c0_i32_0 : i32, i32
  }
  func.func @transform_9(%arg0: i32) -> (i32, i32) {
    %c0_i32 = arith.constant 0 : i32
    %c0_i32_0 = arith.constant 0 : i32
    %c0_i32_1 = arith.constant 0 : i32
    return %c0_i32, %c0_i32_0 : i32, i32
  }
  func.func @transform_10(%arg0: i32) -> (i32, i32) {
    %c0_i32 = arith.constant 0 : i32
    %c0_i32_0 = arith.constant 0 : i32
    %c0_i32_1 = arith.constant 0 : i32
    return %c0_i32, %c0_i32_0 : i32, i32
  }
  func.func @transform_11(%arg0: i32) -> (i32, i32) {
    %c0_i32 = arith.constant 0 : i32
    %c0_i32_0 = arith.constant 0 : i32
    %c0_i32_1 = arith.constant 0 : i32
    return %c0_i32, %c0_i32_0 : i32, i32
  }
  func.func @transform_12(%arg0: i32) -> (i32, i32) {
    %c0_i32 = arith.constant 0 : i32
    %c0_i32_0 = arith.constant 0 : i32
    %c0_i32_1 = arith.constant 0 : i32
    return %c0_i32, %c0_i32_0 : i32, i32
  }
  func.func @transform_13(%arg0: i32) -> (i32, i32) {
    %c0_i32 = arith.constant 0 : i32
    %c0_i32_0 = arith.constant 0 : i32
    %c0_i32_1 = arith.constant 0 : i32
    return %c0_i32, %c0_i32_0 : i32, i32
  }
  func.func @transform_14(%arg0: i32) -> (i32, i32) {
    %c0_i32 = arith.constant 0 : i32
    %c0_i32_0 = arith.constant 0 : i32
    %c0_i32_1 = arith.constant 0 : i32
    return %c0_i32, %c0_i32_0 : i32, i32
  }
  func.func @transform_15(%arg0: i32) -> (i32, i32) {
    %c0_i32 = arith.constant 0 : i32
    %c0_i32_0 = arith.constant 0 : i32
    %c0_i32_1 = arith.constant 0 : i32
    return %c0_i32, %c0_i32_0 : i32, i32
  }
  func.func @transform_16(%arg0: i32) -> (i32, i32) {
    %c0_i32 = arith.constant 0 : i32
    %c0_i32_0 = arith.constant 0 : i32
    %c0_i32_1 = arith.constant 0 : i32
    return %c0_i32, %c0_i32_0 : i32, i32
  }
  func.func @transform_17(%arg0: i32) -> (i32, i32) {
    %c0_i32 = arith.constant 0 : i32
    %c0_i32_0 = arith.constant 0 : i32
    %c0_i32_1 = arith.constant 0 : i32
    return %c0_i32, %c0_i32_0 : i32, i32
  }
  func.func @transform_18(%arg0: i32) -> (i32, i32) {
    %c0_i32 = arith.constant 0 : i32
    %c0_i32_0 = arith.constant 0 : i32
    %c0_i32_1 = arith.constant 0 : i32
    return %c0_i32, %c0_i32_0 : i32, i32
  }
  func.func @transform_19(%arg0: i32) -> (i32, i32) {
    %c0_i32 = arith.constant 0 : i32
    %c0_i32_0 = arith.constant 0 : i32
    %c0_i32_1 = arith.constant 0 : i32
    return %c0_i32, %c0_i32_0 : i32, i32
  }
  func.func @transform_20(%arg0: i32) -> (i32, i32) {
    %c0_i32 = arith.constant 0 : i32
    %c0_i32_0 = arith.constant 0 : i32
    %c0_i32_1 = arith.constant 0 : i32
    return %c0_i32, %c0_i32_0 : i32, i32
  }
  func.func @transform_21(%arg0: i32) -> (i32, i32) {
    %c0_i32 = arith.constant 0 : i32
    %c0_i32_0 = arith.constant 0 : i32
    %c0_i32_1 = arith.constant 0 : i32
    return %c0_i32, %c0_i32_0 : i32, i32
  }
  func.func @transform_22(%arg0: i32) -> (i32, i32) {
    %c0_i32 = arith.constant 0 : i32
    %c0_i32_0 = arith.constant 0 : i32
    %c0_i32_1 = arith.constant 0 : i32
    return %c0_i32, %c0_i32_0 : i32, i32
  }
  func.func @transform_23(%arg0: i32) -> (i32, i32) {
    %c0_i32 = arith.constant 0 : i32
    %c0_i32_0 = arith.constant 0 : i32
    %c0_i32_1 = arith.constant 0 : i32
    return %c0_i32, %c0_i32_0 : i32, i32
  }
  func.func @transform_24(%arg0: i32) -> (i32, i32) {
    %c0_i32 = arith.constant 0 : i32
    %c0_i32_0 = arith.constant 0 : i32
    %c0_i32_1 = arith.constant 0 : i32
    return %c0_i32, %c0_i32_0 : i32, i32
  }
  func.func @transform_25(%arg0: i32) -> (i32, i32, i32) {
    %c0_i32 = arith.constant 0 : i32
    %c0_i32_0 = arith.constant 0 : i32
    %c0_i32_1 = arith.constant 0 : i32
    return %arg0, %c0_i32, %c0_i32_0 : i32, i32, i32
  }
}

</mosaic_0001>

<bundles_post_ra>
// kernel: inception1d_forward.3
= control target key start
LH: loop header
LB: loop body
LE: loop exit
PB: predicated region body
PF: predicated region fallthrough
CT: control target
= control target key end

     0   :  { %v607_v47 = vmov 1983009808   ;;  %v98_v49 = vlaneseq  ;;  %s903_s0 = inlined_call_operand.vmem [shape: f32[2,512], index: 0, kind: input, shape index: {}]   ;;  %s904_s1 = inlined_call_operand.vmem [shape: f32[512,128], index: 1, kind: input, shape index: {}]   ;;  %s905_s2 = inlined_call_operand.vmem [shape: f32[1,128], index: 2, kind: input, shape index: {}]   ;;  %s906_s3 = inlined_call_operand.vmem [shape: f32[128,10], index: 3, kind: input, shape index: {}]   ;;  %s907_s4 = inlined_call_operand.vmem [shape: f32[1,10], index: 4, kind: input, shape index: {}]   ;;  %s908_s5 = inlined_call_operand.hbm [shape: f32[2,10], index: 5, kind: output, shape index: {}]  }
   0x1   :  { %v38_v0 = vld [vmem:[%s904_s1 + $0x80] sm:$0xff]  ;;  %v39_v1 = vld [vmem:[%s904_s1 + $0x88] sm:$0xff]  ;;  %v40_v11 = vld [vmem:[%s904_s1 + $0x90] sm:$0xff]  ;;  %v96_v48 = vunpack.c.l.s4 %v607_v47 }
   0x2   :  { %v22_v2 = vld [vmem:[%s904_s1] sm:$0xff]  ;;  %v489_v3 = vpack.c.bf16 %v39_v1, %v38_v0  ;;  %v23_v4 = vld [vmem:[%s904_s1 + $0x8] sm:$0xff]  ;;  %v41_v13 = vld [vmem:[%s904_s1 + $0x98] sm:$0xff]  ;;  %v99_v0 = vshrl.u32 %v98_v49, 7 }
   0x3   :  { %v70_v5 = vld [vmem:[%s904_s1 + $0x180] sm:$0xff]  ;;  %v71_v6 = vld [vmem:[%s904_s1 + $0x188] sm:$0xff]  ;;  %v491_v7 = vpack.c.bf16 %v23_v4, %v22_v2  ;;  %v24_v14 = vld [vmem:[%s904_s1 + $0x10] sm:$0xff]  ;;  %v493_v16 = vpack.c.bf16 %v41_v13, %v40_v11  ;;  %v97_v63 = vunpack.c.0.s8 %v96_v48 }
   0x4   :  { %v521_v8 = vpack.c.bf16 %v71_v6, %v70_v5  ;;  %v54_v9 = vld [vmem:[%s904_s1 + $0x100] sm:$0xff]  ;;  %v55_v10 = vld [vmem:[%s904_s1 + $0x108] sm:$0xff]  ;;  %490 = vmatprep.subr.bf16.mxu0 %v489_v3  ;;  %v25_v15 = vld [vmem:[%s904_s1 + $0x18] sm:$0xff] }
   0x5   :  { %v523_v12 = vpack.c.bf16 %v55_v10, %v54_v9  ;;  %492 = vmatpush3.bf16.msra.mxu0 %v491_v7  ;;  %v495_v17 = vpack.c.bf16 %v25_v15, %v24_v14  ;;  %v72_v18 = vld [vmem:[%s904_s1 + $0x190] sm:$0xff]  ;;  %v73_v19 = vld [vmem:[%s904_s1 + $0x198] sm:$0xff]  ;;  %v42_v23 = vld [vmem:[%s904_s1 + $0xa0] sm:$0xff]  ;;  %v100_v13 = vsub.s32 %v97_v63, %v99_v0 }
   0x6   :  { %522 = vmatprep.subr.bf16.mxu1 %v521_v8  ;;  %v56_v20 = vld [vmem:[%s904_s1 + $0x110] sm:$0xff]  ;;  %v525_v21 = vpack.c.bf16 %v73_v19, %v72_v18  ;;  %v57_v22 = vld [vmem:[%s904_s1 + $0x118] sm:$0xff]  ;;  %v43_v24 = vld [vmem:[%s904_s1 + $0xa8] sm:$0xff]  ;;  %494 = vmatprep.subr.bf16.mxu0 %v493_v16 }
   0x7   :  { %524 = vmatpush3.bf16.msra.mxu1 %v523_v12  ;;  %v527_v25 = vpack.c.bf16 %v57_v22, %v56_v20  ;;  %v497_v26 = vpack.c.bf16 %v43_v24, %v42_v23  ;;  %v26_v27 = vld [vmem:[%s904_s1 + $0x20] sm:$0xff]  ;;  %v27_v28 = vld [vmem:[%s904_s1 + $0x28] sm:$0xff]  ;;  %v44_v35 = vld [vmem:[%s904_s1 + $0xb0] sm:$0xff] }
   0x8   :  { %v74_v29 = vld [vmem:[%s904_s1 + $0x1a0] sm:$0xff]  ;;  %526 = vmatprep.subr.bf16.mxu1 %v525_v21  ;;  %v75_v30 = vld [vmem:[%s904_s1 + $0x1a8] sm:$0xff]  ;;  %v499_v33 = vpack.c.bf16 %v27_v28, %v26_v27  ;;  %v45_v36 = vld [vmem:[%s904_s1 + $0xb8] sm:$0xff] }
   0x9   :  { %v58_v31 = vld [vmem:[%s904_s1 + $0x120] sm:$0xff]  ;;  %v59_v32 = vld [vmem:[%s904_s1 + $0x128] sm:$0xff]  ;;  %496 = vmatpush3.bf16.msra.mxu0 %v495_v17  ;;  %v529_v34 = vpack.c.bf16 %v75_v30, %v74_v29  ;;  %v28_v37 = vld [vmem:[%s904_s1 + $0x30] sm:$0xff]  ;;  %v501_v39 = vpack.c.bf16 %v45_v36, %v44_v35 }
   0xa   :  { %498 = vmatprep.subr.bf16.mxu0 %v497_v26  ;;  %v531_v38 = vpack.c.bf16 %v59_v32, %v58_v31  ;;  %v29_v40 = vld [vmem:[%s904_s1 + $0x38] sm:$0xff]  ;;  %v76_v41 = vld [vmem:[%s904_s1 + $0x1b0] sm:$0xff]  ;;  %v46_v46 = vld [vmem:[%s904_s1 + $0xc0] sm:$0xff] }
   0xb   :  { %528 = vmatpush3.bf16.msra.mxu1 %v527_v25  ;;  %v77_v42 = vld [vmem:[%s904_s1 + $0x1b8] sm:$0xff]  ;;  %v60_v44 = vld [vmem:[%s904_s1 + $0x130] sm:$0xff]  ;;  %v47_v50 = vld [vmem:[%s904_s1 + $0xc8] sm:$0xff]  ;;  %v503_v51 = vpack.c.bf16 %v29_v40, %v28_v37 }
   0xc   :  { %530 = vmatprep.subr.bf16.mxu1 %v529_v34  ;;  %v533_v43 = vpack.c.bf16 %v77_v42, %v76_v41  ;;  %v61_v45 = vld [vmem:[%s904_s1 + $0x138] sm:$0xff]  ;;  %v78_v52 = vld [vmem:[%s904_s1 + $0x1c0] sm:$0xff]  ;;  %v79_v53 = vld [vmem:[%s904_s1 + $0x1c8] sm:$0xff]  ;;  %v505_v55 = vpack.c.bf16 %v47_v50, %v46_v46 }
   0xd   :  { %500 = vmatpush3.bf16.msra.mxu0 %v499_v33  ;;  %v535_v54 = vpack.c.bf16 %v61_v45, %v60_v44  ;;  %v30_v56 = vld [vmem:[%s904_s1 + $0x40] sm:$0xff]  ;;  %v31_v57 = vld [vmem:[%s904_s1 + $0x48] sm:$0xff]  ;;  %v537_v59 = vpack.c.bf16 %v79_v53, %v78_v52  ;;  %v48_v61 = vld [vmem:[%s904_s1 + $0xd0] sm:$0xff] }
   0xe   :  { %502 = vmatprep.subr.bf16.mxu0 %v501_v39  ;;  %v62_v58 = vld [vmem:[%s904_s1 + $0x140] sm:$0xff]  ;;  %v63_v60 = vld [vmem:[%s904_s1 + $0x148] sm:$0xff]  ;;  %v49_v62 = vld [vmem:[%s904_s1 + $0xd8] sm:$0xff]  ;;  %v507_v3 = vpack.c.bf16 %v31_v57, %v30_v56 }
   0xf   :  { %532 = vmatpush3.bf16.msra.mxu1 %v531_v38  ;;  %v80_v1 = vld [vmem:[%s904_s1 + $0x1d0] sm:$0xff]  ;;  %v81_v2 = vld [vmem:[%s904_s1 + $0x1d8] sm:$0xff]  ;;  %v539_v4 = vpack.c.bf16 %v63_v60, %v62_v58  ;;  %v509_v5 = vpack.c.bf16 %v49_v62, %v48_v61  ;;  %v50_v11 = vld [vmem:[%s904_s1 + $0xe0] sm:$0xff] }
  0x10   :  { %534 = vmatprep.subr.bf16.mxu1 %v533_v43  ;;  %v32_v6 = vld [vmem:[%s904_s1 + $0x50] sm:$0xff]  ;;  %v33_v7 = vld [vmem:[%s904_s1 + $0x58] sm:$0xff]  ;;  %v541_v9 = vpack.c.bf16 %v81_v2, %v80_v1  ;;  %v51_v12 = vld [vmem:[%s904_s1 + $0xe8] sm:$0xff] }
  0x11   :  { %504 = vmatpush3.bf16.msra.mxu0 %v503_v51  ;;  %v64_v8 = vld [vmem:[%s904_s1 + $0x150] sm:$0xff]  ;;  %v65_v10 = vld [vmem:[%s904_s1 + $0x158] sm:$0xff]  ;;  %v82_v14 = vld [vmem:[%s904_s1 + $0x1e0] sm:$0xff]  ;;  %v511_v16 = vpack.c.bf16 %v33_v7, %v32_v6  ;;  %v513_v19 = vpack.c.bf16 %v51_v12, %v50_v11 }
  0x12   :  { %506 = vmatprep.subr.bf16.mxu0 %v505_v55  ;;  %v83_v15 = vld [vmem:[%s904_s1 + $0x1e8] sm:$0xff]  ;;  %v34_v17 = vld [vmem:[%s904_s1 + $0x60] sm:$0xff]  ;;  %v543_v18 = vpack.c.bf16 %v65_v10, %v64_v8  ;;  %v52_v25 = vld [vmem:[%s904_s1 + $0xf0] sm:$0xff] }
  0x13   :  { %536 = vmatpush3.bf16.msra.mxu1 %v535_v54  ;;  %v35_v20 = vld [vmem:[%s904_s1 + $0x68] sm:$0xff]  ;;  %v66_v21 = vld [vmem:[%s904_s1 + $0x160] sm:$0xff]  ;;  %v545_v23 = vpack.c.bf16 %v83_v15, %v82_v14  ;;  %v53_v26 = vld [vmem:[%s904_s1 + $0xf8] sm:$0xff] }
  0x14   :  { %538 = vmatprep.subr.bf16.mxu1 %v537_v59  ;;  %v21_v22 = vld [vmem:[%s903_s0] sm:$0xff]  ;;  %v67_v24 = vld [vmem:[%s904_s1 + $0x168] sm:$0xff]  ;;  %v84_v29 = vld [vmem:[%s904_s1 + $0x1f0] sm:$0xff]  ;;  %v515_v31 = vpack.c.bf16 %v35_v20, %v34_v17  ;;  %v517_v35 = vpack.c.bf16 %v53_v26, %v52_v25 }
  0x15   :  { %508 = vmatpush3.bf16.msra.mxu0 %v507_v3  ;;  %v101_v27 = vrot.slane %v21_v22, %v100_v13  ;;  %v94_v28 = vcombine.high %v21_v22, %v21_v22  ;;  %v85_v30 = vld [vmem:[%s904_s1 + $0x1f8] sm:$0xff]  ;;  %v547_v34 = vpack.c.bf16 %v67_v24, %v66_v21  ;;  %v36_v36 = vld [vmem:[%s904_s1 + $0x70] sm:$0xff] }
  0x16   :  { %510 = vmatprep.subr.bf16.mxu0 %v509_v5  ;;  %v37_v37 = vld [vmem:[%s904_s1 + $0x78] sm:$0xff] }
  0x17   :  { %540 = vmatpush3.bf16.msra.mxu1 %v539_v4  ;;  %v109_v32 = vcombine.high %v101_v27, %v101_v27  ;;  %v108_v33 = vrot.slane %v94_v28, %v100_v13 }
  0x18   :  { %542 = vmatprep.subr.bf16.mxu1 %v541_v9 }
  0x19   :  { %512 = vmatpush3.bf16.msra.mxu0 %v511_v16 }
  0x1a   :  { %514 = vmatprep.subr.bf16.mxu0 %v513_v19 }
  0x1b   :  { %544 = vmatpush3.bf16.msra.mxu1 %v543_v18 }
  0x1c   :  { %10 = vsyncpa [#allocation3], 0  ;;  %546 = vmatprep.subr.bf16.mxu1 %v545_v23  ;;  %v549_v38 = vpack.c.bf16 %v85_v30, %v84_v29  ;;  %v68_v39 = vld [vmem:[%s904_s1 + $0x170] sm:$0xff]  ;;  %v69_v40 = vld [vmem:[%s904_s1 + $0x178] sm:$0xff]  ;;  %179 = vmatprep.mubr.f32.mxu0 %v109_v32  ;;  %v110_v41 = vcombine.high %v108_v33, %v108_v33  ;;  %v519_v42 = vpack.c.bf16 %v37_v37, %v36_v36  ;;  %v608_v47 = vmov 0.0|0.0   ;;  %s611_s29 = smov [#allocation2]  }
  0x1d   :  { %516 = vmatpush3.bf16.msra.mxu0 %v515_v31  ;;  %v551_v43 = vpack.c.bf16 %v69_v40, %v68_v39  ;;  %v256_v44 = vld [vmem:[%s906_s3] sm:$0xff]  ;;  %v257_v45 = vld [vmem:[%s906_s3 + $0x8] sm:$0xff]  ;;  %v258_v48 = vld [vmem:[%s906_s3 + $0x10] sm:$0xff]  ;;  %vm609_vm0 = vmmov 0   ;;  %v610_v5 = vmov 0.0   ;;  %s357_s30 = sshll.u32 %s611_s29, 4  ;;  %s358_s30 = int_to_ptr.vmem [resolvable:$true] %s357_s30 }
  0x1e   :  { %249 = vmatprep.mubr.f32.mxu1 %v110_v41  ;;  %518 = vmatprep.subr.bf16.mxu0 %v517_v35  ;;  %v554_v46 = vpack.c.bf16 %v257_v45, %v256_v44  ;;  %v259_v49 = vld [vmem:[%s906_s3 + $0x18] sm:$0xff]  ;;  %v260_v51 = vld [vmem:[%s906_s3 + $0x20] sm:$0xff]  ;;  %v261_v52 = vld [vmem:[%s906_s3 + $0x28] sm:$0xff]  ;;  %vm349_vm1 = vcmask 74752   ;;  %p588_p1 = scmp.lt.s32.totalorder %s358_s30, %s358_s30 }
  0x1f   :  { %548 = vmatpush3.bf16.msra.mxu1 %v547_v34  ;;  %v557_v50 = vpack.c.bf16 %v259_v49, %v258_v48  ;;  %v560_v53 = vpack.c.bf16 %v261_v52, %v260_v51  ;;  %v262_v54 = vld [vmem:[%s906_s3 + $0x30] sm:$0xff]  ;;  %v263_v55 = vld [vmem:[%s906_s3 + $0x38] sm:$0xff]  ;;  %v264_v57 = vld [vmem:[%s906_s3 + $0x40] sm:$0xff] }
  0x20   :  { %550 = vmatprep.subr.bf16.mxu1 %v549_v38  ;;  %v563_v56 = vpack.c.bf16 %v263_v55, %v262_v54  ;;  %v265_v58 = vld [vmem:[%s906_s3 + $0x48] sm:$0xff]  ;;  %v266_v60 = vld [vmem:[%s906_s3 + $0x50] sm:$0xff]  ;;  %v267_v61 = vld [vmem:[%s906_s3 + $0x58] sm:$0xff] }
  0x21   :  { %520 = vmatpush3.bf16.msra.mxu0 %v519_v42  ;;  %v566_v59 = vpack.c.bf16 %v265_v58, %v264_v57  ;;  %v569_v62 = vpack.c.bf16 %v267_v61, %v266_v60  ;;  %v268_v63 = vld [vmem:[%s906_s3 + $0x60] sm:$0xff]  ;;  %v269_v0 = vld [vmem:[%s906_s3 + $0x68] sm:$0xff]  ;;  %v270_v2 = vld [vmem:[%s906_s3 + $0x70] sm:$0xff] }
  0x22   :  { %553 = vmatprep.subr.bf16.mxu0 %v608_v47  ;;  %v572_v1 = vpack.c.bf16 %v269_v0, %v268_v63  ;;  %v271_v3 = vld [vmem:[%s906_s3 + $0x78] sm:$0xff]  ;;  %v365_v7 = vld [vmem:[%s905_s2] ss:$0 sm:$0xff]  ;;  %s583_s2 = scalar_lea.vmem %s358_s30, 32 }
  0x23   :  { %552 = vmatpush3.bf16.msra.mxu1 %v551_v43  ;;  %v575_v4 = vpack.c.bf16 %v271_v3, %v270_v2  ;;  %v366_v16 = vld [vmem:[%s907_s4] ss:$0 sm:$0xff]  ;;  %p584_p0 = scmp.ne.s32.totalorder %s358_s30, %s583_s2  ;;  %p589_p2 = scmp.lt.s32.totalorder %s583_s2, %s583_s2 }
  0x24   :  { %180 = vmatmul.mubr.f32.vlgmr.msra.gmra.mrb[0].mxu0 %v101_v27 }
  0x25   :  { %555 = vmatpush3.bf16.msra.mxu0 %v554_v46  ;;  %486 = vmatprep.mubr.msk.f32.mxu0 %vm609_vm0, %v610_v5  ;;  %p590_p3 = por %p589_p2, %p588_p1 }
  0x26   :  { %250 = vmatmul.mubr.f32.vlgmr.msra.gmra.mrb[0].mxu1 %v108_v33  ;;  %556 = vmatprep.subr.bf16.mxu0 %v608_v47 }
  0x27   :  { %p591_p4 = pnand %p590_p3, %p584_p0 }
  0x29   :  { %558 = vmatpush3.bf16.msra.mxu0 %v557_v50 }
  0x2a   :  { %559 = vmatprep.subr.bf16.mxu0 %v608_v47 }
  0x2d   :  { %561 = vmatpush3.bf16.msra.mxu0 %v560_v53 }
  0x2e   :  { %562 = vmatprep.subr.bf16.mxu0 %v608_v47 }
  0x31   :  { %564 = vmatpush3.bf16.msra.mxu0 %v563_v56 }
  0x32   :  { %565 = vmatprep.subr.bf16.mxu0 %v608_v47 }
  0x35   :  { %567 = vmatpush3.bf16.msra.mxu0 %v566_v59 }
  0x36   :  { %568 = vmatprep.subr.bf16.mxu0 %v608_v47 }
  0x39   :  { %570 = vmatpush3.bf16.msra.mxu0 %v569_v62 }
  0x3a   :  { %571 = vmatprep.subr.bf16.mxu0 %v608_v47 }
  0x3d   :  { %573 = vmatpush3.bf16.msra.mxu0 %v572_v1 }
  0x3e   :  { %574 = vmatprep.subr.bf16.mxu0 %v608_v47 }
  0x41   :  { %576 = vmatpush3.bf16.msra.mxu0 %v575_v4 }
  0xf7   :  { %v399_v6 = vpop.f32.mrb[0].mxu0 }
  0xf8   :  { %v400_v8 = vpop.f32.mrb[1].mxu0 }
  0xf9   :  { %v434_v9 = vpop.f32.mrb[0].mxu1  ;;  %v401_v10 = vadd.f32 %v400_v8, %v399_v6 }
  0xfa   :  { %v435_v11 = vpop.f32.mrb[1].mxu1 }
  0xfb   :  { %v436_v12 = vadd.f32 %v435_v11, %v434_v9  ;;  %v182_v13 = vadd.f32 %v401_v10, %v365_v7 }
  0xfd   :  { %v252_v14 = vadd.f32 %v436_v12, %v182_v13 }
  0xff   :  { %v255_v15 = vmax.f32 %v252_v14, 0.0 }
 0x101   :  { %487 = vmatmul.mubr.f32.vlgmr.msra.gmra.mrb[2].mxu0 %v255_v15 }
 0x1d4   :  { %v345_v17 = vpop.f32.mrb[2].mxu0 }
 0x1d5   :  { %v346_v18 = vadd.f32 %v366_v16, %v345_v17  ;;  %v488_v19 = vpop.f32.mrb[3].mxu0 }
 0x1d7   :  { %350 = vst.msk [vmem:[#allocation2] sm:$0x3] %vm349_vm1, %v346_v18 }
 0x1d8   :  { %594 = shalt.err (!%p591_p4)
}
 0x1d9   :  { %s595_s8 = scalar_lea.hbm %s908_s5, 32 }
 0x1da   :  { %p596_p5 = scmp.ne.s32.totalorder %s908_s5, %s595_s8  ;;  %p599_p6 = scmp.lt.u32.totalorder %s595_s8, %s908_s5 }
 0x1dc   :  { %p601_p7 = pnand %p599_p6, %p596_p5 }
 0x1de   :  { %604 = shalt.err (!%p601_p7)
}
 0x1df   :  { %360 = dma.vmem_to_hbm [thread:$0]  %s358_s30, 32, %s908_s5, [#allocation3]  }
 0x1e0   :  { %605 = dma.done.wait [#allocation3], 32  }
 0x1e1   :  { %606 = vsyncadd [#allocation3], 4294967264 }
 0x1e2   :  { %364 = vsyncpa [#allocation3], 1 }

// kernel: inception1d_forward.2
= control target key start
LH: loop header
LB: loop body
LE: loop exit
PB: predicated region body
PF: predicated region fallthrough
CT: control target
= control target key end

     0   :  { %s6462_s0 = inlined_call_operand.vmem [shape: bf16[32,4], index: 0, kind: input, shape index: {}]   ;;  %s6463_s1 = inlined_call_operand.vmem [shape: bf16[4,96], index: 1, kind: input, shape index: {}]   ;;  %s6464_s2 = inlined_call_operand.vmem [shape: f32[1,96], index: 2, kind: input, shape index: {}]   ;;  %s6465_s3 = inlined_call_operand.vmem [shape: bf16[96,32], index: 3, kind: input, shape index: {}]   ;;  %s6466_s4 = inlined_call_operand.hbm [shape: f32[1,32], index: 4, kind: input, shape index: {}]   ;;  %s6467_s5 = inlined_call_operand.vmem [shape: bf16[160,32], index: 5, kind: input, shape index: {}]   ;;  %s6468_s6 = inlined_call_operand.hbm [shape: f32[1,32], index: 6, kind: input, shape index: {}]   ;;  %s6469_s7 = inlined_call_operand.vmem [shape: bf16[4,32], index: 7, kind: input, shape index: {}]   ;;  %s6470_s8 = inlined_call_operand.hbm [shape: f32[1,32], index: 8, kind: input, shape index: {}]   ;;  %s6471_s9 = inlined_call_operand.vmem [shape: bf16[128,192], index: 9, kind: input, shape index: {}]   ;;  %s6472_s10 = inlined_call_operand.vmem [shape: f32[1,192], index: 10, kind: input, shape index: {}]   ;;  %s6473_s11 = inlined_call_operand.vmem [shape: bf16[192,64], index: 11, kind: input, shape index: {}]   ;;  %s6474_s12 = inlined_call_operand.hbm [shape: f32[1,64], index: 12, kind: input, shape index: {}]   ;;  %s6475_s13 = inlined_call_operand.vmem [shape: bf16[320,64], index: 13, kind: input, shape index: {}]   ;;  %s6476_s14 = inlined_call_operand.hbm [shape: f32[1,64], index: 14, kind: input, shape index: {}]   ;;  %s6477_s15 = inlined_call_operand.vmem [shape: bf16[128,64], index: 15, kind: input, shape index: {}]   ;;  %s6478_s16 = inlined_call_operand.hbm [shape: f32[1,64], index: 16, kind: input, shape index: {}]   ;;  %s6479_s17 = inlined_call_operand.vmem [shape: bf16[256,384], index: 17, kind: input, shape index: {}]   ;;  %s6480_s18 = inlined_call_operand.hbm [shape: f32[1,384], index: 18, kind: input, shape index: {}]   ;;  %s6481_s19 = inlined_call_operand.vmem [shape: bf16[384,128], index: 19, kind: input, shape index: {}]   ;;  %s6482_s20 = inlined_call_operand.hbm [shape: f32[1,128], index: 20, kind: input, shape index: {}]   ;;  %s6483_s21 = inlined_call_operand.vmem [shape: bf16[640,128], index: 21, kind: input, shape index: {}]   ;;  %s6484_s22 = inlined_call_operand.hbm [shape: f32[1,128], index: 22, kind: input, shape index: {}]   ;;  %s6485_s23 = inlined_call_operand.hbm [shape: bf16[256,128], index: 23, kind: input, shape index: {}]   ;;  %s6486_s24 = inlined_call_operand.hbm [shape: f32[1,128], index: 24, kind: input, shape index: {}]   ;;  %s6487_s25 = inlined_call_operand.vmem [shape: f32[2,1,512], index: 25, kind: output, shape index: {}]  }
   0x1   :  { %6500 = sst [smem:[#allocation26_spill]] %s6462_s0 }
   0x2   :  { %6501 = sst [smem:[#allocation27_spill]] %s6463_s1 }
   0x3   :  { %6502 = sst [smem:[#allocation28_spill]] %s6464_s2 }
   0x4   :  { %6503 = sst [smem:[#allocation29_spill]] %s6465_s3 }
   0x5   :  { %6504 = sst [smem:[#allocation30_spill]] %s6466_s4 }
   0x6   :  { %6505 = sst [smem:[#allocation31_spill]] %s6467_s5 }
   0x7   :  { %6506 = sst [smem:[#allocation32_spill]] %s6468_s6 }
   0x8   :  { %6507 = sst [smem:[#allocation33_spill]] %s6469_s7 }
   0x9   :  { %6508 = sst [smem:[#allocation34_spill]] %s6470_s8 }
   0xa   :  { %6509 = sst [smem:[#allocation35_spill]] %s6471_s9 }
   0xb   :  { %6510 = sst [smem:[#allocation36_spill]] %s6474_s12 }
   0xc   :  { %6511 = sst [smem:[#allocation37_spill]] %s6481_s19 }
   0xd   :  { %6512 = sst [smem:[#allocation38_spill]] %s6483_s21 }
   0xe   :  { %6513 = sst [smem:[#allocation39_spill]] %s6487_s25 }
   0xf   :  { %30 = vsyncpa [#allocation3], 0 }
  0x10   :  { %31 = vsyncpa [#allocation5], 0 }
  0x11   :  { %32 = vsyncpa [#allocation8], 0 }
  0x12   :  { %33 = vsyncpa [#allocation11], 0 }
  0x13   :  { %34 = vsyncpa [#allocation14], 0 }
  0x14   :  { %35 = vsyncpa [#allocation17], 0  ;;  %s5251_s29 = smov 0  }
  0x15 LB: > { %6514 = sst [smem:[#allocation25_spill]] %s5098_s29  ;;  %s5100_s2 = smov [#allocation4]   ;;  %s5098_s29 = sphi %s5251_s29, %s41_s29  }
  0x16   : > { %s638_s6 = sshll.u32 %s5100_s2, 4  ;;  %s5257_s30 = sadd.s32 4294967295, %s5098_s29   ;;  %s5262_s6 = int_to_ptr.vmem [resolvable:$true] %s638_s6 }
  0x17   : > { %p3874_p0 = scmp.ge.s32.totalorder %s5098_s29, 1  ;;  %p602_p1 = scmp.lt.s32.totalorder %s5098_s29, 3 }
  0x18   : > { %p6497_p2 = scmp.eq.s32.totalorder %s5257_s30, 0  ;;  %s5101_s3 = smov [#allocation7]  }
  0x19   : > { %p5264_p3 = pnand %p3874_p0, %p602_p1  ;;  %s672_s26 = sshll.u32 %s5101_s3, 4  ;;  %s5270_s26 = int_to_ptr.vmem [resolvable:$true] %s672_s26 }
  0x1a   : > { %s5102_s1 = smov [#allocation10]   ;;  %s5103_s4 = smov [#allocation13]  }
  0x1b   : > { %s6515_s7 = scalar_select %p5264_p3, 1, 0 }
  0x1c   : > { %p4450_p4 = pneg %p5264_p3  ;;  %s700_s8 = sshll.u32 %s5102_s1, 4  ;;  %s5278_s8 = int_to_ptr.vmem [resolvable:$true] %s700_s8 }
  0x1d   : > { %s728_s28 = sshll.u32 %s5103_s4, 4  ;;  %s6517_s0 = sld [smem:[#allocation32_spill]]  ;;  %s5280_s28 = int_to_ptr.vmem [resolvable:$true] %s728_s28 }
  0x1e   : > { %p5274_p5 = pnand %p6497_p2, %p4450_p4 }
  0x20   : > { %p5290_p7 = pneg %p5274_p5 }
  0x23   : > { %s4760_s2 = scalar_lea.hbm %s6517_s0, 16 }
  0x24   : > { %p4761_p6 = scmp.ne.s32.totalorder %s6517_s0, %s4760_s2  ;;  %p4767_p10 = scmp.lt.u32.totalorder %s4760_s2, %s6517_s0 }
  0x26   : > { %p4763_p8 = pnand %p5290_p7, %p4761_p6 }
  0x28   : > { %p4764_p9 = pneg %p4763_p8 }
  0x2a   : > { %p4769_p11 = pnand %p4767_p10, %p4764_p9 }
  0x2c   : > { %4772 = shalt.err (!%p4769_p11)
}
  0x2d   : > { %s4773_s29 = scalar_lea.vmem %s5262_s6, 16  ;;  %s4780_s9 = scalar_lea.vmem %s5262_s6, 32 }
  0x2e   : > { %p4774_p12 = scmp.ne.s32.totalorder %s5262_s6, %s4773_s29  ;;  %p4781_p1 = scmp.lt.s32.totalorder %s5262_s6, %s5262_s6 }
  0x2f   : > { %p4782_p4 = scmp.lt.s32.totalorder %s4780_s9, %s4773_s29 }
  0x30   : > { %p4776_p13 = pnand %p4774_p12, %p5290_p7 }
  0x31   : > { %p4783_p6 = por %p4782_p4, %p4781_p1 }
  0x32   : > { %p4777_p0 = pneg %p4776_p13 }
  0x34   : > { %p4784_p8 = pnand %p4783_p6, %p4777_p0 }
  0x36   : > { %4787 = shalt.err (!%p4784_p8)
}
  0x37   : > { %4456 = dma.hbm_to_vmem [thread:$0]  (!%p5274_p5), %s6517_s0, 16, %s5262_s6, [#allocation5]  }
  0x38   : > { %s6519_s12 = sld [smem:[#allocation36_spill]] }
  0x3e   : > { %s4788_s4 = scalar_lea.hbm %s6519_s12, 16 }
  0x3f   : > { %p4789_p9 = scmp.ne.s32.totalorder %s6519_s12, %s4788_s4  ;;  %p4795_p12 = scmp.lt.u32.totalorder %s4788_s4, %s6519_s12 }
  0x41   : > { %p4791_p10 = pnand %p4789_p9, %p5290_p7 }
  0x43   : > { %p4792_p11 = pneg %p4791_p10 }
  0x45   : > { %p4797_p13 = pnand %p4795_p12, %p4792_p11 }
  0x47   : > { %4800 = shalt.err (!%p4797_p13)
}
  0x48   : > { %s4801_s6 = scalar_lea.vmem %s5270_s26, 16  ;;  %s4808_s19 = scalar_lea.vmem %s5270_s26, 32 }
  0x49   : > { %p4802_p0 = scmp.ne.s32.totalorder %s5270_s26, %s4801_s6  ;;  %p4809_p6 = scmp.lt.s32.totalorder %s5270_s26, %s5270_s26 }
  0x4a   : > { %p4810_p8 = scmp.lt.s32.totalorder %s4808_s19, %s4801_s6 }
  0x4b   : > { %p4804_p1 = pnand %p4802_p0, %p5290_p7 }
  0x4c   : > { %p4811_p9 = por %p4810_p8, %p4809_p6 }
  0x4d   : > { %p4805_p4 = pneg %p4804_p1 }
  0x4f   : > { %p4812_p10 = pnand %p4811_p9, %p4805_p4 }
  0x51   : > { %4815 = shalt.err (!%p4812_p10)
}
  0x52   : > { %4462 = dma.hbm_to_vmem [thread:$0]  (!%p5274_p5), %s6519_s12, 16, %s5270_s26, [#allocation8]  }
  0x53   : > { %s4816_s3 = scalar_lea.hbm %s6478_s16, 16 }
  0x54   : > { %p4817_p11 = scmp.ne.s32.totalorder %s6478_s16, %s4816_s3  ;;  %p4823_p0 = scmp.lt.u32.totalorder %s4816_s3, %s6478_s16 }
  0x56   : > { %p4819_p12 = pnand %p4817_p11, %p5290_p7 }
  0x58   : > { %p4820_p13 = pneg %p4819_p12 }
  0x5a   : > { %p4825_p1 = pnand %p4823_p0, %p4820_p13 }
  0x5c   : > { %4828 = shalt.err (!%p4825_p1)
}
  0x5d   : > { %s4829_s26 = scalar_lea.vmem %s5278_s8, 16  ;;  %s4836_s19 = scalar_lea.vmem %s5278_s8, 32 }
  0x5e   : > { %p4830_p4 = scmp.ne.s32.totalorder %s5278_s8, %s4829_s26  ;;  %p4837_p9 = scmp.lt.s32.totalorder %s5278_s8, %s5278_s8 }
  0x5f   : > { %p4838_p10 = scmp.lt.s32.totalorder %s4836_s19, %s4829_s26 }
  0x60   : > { %p4832_p6 = pnand %p4830_p4, %p5290_p7 }
  0x61   : > { %p4839_p11 = por %p4838_p10, %p4837_p9 }
  0x62   : > { %p4833_p8 = pneg %p4832_p6 }
  0x64   : > { %p4840_p12 = pnand %p4839_p11, %p4833_p8 }
  0x66   : > { %4843 = shalt.err (!%p4840_p12)
}
  0x67   : > { %4468 = dma.hbm_to_vmem [thread:$0]  (!%p5274_p5), %s6478_s16, 16, %s5278_s8, [#allocation11]  }
  0x68   : > { %s4844_s3 = scalar_lea.hbm %s6482_s20, 16 }
  0x69   : > { %p4845_p13 = scmp.ne.s32.totalorder %s6482_s20, %s4844_s3  ;;  %p4851_p4 = scmp.lt.u32.totalorder %s4844_s3, %s6482_s20 }
  0x6b   : > { %p4847_p0 = pnand %p4845_p13, %p5290_p7 }
  0x6d   : > { %p4848_p1 = pneg %p4847_p0 }
  0x6f   : > { %p4853_p6 = pnand %p4851_p4, %p4848_p1 }
  0x71   : > { %4856 = shalt.err (!%p4853_p6)
}
  0x72   : > { %s4857_s8 = scalar_lea.vmem %s5280_s28, 16  ;;  %s4864_s26 = scalar_lea.vmem %s5280_s28, 32 }
  0x73   : > { %p4858_p8 = scmp.ne.s32.totalorder %s5280_s28, %s4857_s8  ;;  %p4865_p11 = scmp.lt.s32.totalorder %s5280_s28, %s5280_s28 }
  0x74   : > { %p4866_p12 = scmp.lt.s32.totalorder %s4864_s26, %s4857_s8 }
  0x75   : > { %p4860_p9 = pnand %p4858_p8, %p5290_p7 }
  0x76   : > { %p4867_p13 = por %p4866_p12, %p4865_p11 }
  0x77   : > { %p4861_p10 = pneg %p4860_p9 }
  0x79   : > { %p4868_p0 = pnand %p4867_p13, %p4861_p10 }
  0x7b   : > { %4871 = shalt.err (!%p4868_p0)
}
  0x7c   : > { %4474 = dma.hbm_to_vmem [thread:$0]  (!%p5274_p5), %s6482_s20, 16, %s5280_s28, [#allocation14]  }
  0x7d   : > { %s5104_s25 = smov [#allocation16]   ;;  %s4872_s4 = scalar_lea.hbm %s6485_s23, 2048 }
  0x7e   : > { %s752_s5 = sshll.u32 %s5104_s25, 4  ;;  %p4873_p1 = scmp.ne.s32.totalorder %s6485_s23, %s4872_s4  ;;  %s753_s5 = int_to_ptr.vmem [resolvable:$true] %s752_s5 }
  0x7f   : > { %p4879_p8 = scmp.lt.u32.totalorder %s4872_s4, %s6485_s23 }
  0x80   : > { %p4875_p4 = pnand %p4873_p1, %p5290_p7 }
  0x82   : > { %p4876_p6 = pneg %p4875_p4 }
  0x84   : > { %p4881_p9 = pnand %p4879_p8, %p4876_p6 }
  0x86   : > { %4884 = shalt.err (!%p4881_p9)
}
  0x87   : > { %s4885_s28 = scalar_lea.vmem %s753_s5, 2048  ;;  %p4893_p13 = scmp.lt.s32.totalorder %s753_s5, %s753_s5 }
  0x88   : > { %p4886_p10 = scmp.ne.s32.totalorder %s753_s5, %s4885_s28  ;;  %p4894_p0 = scmp.lt.s32.totalorder %s4885_s28, %s4885_s28 }
  0x8a   : > { %p4888_p11 = pnand %p4886_p10, %p5290_p7  ;;  %p4895_p2 = por %p4894_p0, %p4893_p13 }
  0x8c   : > { %p4889_p12 = pneg %p4888_p11 }
  0x8e   : > { %p4896_p3 = pnand %p4895_p2, %p4889_p12 }
  0x90   : > { %4899 = shalt.err (!%p4896_p3)
}
  0x91   : > { %s5105_s26 = smov 64   ;;  %s5106_s19 = smov 4  }
  0x92   : > { %4480 = dma.hbm_to_vmem [thread:$0]  (!%p5274_p5), %s6485_s23, 2048, %s753_s5, [#allocation17], %s5105_s26, %s5105_s26, %s5106_s19  }
  0x93   : > { %s5107_s2 = smov [#allocation2]   ;;  %s5108_s4 = smov [#allocation6]  }
  0x94   : > { %s624_s3 = sshll.u32 %s5107_s2, 4  ;;  %s652_s29 = sshll.u32 %s5108_s4, 4  ;;  %s625_s3 = int_to_ptr.vmem [resolvable:$true] %s624_s3  ;;  %s5402_s29 = int_to_ptr.vmem [resolvable:$true] %s652_s29 }
  0x95   : > { %s6520_s8 = sld [smem:[#allocation30_spill]] }
  0x9b   : > { %s4900_s28 = scalar_lea.hbm %s6520_s8, 16 }
  0x9c   : > { %p4901_p2 = scmp.ne.s32.totalorder %s6520_s8, %s4900_s28  ;;  %p4907_p4 = scmp.lt.u32.totalorder %s4900_s28, %s6520_s8 }
  0x9e   : > { %p4903_p3 = pnand %p4901_p2, %p5290_p7 }
  0xa0   : > { %p4904_p1 = pneg %p4903_p3 }
  0xa2   : > { %p4909_p6 = pnand %p4907_p4, %p4904_p1 }
  0xa4   : > { %4912 = shalt.err (!%p4909_p6)
}
  0xa5   : > { %s4913_s26 = scalar_lea.vmem %s625_s3, 16  ;;  %s4920_s19 = scalar_lea.vmem %s625_s3, 32 }
  0xa6   : > { %p4914_p8 = scmp.ne.s32.totalorder %s625_s3, %s4913_s26  ;;  %p4921_p11 = scmp.lt.s32.totalorder %s625_s3, %s625_s3 }
  0xa7   : > { %p4922_p12 = scmp.lt.s32.totalorder %s4920_s19, %s4913_s26 }
  0xa8   : > { %p4916_p9 = pnand %p4914_p8, %p5290_p7 }
  0xa9   : > { %p4923_p13 = por %p4922_p12, %p4921_p11 }
  0xaa   : > { %p4917_p10 = pneg %p4916_p9 }
  0xac   : > { %p4924_p0 = pnand %p4923_p13, %p4917_p10 }
  0xae   : > { %4927 = shalt.err (!%p4924_p0)
}
  0xaf   : > { %4453 = dma.hbm_to_vmem [thread:$0]  (!%p5274_p5), %s6520_s8, 16, %s625_s3, [#allocation3]  }
  0xb0   : > { %s6521_s4 = sld [smem:[#allocation34_spill]] }
  0xb6   : > { %s4928_s9 = scalar_lea.hbm %s6521_s4, 16 }
  0xb7   : > { %p4929_p2 = scmp.ne.s32.totalorder %s6521_s4, %s4928_s9  ;;  %p4935_p4 = scmp.lt.u32.totalorder %s4928_s9, %s6521_s4 }
  0xb9   : > { %p4931_p3 = pnand %p4929_p2, %p5290_p7 }
  0xbb   : > { %p4932_p1 = pneg %p4931_p3 }
  0xbd   : > { %p4937_p6 = pnand %p4935_p4, %p4932_p1 }
  0xbf   : > { %4940 = shalt.err (!%p4937_p6)
}
  0xc0   : > { %s4941_s3 = scalar_lea.vmem %s5402_s29, 16  ;;  %s4948_s26 = scalar_lea.vmem %s5402_s29, 32 }
  0xc1   : > { %p4942_p8 = scmp.ne.s32.totalorder %s5402_s29, %s4941_s3  ;;  %p4949_p11 = scmp.lt.s32.totalorder %s5402_s29, %s5402_s29 }
  0xc2   : > { %p4950_p12 = scmp.lt.s32.totalorder %s4948_s26, %s4941_s3 }
  0xc3   : > { %p4944_p9 = pnand %p4942_p8, %p5290_p7 }
  0xc4   : > { %p4951_p13 = por %p4950_p12, %p4949_p11 }
  0xc5   : > { %p4945_p10 = pneg %p4944_p9 }
  0xc7   : > { %p4952_p0 = pnand %p4951_p13, %p4945_p10 }
  0xc9   : > { %4955 = shalt.err (!%p4952_p0)
}
  0xca   : > { %4459 = dma.hbm_to_vmem [thread:$0]  (!%p5274_p5), %s6521_s4, 16, %s5402_s29, [#allocation5]  }
  0xcb   : > { %s5109_s0 = smov [#allocation9]   ;;  %s5110_s2 = smov [#allocation12]  }
  0xcc   : > { %s686_s25 = sshll.u32 %s5109_s0, 4  ;;  %s714_s9 = sshll.u32 %s5110_s2, 4  ;;  %s687_s25 = int_to_ptr.vmem [resolvable:$true] %s686_s25  ;;  %s5446_s9 = int_to_ptr.vmem [resolvable:$true] %s714_s9 }
  0xcd   : > { %s4956_s21 = scalar_lea.hbm %s6476_s14, 16 }
  0xce   : > { %p4957_p2 = scmp.ne.s32.totalorder %s6476_s14, %s4956_s21  ;;  %p4963_p4 = scmp.lt.u32.totalorder %s4956_s21, %s6476_s14 }
  0xd0   : > { %p4959_p3 = pnand %p4957_p2, %p5290_p7 }
  0xd2   : > { %p4960_p1 = pneg %p4959_p3 }
  0xd4   : > { %p4965_p6 = pnand %p4963_p4, %p4960_p1 }
  0xd6   : > { %4968 = shalt.err (!%p4965_p6)
}
  0xd7   : > { %s4969_s19 = scalar_lea.vmem %s687_s25, 16  ;;  %s4976_s12 = scalar_lea.vmem %s687_s25, 32 }
  0xd8   : > { %p4970_p8 = scmp.ne.s32.totalorder %s687_s25, %s4969_s19  ;;  %p4977_p11 = scmp.lt.s32.totalorder %s687_s25, %s687_s25 }
  0xd9   : > { %p4978_p12 = scmp.lt.s32.totalorder %s4976_s12, %s4969_s19 }
  0xda   : > { %p4972_p9 = pnand %p4970_p8, %p5290_p7 }
  0xdb   : > { %p4979_p13 = por %p4978_p12, %p4977_p11 }
  0xdc   : > { %p4973_p10 = pneg %p4972_p9 }
  0xde   : > { %p4980_p0 = pnand %p4979_p13, %p4973_p10 }
  0xe0   : > { %4983 = shalt.err (!%p4980_p0)
}
  0xe1   : > { %4465 = dma.hbm_to_vmem [thread:$0]  (!%p5274_p5), %s6476_s14, 16, %s687_s25, [#allocation8]  }
  0xe2   : > { %s4984_s21 = scalar_lea.hbm %s6480_s18, 48 }
  0xe3   : > { %p4985_p2 = scmp.ne.s32.totalorder %s6480_s18, %s4984_s21  ;;  %p4991_p4 = scmp.lt.u32.totalorder %s4984_s21, %s6480_s18 }
  0xe5   : > { %p4987_p3 = pnand %p4985_p2, %p5290_p7 }
  0xe7   : > { %p4988_p1 = pneg %p4987_p3 }
  0xe9   : > { %p4993_p6 = pnand %p4991_p4, %p4988_p1 }
  0xeb   : > { %4996 = shalt.err (!%p4993_p6)
}
  0xec   : > { %s4997_s25 = scalar_lea.vmem %s5446_s9, 48  ;;  %s5004_s19 = scalar_lea.vmem %s5446_s9, 64 }
  0xed   : > { %p4998_p8 = scmp.ne.s32.totalorder %s5446_s9, %s4997_s25  ;;  %p5005_p11 = scmp.lt.s32.totalorder %s5446_s9, %s5446_s9 }
  0xee   : > { %p5006_p12 = scmp.lt.s32.totalorder %s5004_s19, %s4997_s25 }
  0xef   : > { %p5000_p9 = pnand %p4998_p8, %p5290_p7 }
  0xf0   : > { %p5007_p13 = por %p5006_p12, %p5005_p11 }
  0xf1   : > { %p5001_p10 = pneg %p5000_p9 }
  0xf3   : > { %p5008_p0 = pnand %p5007_p13, %p5001_p10 }
  0xf5   : > { %5011 = shalt.err (!%p5008_p0)
}
  0xf6   : > { %4471 = dma.hbm_to_vmem [thread:$0]  (!%p5274_p5), %s6480_s18, 48, %s5446_s9, [#allocation11]  }
  0xf7   : > { %s5111_s2 = smov [#allocation15]   ;;  %s5112_s28 = smov [#allocation18]  }
  0xf8   : > { %s742_s6 = sshll.u32 %s5111_s2, 4  ;;  %s766_s21 = sshll.u32 %s5112_s28, 4  ;;  %s743_s6 = int_to_ptr.vmem [resolvable:$true] %s742_s6  ;;  %s5490_s21 = int_to_ptr.vmem [resolvable:$true] %s766_s21 }
  0xf9   : > { %s5012_s26 = scalar_lea.hbm %s6484_s22, 16 }
  0xfa   : > { %p5013_p2 = scmp.ne.s32.totalorder %s6484_s22, %s5012_s26  ;;  %p5019_p4 = scmp.lt.u32.totalorder %s5012_s26, %s6484_s22 }
  0xfc   : > { %p5015_p3 = pnand %p5013_p2, %p5290_p7 }
  0xfe   : > { %p5016_p1 = pneg %p5015_p3 }
 0x100   : > { %p5021_p6 = pnand %p5019_p4, %p5016_p1 }
 0x102   : > { %5024 = shalt.err (!%p5021_p6)
}
 0x103   : > { %s5025_s12 = scalar_lea.vmem %s743_s6, 16  ;;  %s5032_s0 = scalar_lea.vmem %s743_s6, 32 }
 0x104   : > { %p5026_p8 = scmp.ne.s32.totalorder %s743_s6, %s5025_s12  ;;  %p5033_p11 = scmp.lt.s32.totalorder %s743_s6, %s743_s6 }
 0x105   : > { %p5034_p12 = scmp.lt.s32.totalorder %s5032_s0, %s5025_s12 }
 0x106   : > { %p5028_p9 = pnand %p5026_p8, %p5290_p7 }
 0x107   : > { %p5035_p13 = por %p5034_p12, %p5033_p11 }
 0x108   : > { %p5029_p10 = pneg %p5028_p9 }
 0x10a   : > { %p5036_p0 = pnand %p5035_p13, %p5029_p10 }
 0x10c   : > { %5039 = shalt.err (!%p5036_p0)
}
 0x10d   : > { %4477 = dma.hbm_to_vmem [thread:$0]  (!%p5274_p5), %s6484_s22, 16, %s743_s6, [#allocation14]  }
 0x10e   : > { %s5040_s26 = scalar_lea.hbm %s6486_s24, 16 }
 0x10f   : > { %p5041_p2 = scmp.ne.s32.totalorder %s6486_s24, %s5040_s26  ;;  %p5047_p4 = scmp.lt.u32.totalorder %s5040_s26, %s6486_s24 }
 0x111   : > { %p5043_p3 = pnand %p5041_p2, %p5290_p7 }
 0x113   : > { %p5044_p1 = pneg %p5043_p3 }
 0x115   : > { %p5049_p6 = pnand %p5047_p4, %p5044_p1 }
 0x117   : > { %5052 = shalt.err (!%p5049_p6)
}
 0x118   : > { %s5053_s6 = scalar_lea.vmem %s5490_s21, 16  ;;  %s5060_s12 = scalar_lea.vmem %s5490_s21, 32 }
 0x119   : > { %p5054_p8 = scmp.ne.s32.totalorder %s5490_s21, %s5053_s6  ;;  %p5061_p11 = scmp.lt.s32.totalorder %s5490_s21, %s5490_s21 }
 0x11a   : > { %p5062_p12 = scmp.lt.s32.totalorder %s5060_s12, %s5053_s6 }
 0x11b   : > { %p5056_p9 = pnand %p5054_p8, %p5290_p7 }
 0x11c   : > { %p5063_p13 = por %p5062_p12, %p5061_p11 }
 0x11d   : > { %p5057_p10 = pneg %p5056_p9 }
 0x11f   : > { %p5064_p0 = pnand %p5063_p13, %p5057_p10 }
 0x121   : > { %5067 = shalt.err (!%p5064_p0)
}
 0x122   : > { %4483 = dma.hbm_to_vmem [thread:$0]  (!%p5274_p5), %s6486_s24, 16, %s5490_s21, [#allocation17]  }
 0x123   : > { %p6522_p2 = scmp.ne.s32.totalorder %s6515_s7, 0 }
 0x124   : > { %p6523_p7 = scmp.eq.s32.totalorder (!%p6522_p2), %s5257_s30, 0 }
 0x125   : > { %788 = sbr.rel (%p6522_p2) target bundleno = 2384 (0x950), region = 120 }
 0x12c   : > { %5073 = dma.done.wait (%p6523_p7), [#allocation3], 16   ;;  %p6524_p3 = pmov %p6523_p7 }
 0x12e   : > { %5075 = vsyncadd (%p6524_p3), [#allocation3], 4294967280  ;;  %p6525_p1 = pmov %p6524_p3 }
 0x130   : > { %5077 = dma.done.wait (%p6525_p1), [#allocation5], 32   ;;  %p6526_p4 = pmov %p6525_p1 }
 0x131   : > { %p6527_p6 = pmov %p6525_p1 }
 0x132   : > { %5079 = vsyncadd (%p6526_p4), [#allocation5], 4294967264 }
 0x133   : > { %5081 = dma.done.wait (%p6527_p6), [#allocation8], 32   ;;  %p6528_p5 = pmov %p6525_p1 }
 0x134   : > { %p6529_p8 = pmov %p6525_p1 }
 0x135   : > { %5083 = vsyncadd (%p6528_p5), [#allocation8], 4294967264 }
 0x136   : > { %5085 = dma.done.wait (%p6529_p8), [#allocation11], 64   ;;  %p6530_p9 = pmov %p6525_p1 }
 0x137   : > { %p6531_p10 = pmov %p6525_p1 }
 0x138   : > { %5087 = vsyncadd (%p6530_p9), [#allocation11], 4294967232 }
 0x139   : > { %5089 = dma.done.wait (%p6531_p10), [#allocation14], 32   ;;  %p6532_p11 = pmov %p6525_p1 }
 0x13a   : > { %p6533_p12 = pmov %p6525_p1 }
 0x13b   : > { %5091 = vsyncadd (%p6532_p11), [#allocation14], 4294967264 }
 0x13c   : > { %5093 = dma.done.wait (%p6533_p12), [#allocation17], 2064   ;;  %p6534_p13 = pmov %p6525_p1 }
 0x13d   : > { %s3899_s7 = sshll.u32 %s5257_s30, 1  ;;  %v5113_v0 = vmov 0.0   ;;  %vm5114_vm0 = vmmov 0   ;;  %vm963_vm1 = vcmask 1041408   ;;  %s6535_s28 = sld [smem:[#allocation26_spill]]  ;;  %vm959_vm2 = vcmask 31744  }
 0x13e   : > { %5095 = vsyncadd (%p6534_p13), [#allocation17], 4294965232  ;;  %4306 = vmatprep.subr.bf16.mxu1 %v5113_v0  ;;  %4308 = vmatprep.mubr.msk.bf16.mxu1 %vm5114_vm0, %v5113_v0  ;;  %p896_p0 = scmp.lt.s32.totalorder %s3899_s7, 3  ;;  %s6536_s29 = sld [smem:[#allocation27_spill]]  ;;  %v5115_v4 = vmov 0   ;;  %v909_v9 = vlaneseq  ;;  %vm5116_vm5 = vmmov 1  }
 0x13f   : > { %1316 = vmatprep.subr.bf16.mxu0 %v5115_v4  ;;  %s6537_s9 = sld [smem:[#allocation29_spill]]  ;;  %vm1030_vm6 = vmpackc.low %vm5116_vm5, %vm5116_vm5  ;;  %vm1041_vm7 = vcmask 1047552   ;;  %vm1042_vm9 = vsmask.f32 7424  ;;  %s6541_s6 = sld [smem:[#allocation31_spill]]  ;;  %vm1197_vm13 = vcmask 1046528  }
 0x140   : > { %s6559_s7 = smov (!%p896_p0, %s3899_s7), 3  ;;  %v5596_v10 = vshrl.u32 %v909_v9, 7  ;;  %v5613_v27 = vsel %vm1030_vm6, 65537, %v5115_v4  ;;  %vm5619_vm11 = vmand %vm1041_vm7, %vm1042_vm9  ;;  %s5117_s2 = smov 64   ;;  %vm1022_vm5 = vsmask.f32 256 }
 0x141   : > { %s3900_s27 = sshll.u32 %s6559_s7, 2  ;;  %s5118_s7 = smov 32   ;;  %vm1064_vm9 = vcmask 523264  }
 0x142   : > { %v911_v11 = vadd.s32 8, %v5596_v10  ;;  %s5119_s21 = smov 96   ;;  %v920_v55 = vadd.s32 4294967295, %v5596_v10  ;;  %s6550_s25 = sld [smem:[#allocation33_spill]] }
 0x143   : > { %s899_s5 = scalar_lea.vmem %s6535_s28, %s3900_s27  ;;  %s6538_s28 = sld [smem:[#allocation28_spill]] }
 0x144   : > { %v946_v1 = vld [vmem:[%s6536_s29] sm:$0x3]  ;;  %v929_v12 = vadd.s32 1, %v911_v11  ;;  %v937_v21 = vadd.s32 2, %v911_v11  ;;  %vm922_vm15 = vcmp.ge.s32.totalorder %v920_v55, 0  ;;  %s6553_s0 = sld [smem:[#allocation35_spill]] }
 0x145   : > { %v965_v2 = vsel %vm963_vm1, %v946_v1, 0  ;;  %v5571_v3 = vld [vmem:[%s899_s5] sm:$0xff]   ;;  %v4537_v6 = vld [vmem:[%s6537_s9 + $0x8] sm:$0xff]   ;;  %v4538_v7 = vld [vmem:[%s6537_s9 + $0x10] sm:$0xff]   ;;  %s6555_s12 = sld [smem:[#allocation38_spill]]  ;;  %p901_p2 = scmp.lt.s32.totalorder %s5257_s30, 1 }
 0x146   : > { %4307 = vmatpush3.bf16.msra.mxu1 %v965_v2  ;;  %v4536_v5 = vld [vmem:[%s6537_s9] sm:$0xff]   ;;  %v4539_v8 = vld [vmem:[%s6537_s9 + $0x18] sm:$0xff]   ;;  %vm933_vm3 = vcmp.lt.s32.totalorder %v929_v12, 16  ;;  %v4541_v24 = vld [vmem:[%s6537_s9 + $0x28] sm:$0xff]   ;;  %vm941_vm8 = vcmp.lt.s32.totalorder %v937_v21, 16  ;;  %v1360_v57 = vshrl.u32 %v5571_v3, 16 }
 0x147   : > { %4312 = vmatprep.subr.bf16.mxu1 %v5113_v0  ;;  %v4540_v17 = vld [vmem:[%s6537_s9 + $0x20] sm:$0xff]   ;;  %vm1050_vm4 = vmpackc.low %vm933_vm3, %vm933_vm3  ;;  %v4543_v39 = vld [vmem:[%s6541_s6 + $0x8] sm:$0xff]   ;;  %v1363_v59 = vshll.u32 %v5571_v3, 16  ;;  %s6561_s30 = smov (!%p901_p2, %s5257_s30), 1  ;;  %s6556_s5 = sld [smem:[#allocation39_spill]] }
 0x148   : > { %v1052_v25 = vsel %vm1050_vm4, 65537, %v5115_v4  ;;  %vm1206_vm10 = vmpackc.low %vm941_vm8, %vm941_vm8  ;;  %v4542_v34 = vld [vmem:[%s6541_s6] sm:$0xff]   ;;  %v4544_v44 = vld [vmem:[%s6541_s6 + $0x10] sm:$0xff]   ;;  %v1362_v60 = vrot.slane %v1360_v57, 7  ;;  %vm1021_vm4 = vcmask 1040384   ;;  %vm1061_vm8 = vcmask 261120  }
 0x149   : > { %4309 = vmatmul.mubr.msk.bf16.vlgmr.msra.gmra.mrb[0].mxu1 %vm959_vm2, %v5571_v3  ;;  %v3902_v13 = vld [vmem:[%s6538_s28] ss:$0 sm:$0xff]  ;;  %v3906_v30 = vcombine.low %v5613_v27, %v1052_v25  ;;  %v1208_v38 = vsel %vm1206_vm10, 65537, %v5115_v4  ;;  %1317 = vmatpush1.bf16.msra.mxu0 %v4542_v34  ;;  %v4545_v48 = vld [vmem:[%s6541_s6 + $0x18] sm:$0xff]   ;;  %v4547_v51 = vld [vmem:[%s6541_s6 + $0x28] sm:$0xff]   ;;  %v1371_v1 = vrot.slane %v1363_v59, 1 }
 0x14a   : > { %4324 = vmatprep.mubr.msk.bf16.mxu1 %vm5114_vm0, %v5113_v0  ;;  %4313 = vmatpush3.bf16.msra.mxu1 %v4536_v5  ;;  %v3916_v43 = vcombine.low %v5613_v27, %v1208_v38  ;;  %v4546_v50 = vld [vmem:[%s6541_s6 + $0x20] sm:$0xff]   ;;  %v4548_v52 = vld [vmem:[%s6541_s6 + $0x30] sm:$0xff]   ;;  %v4549_v53 = vld [vmem:[%s6541_s6 + $0x38] sm:$0xff]   ;;  %v1365_v63 = vor.u32 %v1363_v59, %v1362_v60  ;;  %vm1122_vm10 = vcmask 785408   ;;  %s3901_s27 = sshll.u32 %s6561_s30, 2 }
 0x14b   : > { %4314 = vmatprep.subr.bf16.mxu1 %v5113_v0  ;;  %vm5626_vm12 = vcmp.ne.s16.totalorder %v3906_v30, 0  ;;  %1318 = vmatprep.subr.bf16.mxu0 %v5115_v4  ;;  %v4550_v54 = vld [vmem:[%s6541_s6 + $0x40] sm:$0xff]   ;;  %v4551_v56 = vld [vmem:[%s6541_s6 + $0x48] sm:$0xff]   ;;  %vm1029_vm3 = vmpackc.low %vm922_vm15, %vm922_vm15  ;;  %v1372_v12 = vor.u32 %v1371_v1, %v1360_v57 }
 0x14c   : > { %vm5651_vm14 = vcmp.ne.s16.totalorder %v3916_v43, 0  ;;  %v1031_v58 = vsel %vm1029_vm3, 65537, %v5115_v4  ;;  %vm5693_vm6 = vmand %vm1021_vm4, %vm1022_vm5  ;;  %v4555_v43 = vld [vmem:[%s6553_s0 + $0x10] ss:$8 sps:$4 sm:$0xff]   ;;  %v4566_v60 = vld [vmem:[%s6553_s0 + $0x44] ss:$8 sps:$4 sm:$0xff]  }
 0x14d   : > { %1319 = vmatpush1.bf16.msra.mxu0 %v4543_v39  ;;  %v3905_v61 = vcombine.low %v1031_v58, %v5613_v27  ;;  %v1367_v11 = vsel %vm5693_vm6, 4286644096, %v1365_v63  ;;  %v1374_v21 = vsel %vm5619_vm11, %v1372_v12, 4286644096  ;;  %v4561_v58 = vld [vmem:[%s6553_s0 + $0x30] ss:$8 sps:$4 sm:$0xff]  }
 0x14e   : > { %4315 = vmatpush3.bf16.msra.mxu1 %v4537_v6  ;;  %1320 = vmatprep.subr.bf16.mxu0 %v5115_v4  ;;  %v1375_v25 = vsel %vm5626_vm12, %v1374_v21, 4286644096  ;;  %v4758_v62 = vld [vmem:[%s6555_s12 + $0x138] sm:$0xff]  }
 0x14f   : > { %4316 = vmatprep.subr.bf16.mxu1 %v5113_v0  ;;  %vm5697_vm7 = vcmp.ne.s16.totalorder %v3905_v61, 0 }
 0x151   : > { %1321 = vmatpush1.bf16.msra.mxu0 %v4544_v44 }
 0x152   : > { %4317 = vmatpush3.bf16.msra.mxu1 %v4538_v7  ;;  %1322 = vmatprep.subr.bf16.mxu0 %v5115_v4 }
 0x153   : > { %4318 = vmatprep.subr.bf16.mxu1 %v5113_v0 }
 0x155   : > { %1323 = vmatpush1.bf16.msra.mxu0 %v4545_v48 }
 0x156   : > { %4319 = vmatpush3.bf16.msra.mxu1 %v4539_v8  ;;  %1324 = vmatprep.subr.bf16.mxu0 %v5115_v4 }
 0x157   : > { %4320 = vmatprep.subr.bf16.mxu1 %v5113_v0 }
 0x159   : > { %1325 = vmatpush1.bf16.msra.mxu0 %v4546_v50 }
 0x15a   : > { %4321 = vmatpush3.bf16.msra.mxu1 %v4540_v17  ;;  %1326 = vmatprep.subr.bf16.mxu0 %v5115_v4 }
 0x15b   : > { %4322 = vmatprep.subr.bf16.mxu1 %v5113_v0 }
 0x15d   : > { %1327 = vmatpush1.bf16.msra.mxu0 %v4547_v51 }
 0x15e   : > { %4323 = vmatpush3.bf16.msra.mxu1 %v4541_v24  ;;  %1328 = vmatprep.subr.bf16.mxu0 %v5115_v4 }
 0x15f   : > { %4328 = vmatprep.subr.bf16.mxu1 %v5113_v0 }
 0x161   : > { %1329 = vmatpush1.bf16.msra.mxu0 %v4548_v52  ;;  %v4558_v52 = vld [vmem:[%s6553_s0 + $0x20] ss:$8 sps:$4 sm:$0xff]  }
 0x162   : > { %1330 = vmatprep.subr.bf16.mxu0 %v5115_v4 }
 0x165   : > { %1331 = vmatpush1.bf16.msra.mxu0 %v4549_v53  ;;  %v4563_v53 = vld [vmem:[%s6553_s0 + $0x34] ss:$8 sps:$4 sm:$0xff]  }
 0x166   : > { %1332 = vmatprep.subr.bf16.mxu0 %v5115_v4 }
 0x169   : > { %1333 = vmatpush1.bf16.msra.mxu0 %v4550_v54 }
 0x16a   : > { %1334 = vmatprep.subr.bf16.mxu0 %v5115_v4 }
 0x16d   : > { %1335 = vmatpush1.bf16.msra.mxu0 %v4551_v56  ;;  %v3929_v56 = vld [vmem:[#allocation6] ss:$0 sm:$0xff] }
 0x16e   : > { %1737 = vmatprep.subr.bf16.mxu0 %v5115_v4 }
 0x21c   : > { %v1001_v14 = vpop.f32.mrb[0].mxu1 }
 0x21d   : > { %v1002_v15 = vadd.f32 %v3902_v13, %v1001_v14  ;;  %v4310_v16 = vpop.f32.mrb[1].mxu1 }
 0x21e   : > { %v1004_v18 = vpop.f32.mrb[2].mxu1 }
 0x21f   : > { %v1005_v19 = vadd.f32 %v3902_v13, %v1004_v18  ;;  %v4311_v20 = vpop.f32.mrb[3].mxu1  ;;  %v1008_v22 = vmax.f32 %v1002_v15, 0.0  ;;  %v1377_v13 = vld [vmem:[%s6550_s25] sm:$0x3]  ;;  %v1368_v18 = vsel %vm5697_vm7, %v1367_v11, 4286644096 }
 0x220   : > { %v4569_v11 = vld [vmem:[%s6553_s0 + $0x54] ss:$8 sps:$4 sm:$0xff]  }
 0x221   : > { %v1009_v23 = vmax.f32 %v1005_v19, 0.0  ;;  %v1389_v19 = vsel %vm963_vm1, %v1377_v13, 0 }
 0x223   : > { %v5610_v26 = vpack.c.bf16 %v1009_v23, %v1008_v22  ;;  %v1370_v23 = vmax.bf16 %v5571_v3, %v1368_v18  ;;  %v4573_v18 = vld [vmem:[%s6553_s0 + $0x70] ss:$8 sps:$4 sm:$0xff]  }
 0x225   : > { %v1012_v28 = vshrl.u32 %v5610_v26, 16  ;;  %v1015_v29 = vshll.u32 %v5610_v26, 16  ;;  %v1196_v42 = vrot.slane %v5610_v26, 1  ;;  %v1170_v45 = vrot.slane %v5610_v26, 7 }
 0x227   : > { %v1014_v31 = vrot.slane %v1012_v28, 7  ;;  %v1038_v32 = vrot.slane %v1015_v29, 1  ;;  %v1199_v46 = vsel %vm1197_vm13, %v1196_v42, 0  ;;  %v3907_v42 = vld [vmem:[#allocation2] ss:$0 sm:$0xff] }
 0x228   : > { %v1213_v49 = vsel %vm5651_vm14, %v1199_v46, 0 }
 0x229   : > { %v1017_v35 = vor.u32 %v1015_v29, %v1014_v31  ;;  %v1039_v36 = vor.u32 %v1038_v32, %v1012_v28  ;;  %v1376_v28 = vmax.bf16 %v1375_v25, %v1370_v23  ;;  %v912_v29 = vadd.s32 4294967294, %v5596_v10  ;;  %v4743_v31 = vld [vmem:[%s6555_s12 + $0x110] sm:$0xff]  }
 0x22b   : > { %1191 = vrot.lane.b32.xlu0 %v1017_v35, %s5117_s2  ;;  %v1044_v40 = vsel %vm5619_vm11, %v1039_v36, 0  ;;  %vm914_vm1 = vcmp.ge.s32.totalorder %v912_v29, 0 }
 0x22c   : > { %v1057_v41 = vsel %vm5626_vm12, %v1044_v40, 0  ;;  %vm1182_vm15 = vmpackc.low %vm914_vm1, %vm914_vm1  ;;  %v4554_v40 = vld [vmem:[%s6553_s0 + $0x4] ss:$8 sps:$4 sm:$0xff]  }
 0x22d   : > { %1059 = vrot.lane.b32.xlu1 %v1057_v41, %s5118_s7  ;;  %v1184_v3 = vsel %vm1182_vm15, 65537, %v5115_v4  ;;  %v4557_v41 = vld [vmem:[%s6553_s0 + $0x14] ss:$8 sps:$4 sm:$0xff]  }
 0x22e   : > { %v3915_v30 = vcombine.low %v1184_v3, %v5613_v27  ;;  %v4552_v27 = vld [vmem:[%s6553_s0] ss:$8 sps:$4 sm:$0xff]  }
 0x22f   : > { %1018 = vrot.lane.b32.xlu0 %v1017_v35, %s5119_s21 }
 0x230   : > { %vm5735_vm3 = vcmp.ne.s16.totalorder %v3915_v30, 0 }
 0x231   : > { %1171 = vrot.lane.b32.xlu1 %v1170_v45, %s5117_s2  ;;  %v4560_v45 = vld [vmem:[%s6553_s0 + $0x24] ss:$8 sps:$4 sm:$0xff]  }
 0x235   : > { %1218 = vrot.lane.b32.xlu1 %v1213_v49, %s5117_s2 }
 0x29d   : > { %v1192_v5 = vpop.permute.xlu0 %1191 }
 0x29e   : > { %v1194_v6 = vsel %vm5693_vm6, 0, %v1192_v5 }
 0x29f   : > { %v1195_v7 = vsel %vm5697_vm7, %v1194_v6, 0  ;;  %v1060_v8 = vpop.permute.xlu1 %1059 }
 0x2a0   : > { %1215 = vrot.lane.b32.xlu0 %v1195_v7, %s5118_s7 }
 0x2a1   : > { %v1019_v14 = vpop.permute.xlu0 %1018 }
 0x2a2   : > { %v1024_v15 = vsel %vm5693_vm6, 0, %v1019_v14  ;;  %v4567_v14 = vld [vmem:[%s6553_s0 + $0x50] ss:$8 sps:$4 sm:$0xff]  }
 0x2a3   : > { %v1037_v16 = vsel %vm5697_vm7, %v1024_v15, 0  ;;  %v1172_v17 = vpop.permute.xlu1 %1171  ;;  %v4572_v15 = vld [vmem:[%s6553_s0 + $0x64] ss:$8 sps:$4 sm:$0xff]  }
 0x2a4   : > { %v1063_v20 = vsel %vm1061_vm8, %v1037_v16, %v5610_v26  ;;  %v1176_v32 = vsel %vm1021_vm4, 0, %v1172_v17  ;;  %v4570_v16 = vld [vmem:[%s6553_s0 + $0x60] ss:$8 sps:$4 sm:$0xff]   ;;  %v4575_v17 = vld [vmem:[%s6553_s0 + $0x74] ss:$8 sps:$4 sm:$0xff]  }
 0x2a5   : > { %v1066_v22 = vsel %vm1064_vm9, %v1063_v20, %v1060_v8  ;;  %v1190_v34 = vsel %vm5735_vm3, %v1176_v32, 0 }
 0x2a6   : > { %4325 = vmatmul.mubr.msk.bf16.vlgmr.msra.gmra.mrb[4].mxu1 %vm1122_vm10, %v1066_v22 }
 0x2a7   : > { %v1219_v24 = vpop.permute.xlu1 %1218  ;;  %4329 = vmatpush3.bf16.msra.mxu1 %v1389_v19  ;;  %4330 = vmatprep.mubr.msk.bf16.mxu1 %vm5114_vm0, %v5113_v0  ;;  %v3917_v19 = vld [vmem:[#allocation4] ss:$0 sm:$0xff] }
 0x2a8   : > { %3928 = vmatprep.mubr.msk.bf16.mxu0 %vm1061_vm8, %v1219_v24  ;;  %1559 = vmatprep.subr.bf16.mxu1 %v4554_v40  ;;  %v4577_v40 = vld [vmem:[%s6473_s11 + $0x8] sm:$0xff]  }
 0x2ae   : > { %4331 = vmatmul.mubr.msk.bf16.vlgmr.msra.gmra.mrb[8].mxu1 %vm959_vm2, %v1376_v28 }
 0x2af   : > { %1591 = vmatprep.mubr.bf16.mxu1 %v5115_v4  ;;  %1560 = vmatpush1.bf16.msra.mxu1 %v4552_v27  ;;  %v4579_v27 = vld [vmem:[%s6475_s13 + $0x40] sm:$0xff]  }
 0x2b0   : > { %1561 = vmatprep.subr.bf16.mxu1 %v4557_v41  ;;  %v4582_v41 = vld [vmem:[%s6475_s13 + $0x48] sm:$0xff]  }
 0x2b3   : > { %1562 = vmatpush1.bf16.msra.mxu1 %v4555_v43  ;;  %v4585_v43 = vld [vmem:[%s6475_s13 + $0x50] sm:$0xff]  }
 0x2b4   : > { %1563 = vmatprep.subr.bf16.mxu1 %v4560_v45  ;;  %v4586_v45 = vld [vmem:[%s6475_s13 + $0x10] sm:$0xff]  }
 0x2b7   : > { %1564 = vmatpush1.bf16.msra.mxu1 %v4558_v52  ;;  %v4592_v52 = vld [vmem:[%s6475_s13 + $0x20] sm:$0xff]  }
 0x2b8   : > { %1565 = vmatprep.subr.bf16.mxu1 %v4563_v53  ;;  %v4594_v53 = vld [vmem:[%s6475_s13 + $0x68] sm:$0xff]  }
 0x2bb   : > { %1566 = vmatpush1.bf16.msra.mxu1 %v4561_v58  ;;  %v4598_v58 = vld [vmem:[%s6475_s13 + $0x30] sm:$0xff]  }
 0x2bc   : > { %1567 = vmatprep.subr.bf16.mxu1 %v4566_v60  ;;  %v4593_v60 = vld [vmem:[%s6473_s11 + $0x38] sm:$0xff]  }
 0x312   : > { %v1216_v35 = vpop.permute.xlu0 %1215 }
 0x313   : > { %v1222_v36 = vsel %vm1061_vm8, %v1190_v34, %v1216_v35 }
 0x314   : > { %v1223_v38 = vsel %vm1064_vm9, %v1222_v36, %v5610_v26 }
 0x315   : > { %v1224_v39 = vsel %vm1122_vm10, %v1223_v38, %v1060_v8  ;;  %v4564_v8 = vld [vmem:[%s6553_s0 + $0x40] ss:$8 sps:$4 sm:$0xff]  }
 0x316   : > { %1349 = vmatmul.mubr.bf16.vlgmr.msra.gmra.mrb[0].mxu0 %v1224_v39  ;;  %1568 = vmatpush1.bf16.msra.mxu1 %v4564_v8  ;;  %v4576_v39 = vld [vmem:[%s6473_s11] sm:$0xff]   ;;  %v1475_v8 = vsub.s32 1, %v5596_v10 }
 0x317   : > { %1569 = vmatprep.subr.bf16.mxu1 %v4569_v11  ;;  %1738 = vmatpush1.bf16.msra.mxu0 %v4576_v39 }
 0x318   : > { %1739 = vmatprep.subr.bf16.mxu0 %v5115_v4 }
 0x31a   : > { %1570 = vmatpush1.bf16.msra.mxu1 %v4567_v14 }
 0x31b   : > { %1571 = vmatprep.subr.bf16.mxu1 %v4572_v15  ;;  %1740 = vmatpush1.bf16.msra.mxu0 %v4577_v40 }
 0x31c   : > { %1741 = vmatprep.subr.bf16.mxu0 %v5115_v4 }
 0x31e   : > { %1572 = vmatpush1.bf16.msra.mxu1 %v4570_v16 }
 0x31f   : > { %1573 = vmatprep.subr.bf16.mxu1 %v4575_v17 }
 0x322   : > { %1574 = vmatpush1.bf16.msra.mxu1 %v4573_v18 }
 0x323   : > { %4142 = vmatprep.subr.bf16.mxu1 %v4579_v27 }
 0x379   : > { %v1159_v44 = vpop.f32.mrb[4].mxu1 }
 0x37a   : > { %v1160_v46 = vadd.f32 %v3907_v42, %v1159_v44  ;;  %v4326_v48 = vpop.f32.mrb[5].mxu1  ;;  %v4578_v44 = vld [vmem:[%s6473_s11 + $0x10] sm:$0xff]  }
 0x37b   : > { %v1162_v49 = vpop.f32.mrb[6].mxu1  ;;  %1742 = vmatpush1.bf16.msra.mxu0 %v4578_v44  ;;  %v4581_v48 = vld [vmem:[%s6473_s11 + $0x18] sm:$0xff]  }
 0x37c   : > { %v1163_v50 = vadd.f32 %v3907_v42, %v1162_v49  ;;  %v4327_v51 = vpop.f32.mrb[7].mxu1  ;;  %v1166_v54 = vmax.f32 %v1160_v46, 0.0  ;;  %v4583_v42 = vld [vmem:[%s6475_s13 + $0x8] sm:$0xff]   ;;  %v4588_v46 = vld [vmem:[%s6475_s13 + $0x58] sm:$0xff]   ;;  %1743 = vmatprep.subr.bf16.mxu0 %v5115_v4 }
 0x37d   : > { %v4589_v49 = vld [vmem:[%s6475_s13 + $0x18] sm:$0xff]   ;;  %v4584_v51 = vld [vmem:[%s6473_s11 + $0x20] sm:$0xff]  }
 0x37e   : > { %v1167_v55 = vmax.f32 %v1163_v50, 0.0  ;;  %v4591_v50 = vld [vmem:[%s6475_s13 + $0x60] sm:$0xff]  }
 0x37f   : > { %1744 = vmatpush1.bf16.msra.mxu0 %v4581_v48 }
 0x380   : > { %v1168_v57 = vpack.c.bf16 %v1167_v55, %v1166_v54  ;;  %1745 = vmatprep.subr.bf16.mxu0 %v5115_v4  ;;  %v4587_v54 = vld [vmem:[%s6473_s11 + $0x28] sm:$0xff]  }
 0x381   : > { %v1425_v59 = vpop.f32.mrb[8].mxu1  ;;  %v4595_v55 = vld [vmem:[%s6475_s13 + $0x28] sm:$0xff]  }
 0x382   : > { %1436 = vrot.lane.b32.xlu0 %v1168_v57, %s5118_s7  ;;  %v1426_v61 = vadd.f32 %v3929_v56, %v1425_v59  ;;  %v4332_v63 = vpop.f32.mrb[9].mxu1  ;;  %v4590_v57 = vld [vmem:[%s6473_s11 + $0x30] sm:$0xff]   ;;  %v4600_v59 = vld [vmem:[%s6475_s13 + $0x78] sm:$0xff]  }
 0x383   : > { %v1428_v1 = vpop.f32.mrb[10].mxu1  ;;  %1746 = vmatpush1.bf16.msra.mxu0 %v4584_v51  ;;  %v4596_v63 = vld [vmem:[%s6473_s11 + $0x40] sm:$0xff]  }
 0x384   : > { %v1432_v5 = vmax.f32 %v1426_v61, 0.0  ;;  %v1429_v6 = vadd.f32 %v3929_v56, %v1428_v1  ;;  %v4333_v7 = vpop.f32.mrb[11].mxu1  ;;  %1747 = vmatprep.subr.bf16.mxu0 %v5115_v4  ;;  %v4597_v56 = vld [vmem:[%s6475_s13 + $0x70] sm:$0xff]   ;;  %v4601_v61 = vld [vmem:[%s6475_s13 + $0x38] sm:$0xff]   ;;  %v4599_v1 = vld [vmem:[%s6473_s11 + $0x48] sm:$0xff]  }
 0x385   : > { %v1467_v7 = vld [vmem:[%s6472_s10] sm:$0x3] }
 0x386   : > { %v1433_v12 = vmax.f32 %v1429_v6, 0.0  ;;  %v1471_v6 = vsub.s32 0, %v5596_v10 }
 0x387   : > { %1748 = vmatpush1.bf16.msra.mxu0 %v4587_v54  ;;  %v4603_v54 = vld [vmem:[%s6477_s15] sm:$0xff]  }
 0x388   : > { %v1434_v13 = vpack.c.bf16 %v1433_v12, %v1432_v5  ;;  %1749 = vmatprep.subr.bf16.mxu0 %v5115_v4  ;;  %v4602_v5 = vld [vmem:[%s6473_s11 + $0x50] sm:$0xff]   ;;  %v1472_v11 = vrot.slane %v1467_v7, %v1471_v6  ;;  %v1476_v12 = vrot.slane %v1467_v7, %v1475_v8  ;;  %v4608_v7 = vld [vmem:[%s6475_s13 + $0x88] sm:$0xff]  }
 0x38a   : > { %1442 = vrot.lane.b32.xlu0 %v1434_v13, %s5119_s21  ;;  %s6554_s21 = sld [smem:[#allocation37_spill]] }
 0x38b   : > { %1750 = vmatpush1.bf16.msra.mxu0 %v4590_v57 }
 0x38c   : > { %1751 = vmatprep.subr.bf16.mxu0 %v5115_v4 }
 0x38f   : > { %1752 = vmatpush1.bf16.msra.mxu0 %v4593_v60 }
 0x390   : > { %1753 = vmatprep.subr.bf16.mxu0 %v5115_v4 }
 0x393   : > { %1754 = vmatpush1.bf16.msra.mxu0 %v4596_v63 }
 0x394   : > { %1755 = vmatprep.subr.bf16.mxu0 %v5115_v4 }
 0x397   : > { %1756 = vmatpush1.bf16.msra.mxu0 %v4599_v1 }
 0x398   : > { %1757 = vmatprep.subr.bf16.mxu0 %v5115_v4 }
 0x39b   : > { %1758 = vmatpush1.bf16.msra.mxu0 %v4602_v5  ;;  %v4607_v5 = vld [vmem:[%s6477_s15 + $0x10] sm:$0xff]  }
 0x39c   : > { %1759 = vmatprep.subr.bf16.mxu0 %v5115_v4 }
 0x3e9   : > { %v1350_v20 = vpop.f32.mrb[0].mxu0 }
 0x3ea   : > { %v1351_v21 = vadd.f32 %v3917_v19, %v1350_v20  ;;  %v1352_v22 = vpop.f32.mrb[1].mxu0 }
 0x3eb   : > { %v1353_v23 = vpop.f32.mrb[2].mxu0 }
 0x3ec   : > { %v1354_v24 = vadd.f32 %v3917_v19, %v1353_v23  ;;  %v1355_v25 = vpop.f32.mrb[3].mxu0  ;;  %v1357_v28 = vmax.f32 %v1351_v21, 0.0 }
 0x3ed   : > { %v4604_v25 = vld [vmem:[%s6473_s11 + $0x58] sm:$0xff]  }
 0x3ee   : > { %v1358_v29 = vmax.f32 %v1354_v24, 0.0  ;;  %1760 = vmatpush1.bf16.msra.mxu0 %v4604_v25  ;;  %v4614_v25 = vld [vmem:[%s6477_s15 + $0x30] sm:$0xff]  }
 0x3ef   : > { %4334 = vmatprep.subr.bf16.mxu0 %v5113_v0 }
 0x3f0   : > { %v1359_v3 = vpack.c.bf16 %v1358_v29, %v1357_v28 }
 0x3f2   : > { %1439 = vrot.lane.b32.xlu1 %v1359_v3, %s5117_s2 }
 0x3f4   : > { %v1437_v30 = vpop.permute.xlu0 %1436 }
 0x3f5   : > { %v1445_v32 = vsel %vm1061_vm8, %v5610_v26, %v1437_v30  ;;  %v4580_v26 = vld [vmem:[%s6475_s13] sm:$0xff]  }
 0x3fc   : > { %v1443_v35 = vpop.permute.xlu0 %1442 }
 0x464   : > { %v1440_v34 = vpop.permute.xlu1 %1439 }
 0x465   : > { %v1447_v36 = vsel %vm1064_vm9, %v1445_v32, %v1440_v34 }
 0x466   : > { %v5801_v38 = vsel %vm1122_vm10, %v1447_v36, %v1443_v35 }
 0x467   : > { %1592 = vmatmul.mubr.bf16.vlgmr.msra.gmra.mrb[12].mxu1 %v5801_v38 }
 0x468   : > { %4143 = vmatpush3.bf16.msra.mxu1 %v4580_v26 }
 0x469   : > { %4144 = vmatprep.subr.bf16.mxu1 %v4582_v41 }
 0x46c   : > { %4145 = vmatpush3.bf16.msra.mxu1 %v4583_v42 }
 0x46d   : > { %4146 = vmatprep.subr.bf16.mxu1 %v4585_v43 }
 0x470   : > { %4147 = vmatpush3.bf16.msra.mxu1 %v4586_v45 }
 0x471   : > { %4148 = vmatprep.subr.bf16.mxu1 %v4588_v46 }
 0x474   : > { %4149 = vmatpush3.bf16.msra.mxu1 %v4589_v49 }
 0x475   : > { %4150 = vmatprep.subr.bf16.mxu1 %v4591_v50 }
 0x478   : > { %4151 = vmatpush3.bf16.msra.mxu1 %v4592_v52 }
 0x479   : > { %4152 = vmatprep.subr.bf16.mxu1 %v4594_v53 }
 0x47c   : > { %4153 = vmatpush3.bf16.msra.mxu1 %v4595_v55 }
 0x47d   : > { %4154 = vmatprep.subr.bf16.mxu1 %v4597_v56 }
 0x480   : > { %4155 = vmatpush3.bf16.msra.mxu1 %v4598_v58 }
 0x481   : > { %4156 = vmatprep.subr.bf16.mxu1 %v4600_v59  ;;  %v4605_v59 = vld [vmem:[%s6477_s15 + $0x8] sm:$0xff]  }
 0x484   : > { %4157 = vmatpush3.bf16.msra.mxu1 %v4601_v61  ;;  %v4606_v61 = vld [vmem:[%s6475_s13 + $0x80] sm:$0xff]  }
 0x485   : > { %4346 = vmatprep.subr.bf16.mxu1 %v5113_v0 }
 0x53a   : > { %v1593_v13 = vpop.f32.mrb[12].mxu1 }
 0x53b   : > { %v1594_v14 = vadd.f32 %v1593_v13, %v1472_v11  ;;  %v1595_v15 = vpop.f32.mrb[13].mxu1  ;;  %v4610_v13 = vld [vmem:[%s6475_s13 + $0x90] sm:$0xff]  }
 0x53c   : > { %v1596_v16 = vadd.f32 %v1595_v15, %v1476_v12  ;;  %v1597_v17 = vpop.f32.mrb[14].mxu1  ;;  %v4611_v15 = vld [vmem:[%s6477_s15 + $0x20] sm:$0xff]  }
 0x53d   : > { %v1598_v4 = vadd.f32 %v1597_v17, %v1472_v11  ;;  %v1599_v18 = vpop.f32.mrb[15].mxu1  ;;  %v1602_v20 = vmax.f32 %v1594_v14, 0.0  ;;  %v2075_v11 = vshrl.u32 %v5801_v38, 16  ;;  %v2078_v17 = vshll.u32 %v5801_v38, 16 }
 0x53e   : > { %v1600_v19 = vadd.f32 %v1599_v18, %v1476_v12  ;;  %v1603_v22 = vmax.f32 %v1596_v16, 0.0  ;;  %v4609_v12 = vld [vmem:[%s6477_s15 + $0x18] sm:$0xff]  }
 0x53f   : > { %v1604_v21 = vmax.f32 %v1598_v4, 0.0  ;;  %v2077_v14 = vrot.slane %v2075_v11, 7  ;;  %v4612_v4 = vld [vmem:[%s6475_s13 + $0x98] sm:$0xff]  }
 0x540   : > { %v1605_v23 = vmax.f32 %v1600_v19, 0.0 }
 0x541   : > { %v5906_v24 = vpack.c.bf16 %v1604_v21, %v1602_v20  ;;  %v2080_v18 = vor.u32 %v2078_v17, %v2077_v14  ;;  %v4613_v20 = vld [vmem:[%s6477_s15 + $0x28] sm:$0xff]   ;;  %v2085_v21 = vrot.slane %v2078_v17, 1 }
 0x542   : > { %v5911_v28 = vpack.c.bf16 %v1605_v23, %v1603_v22 }
 0x543   : > { %v1612_v29 = vshll.u32 %v5906_v24, 16  ;;  %v1609_v36 = vshrl.u32 %v5906_v24, 16  ;;  %v2082_v22 = vsel %vm5693_vm6, 4286644096, %v2080_v18 }
 0x544   : > { %v1788_v3 = vshrl.u32 %v5911_v28, 16  ;;  %v1791_v30 = vshll.u32 %v5911_v28, 16  ;;  %v1782_v49 = vrot.slane %v5911_v28, 7  ;;  %v1802_v16 = vrot.slane %v5911_v28, 1 }
 0x545   : > { %v1620_v32 = vrot.slane %v1612_v29, 1  ;;  %v1611_v42 = vrot.slane %v1609_v36, 7 }
 0x546   : > { %v1797_v34 = vrot.slane %v1791_v30, 1  ;;  %v1790_v35 = vrot.slane %v1788_v3, 7  ;;  %v1784_v50 = vsel %vm1021_vm4, 0, %v1782_v49  ;;  %v1804_v19 = vsel %vm1197_vm13, %v1802_v16, 0  ;;  %v4631_v49 = vld [vmem:[%s6479_s17 + $0x78] ss:$12 sps:$4 sm:$0xff]  }
 0x547   : > { %v1621_v26 = vor.u32 %v1620_v32, %v1609_v36  ;;  %v1614_v46 = vor.u32 %v1612_v29, %v1611_v42  ;;  %v1786_v53 = vsel %vm5735_vm3, %v1784_v50, 0  ;;  %v1806_v23 = vsel %vm5651_vm14, %v1804_v19, 0  ;;  %v4616_v36 = vld [vmem:[%s6479_s17] ss:$12 sps:$4 sm:$0xff]   ;;  %v4622_v42 = vld [vmem:[%s6479_s17 + $0x30] ss:$12 sps:$4 sm:$0xff]  }
 0x548   : > { %v1798_v39 = vor.u32 %v1797_v34, %v1788_v3  ;;  %v1793_v27 = vor.u32 %v1791_v30, %v1790_v35  ;;  %v2083_v29 = vsel %vm5697_vm7, %v2082_v22, 4286644096  ;;  %v4615_v3 = vld [vmem:[%s6477_s15 + $0x38] sm:$0xff]   ;;  %v4636_v50 = vld [vmem:[%s6479_s17 + $0x94] ss:$12 sps:$4 sm:$0xff]  }
 0x549   : > { %v1623_v45 = vsel %vm5619_vm11, %v1621_v26, 0  ;;  %v2084_v30 = vmax.bf16 %v2083_v29, %v5801_v38  ;;  %v4621_v38 = vld [vmem:[%s6479_s17 + $0x1c] ss:$12 sps:$4 sm:$0xff]   ;;  %v4624_v26 = vld [vmem:[%s6479_s17 + $0x34] ss:$12 sps:$4 sm:$0xff]  }
 0x54a   : > { %v1800_v40 = vsel %vm5619_vm11, %v1798_v39, 0  ;;  %v1795_v41 = vsel %vm5693_vm6, 0, %v1793_v27  ;;  %v1624_v48 = vsel %vm5626_vm12, %v1623_v45, 0  ;;  %v4618_v39 = vld [vmem:[%s6479_s17 + $0x4] ss:$12 sps:$4 sm:$0xff]  }
 0x54b   : > { %v1801_v43 = vsel %vm5626_vm12, %v1800_v40, 0  ;;  %v1796_v44 = vsel %vm5697_vm7, %v1795_v41, 0  ;;  %v4619_v27 = vld [vmem:[%s6479_s17 + $0x18] ss:$12 sps:$4 sm:$0xff]   ;;  %v4643_v40 = vld [vmem:[%s6479_s17 + $0xc8] ss:$12 sps:$4 sm:$0xff]  }
 0x54c   : > { %1811 = vrot.lane.b32.xlu1 %v1801_v43, %s5117_s2  ;;  %1808 = vrot.lane.b32.xlu0 %v1796_v44, %s5117_s2  ;;  %v4644_v41 = vld [vmem:[%s6479_s17 + $0x8] ss:$12 sps:$4 sm:$0xff]   ;;  %v4627_v43 = vld [vmem:[%s6479_s17 + $0x4c] ss:$12 sps:$4 sm:$0xff]  }
 0x54d   : > { %v4625_v44 = vld [vmem:[%s6479_s17 + $0x48] ss:$12 sps:$4 sm:$0xff]   ;;  %v4630_v45 = vld [vmem:[%s6479_s17 + $0x64] ss:$12 sps:$4 sm:$0xff]  }
 0x54e   : > { %v4654_v16 = vld [vmem:[%s6479_s17 + $0x38] ss:$12 sps:$4 sm:$0xff]   ;;  %v4658_v22 = vld [vmem:[%s6479_s17 + $0x110] ss:$12 sps:$4 sm:$0xff]  }
 0x550   : > { %1626 = vrot.lane.b32.xlu0 %v1624_v48, %s5117_s2  ;;  %1615 = vrot.lane.b32.xlu1 %v1614_v46, %s5117_s2  ;;  %v4628_v46 = vld [vmem:[%s6479_s17 + $0x60] ss:$12 sps:$4 sm:$0xff]   ;;  %v4633_v48 = vld [vmem:[%s6479_s17 + $0x7c] ss:$12 sps:$4 sm:$0xff]  }
 0x5be   : > { %v1812_v51 = vpop.permute.xlu1 %1811  ;;  %v1809_v52 = vpop.permute.xlu0 %1808 }
 0x5bf   : > { %v1815_v55 = vsel %vm1064_vm9, %v1786_v53, %v1809_v52  ;;  %v1818_v56 = vsel %vm1064_vm9, %v5911_v28, %v1812_v51  ;;  %v2086_v28 = vor.u32 %v2085_v21, %v2075_v11  ;;  %v4634_v51 = vld [vmem:[%s6479_s17 + $0x90] ss:$12 sps:$4 sm:$0xff]   ;;  %v4639_v52 = vld [vmem:[%s6479_s17 + $0xac] ss:$12 sps:$4 sm:$0xff]   ;;  %v4637_v53 = vld [vmem:[%s6479_s17 + $0xa8] ss:$12 sps:$4 sm:$0xff]  }
 0x5c0   : > { %2022 = vmatprep.mubr.bf16.mxu1 %v1818_v56  ;;  %v4657_v21 = vld [vmem:[%s6479_s17 + $0x10c] ss:$12 sps:$4 sm:$0xff]  }
 0x5c1   : > { %2023 = vmatmul.mubr.bf16.vlgmr.msra.gmra.mrb[16].mxu1 %v1815_v55  ;;  %v2088_v32 = vsel %vm5619_vm11, %v2086_v28, 4286644096  ;;  %v4640_v55 = vld [vmem:[%s6479_s17 + $0xc0] ss:$12 sps:$4 sm:$0xff]  }
 0x5c2   : > { %4347 = vmatpush3.bf16.msra.mxu1 %v4603_v54  ;;  %v1627_v57 = vpop.permute.xlu0 %1626  ;;  %v1616_v58 = vpop.permute.xlu1 %1615  ;;  %4362 = vmatprep.mubr.msk.bf16.mxu1 %vm5114_vm0, %v5113_v0  ;;  %v2089_v34 = vsel %vm5626_vm12, %v2088_v32, 4286644096  ;;  %v4642_v54 = vld [vmem:[%s6479_s17 + $0xc4] ss:$12 sps:$4 sm:$0xff]   ;;  %v4663_v32 = vld [vmem:[%s6479_s17 + $0x128] ss:$12 sps:$4 sm:$0xff]  }
 0x5c3   : > { %v1618_v60 = vsel %vm5693_vm6, 0, %v1616_v58  ;;  %3960 = vmatprep.mubr.msk.bf16.mxu0 %vm1064_vm9, %v1627_v57  ;;  %4348 = vmatprep.subr.bf16.mxu1 %v5113_v0  ;;  %v2090_v35 = vmax.bf16 %v2089_v34, %v2084_v30  ;;  %v4647_v57 = vld [vmem:[%s6479_s17 + $0xdc] ss:$12 sps:$4 sm:$0xff]   ;;  %v4648_v58 = vld [vmem:[%s6479_s17 + $0xe0] ss:$12 sps:$4 sm:$0xff]  }
 0x5c4   : > { %v1619_v63 = vsel %vm5697_vm7, %v1618_v60, 0  ;;  %v4645_v60 = vld [vmem:[%s6479_s17 + $0xd8] ss:$12 sps:$4 sm:$0xff]   ;;  %v4660_v30 = vld [vmem:[%s6479_s17 + $0x120] ss:$12 sps:$4 sm:$0xff]  }
 0x5c5   : > { %v1629_v1 = vsel %vm1064_vm9, %v1619_v63, %v5906_v24  ;;  %v4664_v34 = vld [vmem:[%s6479_s17 + $0x68] ss:$12 sps:$4 sm:$0xff]  }
 0x5c6   : > { %4349 = vmatpush3.bf16.msra.mxu1 %v4605_v59  ;;  %1770 = vmatmul.mubr.bf16.vlgmr.msra.gmra.mrb[4].mxu0 %v1629_v1 }
 0x5c7   : > { %4335 = vmatpush3.bf16.msra.mxu0 %v4606_v61  ;;  %4350 = vmatprep.subr.bf16.mxu1 %v5113_v0  ;;  %v4649_v61 = vld [vmem:[%s6479_s17 + $0x20] ss:$12 sps:$4 sm:$0xff]  }
 0x5c8   : > { %4336 = vmatprep.subr.bf16.mxu0 %v5113_v0  ;;  %4342 = vmatprep.mubr.msk.bf16.mxu0 %vm5114_vm0, %v5113_v0 }
 0x5ca   : > { %4351 = vmatpush3.bf16.msra.mxu1 %v4607_v5 }
 0x5cb   : > { %4337 = vmatpush3.bf16.msra.mxu0 %v4608_v7  ;;  %4352 = vmatprep.subr.bf16.mxu1 %v5113_v0  ;;  %v3947_v7 = vld [vmem:[#allocation7] ss:$0 sm:$0xff] }
 0x5cc   : > { %4338 = vmatprep.subr.bf16.mxu0 %v5113_v0 }
 0x5ce   : > { %4353 = vmatpush3.bf16.msra.mxu1 %v4609_v12  ;;  %v4652_v12 = vld [vmem:[%s6479_s17 + $0xf4] ss:$12 sps:$4 sm:$0xff]  }
 0x5cf   : > { %4339 = vmatpush3.bf16.msra.mxu0 %v4610_v13  ;;  %4354 = vmatprep.subr.bf16.mxu1 %v5113_v0  ;;  %v4653_v13 = vld [vmem:[%s6479_s17 + $0xf8] ss:$12 sps:$4 sm:$0xff]  }
 0x5d0   : > { %4340 = vmatprep.subr.bf16.mxu0 %v5113_v0 }
 0x5d2   : > { %4355 = vmatpush3.bf16.msra.mxu1 %v4611_v15  ;;  %v4650_v15 = vld [vmem:[%s6479_s17 + $0xf0] ss:$12 sps:$4 sm:$0xff]  }
 0x5d3   : > { %4341 = vmatpush3.bf16.msra.mxu0 %v4612_v4  ;;  %4356 = vmatprep.subr.bf16.mxu1 %v5113_v0 }
 0x5d4   : > { %2556 = vmatprep.subr.bf16.mxu0 %v4618_v39  ;;  %v4668_v39 = vld [vmem:[%s6479_s17 + $0x140] ss:$12 sps:$4 sm:$0xff]  }
 0x5d6   : > { %4343 = vmatmul.mubr.msk.bf16.vlgmr.msra.gmra.mrb[8].mxu0 %vm1064_vm9, %v1806_v23  ;;  %4357 = vmatpush3.bf16.msra.mxu1 %v4613_v20  ;;  %v4655_v23 = vld [vmem:[%s6479_s17 + $0x108] ss:$12 sps:$4 sm:$0xff]  }
 0x5d7   : > { %4358 = vmatprep.subr.bf16.mxu1 %v5113_v0  ;;  %2557 = vmatpush1.bf16.msra.mxu0 %v4616_v36  ;;  %v4667_v36 = vld [vmem:[%s6479_s17 + $0x13c] ss:$12 sps:$4 sm:$0xff]  }
 0x5d8   : > { %2558 = vmatprep.subr.bf16.mxu0 %v4621_v38  ;;  %v4665_v38 = vld [vmem:[%s6479_s17 + $0x138] ss:$12 sps:$4 sm:$0xff]  }
 0x5da   : > { %4359 = vmatpush3.bf16.msra.mxu1 %v4614_v25  ;;  %v4659_v25 = vld [vmem:[%s6479_s17 + $0x50] ss:$12 sps:$4 sm:$0xff]  }
 0x5db   : > { %4360 = vmatprep.subr.bf16.mxu1 %v5113_v0  ;;  %2559 = vmatpush1.bf16.msra.mxu0 %v4619_v27  ;;  %v4669_v27 = vld [vmem:[%s6479_s17 + $0x80] ss:$12 sps:$4 sm:$0xff]  }
 0x5dc   : > { %2560 = vmatprep.subr.bf16.mxu0 %v4624_v26  ;;  %v4672_v26 = vld [vmem:[%s6479_s17 + $0x154] ss:$12 sps:$4 sm:$0xff]  }
 0x5de   : > { %4361 = vmatpush3.bf16.msra.mxu1 %v4615_v3  ;;  %v4662_v3 = vld [vmem:[%s6479_s17 + $0x124] ss:$12 sps:$4 sm:$0xff]  }
 0x5df   : > { %4178 = vmatprep.subr.bf16.mxu1 %v4643_v40  ;;  %2561 = vmatpush1.bf16.msra.mxu0 %v4622_v42  ;;  %v4673_v40 = vld [vmem:[%s6479_s17 + $0x158] ss:$12 sps:$4 sm:$0xff]   ;;  %v4670_v42 = vld [vmem:[%s6479_s17 + $0x150] ss:$12 sps:$4 sm:$0xff]  }
 0x5e0   : > { %2562 = vmatprep.subr.bf16.mxu0 %v4627_v43  ;;  %v4674_v43 = vld [vmem:[%s6479_s17 + $0x98] ss:$12 sps:$4 sm:$0xff]  }
 0x5e1   : > { %4363 = vmatmul.mubr.bf16.vlgmr.msra.gmra.mrb[20].mxu1 %v2090_v35 }
 0x5e2   : > { %4179 = vmatpush3.bf16.msra.mxu1 %v4644_v41  ;;  %v3961_v41 = vld [vmem:[#allocation9] ss:$0 sm:$0xff] }
 0x5e3   : > { %2563 = vmatpush1.bf16.msra.mxu0 %v4625_v44  ;;  %4180 = vmatprep.subr.bf16.mxu1 %v4648_v58 }
 0x5e4   : > { %2564 = vmatprep.subr.bf16.mxu0 %v4630_v45  ;;  %v4677_v45 = vld [vmem:[%s6479_s17 + $0x16c] ss:$12 sps:$4 sm:$0xff]  }
 0x5e6   : > { %4181 = vmatpush3.bf16.msra.mxu1 %v4649_v61  ;;  %v4680_v61 = vld [vmem:[%s6554_s21 + $0x40] sm:$0xff]  }
 0x5e7   : > { %2565 = vmatpush1.bf16.msra.mxu0 %v4628_v46  ;;  %4182 = vmatprep.subr.bf16.mxu1 %v4653_v13  ;;  %v4678_v46 = vld [vmem:[%s6479_s17 + $0x170] ss:$12 sps:$4 sm:$0xff]  }
 0x5e8   : > { %2566 = vmatprep.subr.bf16.mxu0 %v4633_v48 }
 0x5ea   : > { %4183 = vmatpush3.bf16.msra.mxu1 %v4654_v16 }
 0x5eb   : > { %2567 = vmatpush1.bf16.msra.mxu0 %v4631_v49  ;;  %4184 = vmatprep.subr.bf16.mxu1 %v4658_v22  ;;  %v4684_v22 = vld [vmem:[%s6554_s21 + $0x8] sm:$0xff]  }
 0x5ec   : > { %2568 = vmatprep.subr.bf16.mxu0 %v4636_v50 }
 0x5ee   : > { %4185 = vmatpush3.bf16.msra.mxu1 %v4659_v25  ;;  %v4687_v25 = vld [vmem:[%s6554_s21 + $0x10] sm:$0xff]  }
 0x5ef   : > { %2569 = vmatpush1.bf16.msra.mxu0 %v4634_v51  ;;  %4186 = vmatprep.subr.bf16.mxu1 %v4663_v32  ;;  %v4692_v32 = vld [vmem:[%s6554_s21 + $0x60] sm:$0xff]  }
 0x5f0   : > { %2570 = vmatprep.subr.bf16.mxu0 %v4639_v52 }
 0x5f2   : > { %4187 = vmatpush3.bf16.msra.mxu1 %v4664_v34  ;;  %v4693_v34 = vld [vmem:[%s6554_s21 + $0x20] sm:$0xff]  }
 0x5f3   : > { %2571 = vmatpush1.bf16.msra.mxu0 %v4637_v53  ;;  %4188 = vmatprep.subr.bf16.mxu1 %v4668_v39  ;;  %v4675_v53 = vld [vmem:[%s6479_s17 + $0x168] ss:$12 sps:$4 sm:$0xff]  }
 0x5f4   : > { %2572 = vmatprep.subr.bf16.mxu0 %v4642_v54  ;;  %v4679_v54 = vld [vmem:[%s6479_s17 + $0xb0] ss:$12 sps:$4 sm:$0xff]   ;;  %v4696_v39 = vld [vmem:[%s6554_s21 + $0x28] sm:$0xff]  }
 0x5f6   : > { %4189 = vmatpush3.bf16.msra.mxu1 %v4669_v27  ;;  %v4698_v27 = vld [vmem:[%s6554_s21 + $0x70] sm:$0xff]  }
 0x5f7   : > { %2573 = vmatpush1.bf16.msra.mxu0 %v4640_v55  ;;  %4190 = vmatprep.subr.bf16.mxu1 %v4673_v40  ;;  %v4700_v40 = vld [vmem:[%s6554_s21 + $0xb0] sm:$0xff]  }
 0x5f8   : > { %2574 = vmatprep.subr.bf16.mxu0 %v4647_v57 }
 0x5fa   : > { %4191 = vmatpush3.bf16.msra.mxu1 %v4674_v43  ;;  %v4703_v43 = vld [vmem:[%s6554_s21 + $0xb8] sm:$0xff]  }
 0x5fb   : > { %2575 = vmatpush1.bf16.msra.mxu0 %v4645_v60  ;;  %4192 = vmatprep.subr.bf16.mxu1 %v4678_v46  ;;  %v3983_v60 = vld [vmem:[#allocation10] ss:$0 sm:$0xff]  ;;  %v2283_v46 = vld [vmem:[#allocation12] sm:$0x7] }
 0x5fc   : > { %2576 = vmatprep.subr.bf16.mxu0 %v4652_v12 }
 0x5fe   : > { %4193 = vmatpush3.bf16.msra.mxu1 %v4679_v54 }
 0x5ff   : > { %2577 = vmatpush1.bf16.msra.mxu0 %v4650_v15  ;;  %4200 = vmatprep.subr.bf16.mxu1 %v4680_v61 }
 0x600   : > { %2578 = vmatprep.subr.bf16.mxu0 %v4657_v21 }
 0x603   : > { %2579 = vmatpush1.bf16.msra.mxu0 %v4655_v23  ;;  %v4685_v23 = vld [vmem:[%s6554_s21 + $0x88] sm:$0xff]  }
 0x604   : > { %2580 = vmatprep.subr.bf16.mxu0 %v4662_v3  ;;  %v4690_v3 = vld [vmem:[%s6554_s21 + $0x18] sm:$0xff]  }
 0x607   : > { %2581 = vmatpush1.bf16.msra.mxu0 %v4660_v30  ;;  %v4691_v30 = vld [vmem:[%s6554_s21 + $0x98] sm:$0xff]  }
 0x608   : > { %2582 = vmatprep.subr.bf16.mxu0 %v4667_v36  ;;  %v4695_v36 = vld [vmem:[%s6554_s21 + $0x68] sm:$0xff]  }
 0x60b   : > { %2583 = vmatpush1.bf16.msra.mxu0 %v4665_v38  ;;  %v4697_v38 = vld [vmem:[%s6554_s21 + $0xa8] sm:$0xff]  }
 0x60c   : > { %2584 = vmatprep.subr.bf16.mxu0 %v4672_v26  ;;  %v4699_v26 = vld [vmem:[%s6554_s21 + $0x30] sm:$0xff]  }
 0x60f   : > { %2585 = vmatpush1.bf16.msra.mxu0 %v4670_v42  ;;  %v4702_v42 = vld [vmem:[%s6554_s21 + $0x38] sm:$0xff]  }
 0x610   : > { %2586 = vmatprep.subr.bf16.mxu0 %v4677_v45  ;;  %v4705_v45 = vld [vmem:[%s6555_s12 + $0xc0] sm:$0xff]  }
 0x613   : > { %2587 = vmatpush1.bf16.msra.mxu0 %v4675_v53 }
 0x614   : > { %4366 = vmatprep.subr.bf16.mxu0 %v5113_v0 }
 0x694   : > { %v4158_v56 = vpop.f32.mrb[16].mxu1 }
 0x695   : > { %v4159_v59 = vpop.f32.mrb[17].mxu1 }
 0x696   : > { %v4160_v63 = vadd.f32 %v4159_v59, %v4158_v56  ;;  %v4161_v1 = vpop.f32.mrb[18].mxu1 }
 0x697   : > { %v4162_v5 = vpop.f32.mrb[19].mxu1 }
 0x698   : > { %v4163_v11 = vadd.f32 %v4162_v5, %v4161_v1  ;;  %v2025_v44 = vadd.f32 %v4160_v63, %v3961_v41 }
 0x699   : > { %v1771_v14 = vpop.f32.mrb[4].mxu0 }
 0x69a   : > { %v1772_v17 = vadd.f32 %v3947_v7, %v1771_v14  ;;  %v1773_v4 = vpop.f32.mrb[5].mxu0  ;;  %v2028_v51 = vadd.f32 %v4163_v11, %v3961_v41  ;;  %v4701_v41 = vld [vmem:[%s6554_s21 + $0x78] sm:$0xff]  }
 0x69b   : > { %v1774_v18 = vpop.f32.mrb[6].mxu0  ;;  %v4681_v4 = vld [vmem:[%s6554_s21] sm:$0xff]  }
 0x69c   : > { %v1775_v19 = vadd.f32 %v3947_v7, %v1774_v18  ;;  %v1776_v20 = vpop.f32.mrb[7].mxu0  ;;  %v1778_v28 = vmax.f32 %v1772_v17, 0.0  ;;  %v4682_v18 = vld [vmem:[%s6554_s21 + $0x80] sm:$0xff]  }
 0x69d   : > { %v4683_v20 = vld [vmem:[%s6554_s21 + $0x48] sm:$0xff]  }
 0x69e   : > { %v1779_v29 = vmax.f32 %v1775_v19, 0.0 }
 0x6a0   : > { %v1780_v35 = vpack.c.bf16 %v1779_v29, %v1778_v28  ;;  %v4688_v28 = vld [vmem:[%s6554_s21 + $0x90] sm:$0xff]   ;;  %v4689_v29 = vld [vmem:[%s6554_s21 + $0x58] sm:$0xff]  }
 0x6a2   : > { %2207 = vrot.lane.b32.xlu0 %v1780_v35, %s5117_s2  ;;  %v4694_v35 = vld [vmem:[%s6554_s21 + $0xa0] sm:$0xff]  }
 0x6a9   : > { %v2065_v48 = vpop.f32.mrb[8].mxu0 }
 0x6aa   : > { %v2066_v49 = vadd.f32 %v2065_v48, %v2025_v44  ;;  %v4344_v50 = vpop.f32.mrb[9].mxu0  ;;  %v4704_v44 = vld [vmem:[%s6555_s12 + $0x40] sm:$0xff]   ;;  %v2295_v48 = vsub.s32 2, %v5596_v10 }
 0x6ab   : > { %v2068_v52 = vpop.f32.mrb[10].mxu0  ;;  %v2292_v50 = vrot.slane %v2283_v46, %v1475_v8 }
 0x6ac   : > { %v2069_v55 = vadd.f32 %v2068_v52, %v2028_v51  ;;  %v4345_v56 = vpop.f32.mrb[11].mxu0  ;;  %v2072_v57 = vmax.f32 %v2066_v49, 0.0  ;;  %v2288_v49 = vrot.slane %v2283_v46, %v1471_v6  ;;  %v2296_v53 = vrot.slane %v2283_v46, %v2295_v48  ;;  %v4713_v46 = vld [vmem:[%s6555_s12 + $0xd0] sm:$0xff]  }
 0x6ad   : > { %v4714_v48 = vld [vmem:[%s6555_s12 + $0x10] sm:$0xff]  }
 0x6ae   : > { %v2073_v58 = vmax.f32 %v2069_v55, 0.0 }
 0x6b0   : > { %v2074_v59 = vpack.c.bf16 %v2073_v58, %v2072_v57 }
 0x6b4   : > { %v2196_v63 = vpop.f32.mrb[20].mxu1 }
 0x6b5   : > { %v2197_v1 = vadd.f32 %v3983_v60, %v2196_v63  ;;  %v4364_v5 = vpop.f32.mrb[21].mxu1 }
 0x6b6   : > { %v2199_v7 = vpop.f32.mrb[22].mxu1 }
 0x6b7   : > { %v2200_v11 = vadd.f32 %v3983_v60, %v2199_v7  ;;  %v4365_v12 = vpop.f32.mrb[23].mxu1  ;;  %v2203_v13 = vmax.f32 %v2197_v1, 0.0 }
 0x6b9   : > { %v2204_v14 = vmax.f32 %v2200_v11, 0.0 }
 0x6bb   : > { %v2205_v15 = vpack.c.bf16 %v2204_v14, %v2203_v13 }
 0x6bd   : > { %2210 = vrot.lane.b32.xlu1 %v2205_v15, %s5117_s2  ;;  %s904_s2 = scalar_lea.vmem %s6556_s5, %s3901_s27 }
 0x714   : > { %v2208_v16 = vpop.permute.xlu0 %2207 }
 0x715   : > { %v6178_v21 = vsel %vm1064_vm9, %v5906_v24, %v2208_v16  ;;  %v4686_v24 = vld [vmem:[%s6554_s21 + $0x50] sm:$0xff]  }
 0x72f   : > { %v2211_v17 = vpop.permute.xlu1 %2210 }
 0x730   : > { %v6171_v19 = vsel %vm1064_vm9, %v2074_v59, %v2211_v17 }
 0x731   : > { %2588 = vmatprep.mubr.bf16.mxu0 %v6171_v19  ;;  %2631 = vmatprep.mubr.bf16.mxu1 %v6171_v19 }
 0x732   : > { %2589 = vmatmul.mubr.bf16.vlgmr.msra.gmra.mrb[12].mxu0 %v6178_v21  ;;  %2632 = vmatmul.mubr.bf16.vlgmr.msra.gmra.mrb[24].mxu1 %v6178_v21 }
 0x733   : > { %4201 = vmatpush3.bf16.msra.mxu1 %v4681_v4  ;;  %4367 = vmatpush3.bf16.msra.mxu0 %v4682_v18 }
 0x734   : > { %4202 = vmatprep.subr.bf16.mxu1 %v4683_v20  ;;  %4368 = vmatprep.subr.bf16.mxu0 %v5113_v0 }
 0x735   : > { %4382 = vmatprep.mubr.msk.bf16.mxu0 %vm5114_vm0, %v5113_v0 }
 0x737   : > { %4203 = vmatpush3.bf16.msra.mxu1 %v4684_v22  ;;  %4369 = vmatpush3.bf16.msra.mxu0 %v4685_v23 }
 0x738   : > { %4204 = vmatprep.subr.bf16.mxu1 %v4686_v24  ;;  %4370 = vmatprep.subr.bf16.mxu0 %v5113_v0 }
 0x73b   : > { %4205 = vmatpush3.bf16.msra.mxu1 %v4687_v25  ;;  %4371 = vmatpush3.bf16.msra.mxu0 %v4688_v28 }
 0x73c   : > { %4206 = vmatprep.subr.bf16.mxu1 %v4689_v29  ;;  %4372 = vmatprep.subr.bf16.mxu0 %v5113_v0 }
 0x73f   : > { %4207 = vmatpush3.bf16.msra.mxu1 %v4690_v3  ;;  %4373 = vmatpush3.bf16.msra.mxu0 %v4691_v30  ;;  %v4706_v30 = vld [vmem:[%s6555_s12] sm:$0xff]  }
 0x740   : > { %4374 = vmatprep.subr.bf16.mxu0 %v5113_v0  ;;  %4208 = vmatprep.subr.bf16.mxu1 %v4692_v32  ;;  %v4707_v32 = vld [vmem:[%s6555_s12 + $0x80] sm:$0xff]  }
 0x743   : > { %4209 = vmatpush3.bf16.msra.mxu1 %v4693_v34  ;;  %4375 = vmatpush3.bf16.msra.mxu0 %v4694_v35 }
 0x744   : > { %4376 = vmatprep.subr.bf16.mxu0 %v5113_v0  ;;  %4210 = vmatprep.subr.bf16.mxu1 %v4695_v36 }
 0x747   : > { %4211 = vmatpush3.bf16.msra.mxu1 %v4696_v39  ;;  %4377 = vmatpush3.bf16.msra.mxu0 %v4697_v38 }
 0x748   : > { %4378 = vmatprep.subr.bf16.mxu0 %v5113_v0  ;;  %4212 = vmatprep.subr.bf16.mxu1 %v4698_v27 }
 0x74b   : > { %4213 = vmatpush3.bf16.msra.mxu1 %v4699_v26  ;;  %4379 = vmatpush3.bf16.msra.mxu0 %v4700_v40  ;;  %v4708_v26 = vld [vmem:[%s6555_s12 + $0x48] sm:$0xff]  }
 0x74c   : > { %4380 = vmatprep.subr.bf16.mxu0 %v5113_v0  ;;  %4214 = vmatprep.subr.bf16.mxu1 %v4701_v41  ;;  %v4709_v40 = vld [vmem:[%s6555_s12 + $0xc8] sm:$0xff]  }
 0x74f   : > { %4215 = vmatpush3.bf16.msra.mxu1 %v4702_v42  ;;  %4381 = vmatpush3.bf16.msra.mxu0 %v4703_v43  ;;  %v4710_v43 = vld [vmem:[%s6555_s12 + $0x8] sm:$0xff]  }
 0x750   : > { %4231 = vmatprep.subr.bf16.mxu1 %v4704_v44  ;;  %4253 = vmatprep.subr.bf16.mxu0 %v4705_v45  ;;  %v4711_v44 = vld [vmem:[%s6555_s12 + $0x88] sm:$0xff]   ;;  %v4712_v45 = vld [vmem:[%s6555_s12 + $0x50] sm:$0xff]  }
 0x805   : > { %v2590_v51 = vpop.f32.mrb[12].mxu0  ;;  %v4194_v52 = vpop.f32.mrb[24].mxu1 }
 0x806   : > { %v2591_v54 = vadd.f32 %v2590_v51, %v2288_v49  ;;  %v2592_v55 = vpop.f32.mrb[13].mxu0  ;;  %v4195_v56 = vpop.f32.mrb[25].mxu1  ;;  %v4717_v51 = vld [vmem:[%s6555_s12 + $0xd8] sm:$0xff]  }
 0x807   : > { %v2593_v57 = vadd.f32 %v2592_v55, %v2292_v50  ;;  %v4196_v58 = vadd.f32 %v4195_v56, %v4194_v52  ;;  %v2594_v59 = vpop.f32.mrb[14].mxu0  ;;  %v4197_v60 = vpop.f32.mrb[26].mxu1  ;;  %v4718_v52 = vld [vmem:[%s6555_s12 + $0x18] sm:$0xff]   ;;  %v4720_v55 = vld [vmem:[%s6555_s12 + $0x60] sm:$0xff]  }
 0x808   : > { %v2595_v61 = vadd.f32 %v2594_v59, %v2288_v49  ;;  %v2596_v63 = vpop.f32.mrb[15].mxu0  ;;  %v4198_v1 = vpop.f32.mrb[27].mxu1  ;;  %v2640_v6 = vmax.f32 %v2591_v54, 0.0  ;;  %v4715_v49 = vld [vmem:[%s6555_s12 + $0x90] sm:$0xff]   ;;  %v3433_v54 = vshrl.u32 %v6171_v19, 16  ;;  %v4721_v56 = vld [vmem:[%s6555_s12 + $0xe0] sm:$0xff]  }
 0x809   : > { %v2634_v5 = vadd.f32 %v4196_v58, %v2296_v53  ;;  %v2597_v7 = vadd.f32 %v2596_v63, %v2292_v50  ;;  %v4199_v11 = vadd.f32 %v4198_v1, %v4197_v60  ;;  %v2641_v13 = vmax.f32 %v2593_v57, 0.0  ;;  %v4716_v50 = vld [vmem:[%s6555_s12 + $0x58] sm:$0xff]   ;;  %v4722_v57 = vld [vmem:[%s6555_s12 + $0x20] sm:$0xff]   ;;  %v4724_v60 = vld [vmem:[%s6555_s12 + $0x68] sm:$0xff]  }
 0x80a   : > { %v2643_v12 = vmax.f32 %v2595_v61, 0.0  ;;  %v4723_v58 = vld [vmem:[%s6555_s12 + $0xa0] sm:$0xff]   ;;  %v3435_v59 = vrot.slane %v3433_v54, 7  ;;  %v4725_v61 = vld [vmem:[%s6555_s12 + $0xe8] sm:$0xff]   ;;  %v3436_v63 = vshll.u32 %v6171_v19, 16 }
 0x80b   : > { %v2644_v8 = vmax.f32 %v2597_v7, 0.0  ;;  %v2637_v14 = vadd.f32 %v4199_v11, %v2296_v53  ;;  %v2642_v16 = vmax.f32 %v2634_v5, 0.0  ;;  %v4719_v53 = vld [vmem:[%s6555_s12 + $0x98] sm:$0xff]   ;;  %v4726_v1 = vld [vmem:[%s6555_s12 + $0x28] sm:$0xff]   ;;  %v4728_v7 = vld [vmem:[%s6555_s12 + $0x70] sm:$0xff]  }
 0x80c   : > { %v6264_v15 = vpack.c.bf16 %v2643_v12, %v2640_v6  ;;  %v4727_v5 = vld [vmem:[%s6555_s12 + $0xa8] sm:$0xff]   ;;  %v4729_v11 = vld [vmem:[%s6555_s12 + $0xf0] sm:$0xff]   ;;  %v3438_v6 = vor.u32 %v3436_v63, %v3435_v59  ;;  %v3449_v12 = vrot.slane %v3436_v63, 1 }
 0x80d   : > { %v2647_v17 = vpack.c.bf16 %v2644_v8, %v2641_v13  ;;  %v2645_v4 = vmax.f32 %v2637_v14, 0.0  ;;  %v4730_v13 = vld [vmem:[%s6555_s12 + $0x30] sm:$0xff]   ;;  %v4732_v14 = vld [vmem:[%s6555_s12 + $0x78] sm:$0xff]  }
 0x80e   : > { %v4731_v8 = vld [vmem:[%s6555_s12 + $0xb0] sm:$0xff]  }
 0x80f   : > { %v2650_v18 = vshrl.u32 %v2647_v17, 16  ;;  %v2653_v20 = vshll.u32 %v2647_v17, 16  ;;  %v6266_v22 = vpack.c.bf16 %v2645_v4, %v2642_v16  ;;  %2895 = vmatprep.mubr.bf16.mxu1 %v2647_v17  ;;  %v4733_v16 = vld [vmem:[%s6555_s12 + $0xf8] sm:$0xff]   ;;  %v3442_v17 = vsel %vm5693_vm6, 4286644096, %v3438_v6  ;;  %v4757_v59 = vld [vmem:[#allocation16 + $0x78] sm:$0xff]  }
 0x810   : > { %v3450_v4 = vor.u32 %v3449_v12, %v3433_v54  ;;  %v4754_v54 = vld [vmem:[#allocation16 + $0x70] sm:$0xff]   ;;  %v4040_v12 = vld [vmem:[#allocation13] ss:$0 sm:$0xff] }
 0x811   : > { %v2652_v23 = vrot.slane %v2650_v18, 7  ;;  %v2659_v24 = vrot.slane %v2653_v20, 1  ;;  %v2955_v25 = vshrl.u32 %v6266_v22, 16  ;;  %v2958_v28 = vshll.u32 %v6266_v22, 16 }
 0x813   : > { %v2655_v29 = vor.u32 %v2653_v20, %v2652_v23  ;;  %v2660_v3 = vor.u32 %v2659_v24, %v2650_v18  ;;  %v2957_v34 = vrot.slane %v2955_v25, 7  ;;  %v2964_v35 = vrot.slane %v2958_v28, 1  ;;  %v4734_v18 = vld [vmem:[%s6555_s12 + $0x38] sm:$0xff]  }
 0x814   : > { %v4735_v20 = vld [vmem:[%s6555_s12 + $0xb8] sm:$0xff]   ;;  %v3444_v23 = vsel %vm5697_vm7, %v3442_v17, 4286644096 }
 0x815   : > { %v2657_v36 = vsel %vm5693_vm6, 0, %v2655_v29  ;;  %v2662_v39 = vsel %vm5619_vm11, %v2660_v3, 0  ;;  %v2960_v38 = vor.u32 %v2958_v28, %v2957_v34  ;;  %v2965_v27 = vor.u32 %v2964_v35, %v2955_v25  ;;  %v4736_v24 = vld [vmem:[#allocation16 + $0x40] sm:$0xff]   ;;  %v4737_v3 = vld [vmem:[%s6555_s12 + $0x100] sm:$0xff]  }
 0x816   : > { %4065 = vmatmul.mubr.msk.bf16.vlgmr.msra.gmra.mrb[28].mxu1 %vm5697_vm7, %v2657_v36  ;;  %4383 = vmatmul.mubr.msk.bf16.vlgmr.msra.gmra.mrb[16].mxu0 %vm5626_vm12, %v2662_v39  ;;  %v2949_v25 = vrot.slane %v6266_v22, 7  ;;  %v3446_v28 = vmax.bf16 %v3444_v23, %v6171_v19  ;;  %v3454_v29 = vsel %vm5619_vm11, %v3450_v4, 4286644096  ;;  %v4739_v35 = vld [vmem:[#allocation16 + $0x48] sm:$0xff]   ;;  %v4740_v36 = vld [vmem:[%s6555_s12 + $0x108] sm:$0xff]  }
 0x817   : > { %4232 = vmatpush3.bf16.msra.mxu1 %v4706_v30  ;;  %4254 = vmatpush3.bf16.msra.mxu0 %v4707_v32  ;;  %v2962_v41 = vsel %vm5693_vm6, 0, %v2960_v38  ;;  %v2967_v42 = vsel %vm5619_vm11, %v2965_v27, 0  ;;  %v4738_v30 = vld [vmem:[#allocation16] sm:$0xff]   ;;  %v3456_v34 = vsel %vm5626_vm12, %v3454_v29, 4286644096  ;;  %v4741_v39 = vld [vmem:[#allocation16 + $0x8] sm:$0xff]  }
 0x818   : > { %4108 = vmatprep.mubr.msk.bf16.mxu1 %vm5697_vm7, %v2962_v41  ;;  %4110 = vmatprep.mubr.msk.bf16.mxu0 %vm5626_vm12, %v2967_v42  ;;  %v2951_v32 = vsel %vm1021_vm4, 0, %v2949_v25  ;;  %v3458_v19 = vmax.bf16 %v3456_v34, %v3446_v28  ;;  %v4742_v38 = vld [vmem:[#allocation16 + $0x50] sm:$0xff]   ;;  %v4746_v41 = vld [vmem:[%s6555_s12 + $0x118] sm:$0xff]   ;;  %v4747_v42 = vld [vmem:[#allocation16 + $0x18] sm:$0xff]  }
 0x819   : > { %4233 = vmatprep.subr.bf16.mxu1 %v4708_v26  ;;  %4255 = vmatprep.subr.bf16.mxu0 %v4709_v40  ;;  %v4744_v27 = vld [vmem:[#allocation16 + $0x10] sm:$0xff]   ;;  %v4745_v26 = vld [vmem:[#allocation16 + $0x58] sm:$0xff]   ;;  %v3427_v40 = vshrl.u32 %v6178_v21, 16 }
 0x81b   : > { %4234 = vmatpush3.bf16.msra.mxu1 %v4710_v43  ;;  %4256 = vmatpush3.bf16.msra.mxu0 %v4711_v44  ;;  %v4748_v43 = vld [vmem:[#allocation16 + $0x60] sm:$0xff]   ;;  %v3429_v44 = vrot.slane %v3427_v40, 7 }
 0x81c   : > { %4235 = vmatprep.subr.bf16.mxu1 %v4712_v45  ;;  %4257 = vmatprep.subr.bf16.mxu0 %v4713_v46  ;;  %v4749_v45 = vld [vmem:[%s6555_s12 + $0x120] sm:$0xff]   ;;  %v4750_v46 = vld [vmem:[#allocation16 + $0x20] sm:$0xff]  }
 0x81f   : > { %4236 = vmatpush3.bf16.msra.mxu1 %v4714_v48  ;;  %4258 = vmatpush3.bf16.msra.mxu0 %v4715_v49  ;;  %v3430_v48 = vshll.u32 %v6178_v21, 16  ;;  %v4751_v49 = vld [vmem:[#allocation16 + $0x68] sm:$0xff]  }
 0x820   : > { %4237 = vmatprep.subr.bf16.mxu1 %v4716_v50  ;;  %4259 = vmatprep.subr.bf16.mxu0 %v4717_v51  ;;  %v4752_v51 = vld [vmem:[%s6555_s12 + $0x128] sm:$0xff]  }
 0x821   : > { %v3432_v50 = vor.u32 %v3430_v48, %v3429_v44 }
 0x823   : > { %4238 = vmatpush3.bf16.msra.mxu1 %v4718_v52  ;;  %4260 = vmatpush3.bf16.msra.mxu0 %v4719_v53  ;;  %v4753_v52 = vld [vmem:[#allocation16 + $0x28] sm:$0xff]   ;;  %v3447_v53 = vrot.slane %v3430_v48, 1  ;;  %v4067_v48 = vld [vmem:[#allocation15] ss:$0 sm:$0xff] }
 0x824   : > { %4239 = vmatprep.subr.bf16.mxu1 %v4720_v55  ;;  %4261 = vmatprep.subr.bf16.mxu0 %v4721_v56  ;;  %v3441_v55 = vsel %vm5693_vm6, 4286644096, %v3432_v50  ;;  %v4755_v56 = vld [vmem:[%s6555_s12 + $0x130] sm:$0xff]  }
 0x827   : > { %4240 = vmatpush3.bf16.msra.mxu1 %v4722_v57  ;;  %4262 = vmatpush3.bf16.msra.mxu0 %v4723_v58  ;;  %v4756_v57 = vld [vmem:[#allocation16 + $0x30] sm:$0xff]   ;;  %v3448_v58 = vor.u32 %v3447_v53, %v3427_v40 }
 0x828   : > { %4241 = vmatprep.subr.bf16.mxu1 %v4724_v60  ;;  %4263 = vmatprep.subr.bf16.mxu0 %v4725_v61  ;;  %v3443_v60 = vsel %vm5697_vm7, %v3441_v55, 4286644096  ;;  %v4759_v61 = vld [vmem:[#allocation16 + $0x38] sm:$0xff]  }
 0x829   : > { %v3445_v63 = vmax.bf16 %v3443_v60, %v6178_v21  ;;  %v3642_v21 = vunpack.c.h.bf16 %v6264_v15 }
 0x82b   : > { %4242 = vmatpush3.bf16.msra.mxu1 %v4726_v1  ;;  %4264 = vmatpush3.bf16.msra.mxu0 %v4727_v5  ;;  %v3453_v1 = vsel %vm5619_vm11, %v3448_v58, 4286644096  ;;  %v2969_v5 = vrot.slane %v6266_v22, 1 }
 0x82c   : > { %4243 = vmatprep.subr.bf16.mxu1 %v4728_v7  ;;  %4265 = vmatprep.subr.bf16.mxu0 %v4729_v11  ;;  %v3455_v2 = vsel %vm5626_vm12, %v3453_v1, 4286644096 }
 0x82d   : > { %v3457_v7 = vmax.bf16 %v3455_v2, %v3445_v63  ;;  %v2971_v11 = vsel %vm1197_vm13, %v2969_v5, 0 }
 0x82f   : > { %4244 = vmatpush3.bf16.msra.mxu1 %v4730_v13  ;;  %4266 = vmatpush3.bf16.msra.mxu0 %v4731_v8 }
 0x830   : > { %4245 = vmatprep.subr.bf16.mxu1 %v4732_v14  ;;  %4267 = vmatprep.subr.bf16.mxu0 %v4733_v16 }
 0x833   : > { %4246 = vmatpush3.bf16.msra.mxu1 %v4734_v18  ;;  %4268 = vmatpush3.bf16.msra.mxu0 %v4735_v20 }
 0x834   : > { %4386 = vmatprep.subr.bf16.mxu1 %v5113_v0  ;;  %4284 = vmatprep.subr.bf16.mxu0 %v4736_v24 }
 0x836   : > { %4109 = vmatmul.mubr.msk.bf16.vlgmr.msra.gmra.mrb[32].mxu1 %vm5735_vm3, %v2951_v32  ;;  %3375 = vmatmul.mubr.bf16.vlgmr.msra.gmra.mrb[20].mxu0 %v6266_v22 }
 0x837   : > { %4387 = vmatpush3.bf16.msra.mxu1 %v4737_v3  ;;  %4285 = vmatpush3.bf16.msra.mxu0 %v4738_v30 }
 0x838   : > { %3626 = vmatprep.mubr.bf16.mxu0 %v3458_v19  ;;  %4388 = vmatprep.subr.bf16.mxu1 %v5113_v0 }
 0x839   : > { %4286 = vmatprep.subr.bf16.mxu0 %v4739_v35  ;;  %4402 = vmatprep.mubr.msk.bf16.mxu1 %vm5114_vm0, %v5113_v0  ;;  %vm3709_vm0 = vcmp.lt.s32.totalorder %v909_v9, 512 }
 0x83b   : > { %4389 = vmatpush3.bf16.msra.mxu1 %v4740_v36  ;;  %4287 = vmatpush3.bf16.msra.mxu0 %v4741_v39 }
 0x83c   : > { %4390 = vmatprep.subr.bf16.mxu1 %v5113_v0  ;;  %4288 = vmatprep.subr.bf16.mxu0 %v4742_v38 }
 0x83f   : > { %4391 = vmatpush3.bf16.msra.mxu1 %v4743_v31  ;;  %4289 = vmatpush3.bf16.msra.mxu0 %v4744_v27 }
 0x840   : > { %4392 = vmatprep.subr.bf16.mxu1 %v5113_v0  ;;  %4290 = vmatprep.subr.bf16.mxu0 %v4745_v26 }
 0x843   : > { %4393 = vmatpush3.bf16.msra.mxu1 %v4746_v41  ;;  %4291 = vmatpush3.bf16.msra.mxu0 %v4747_v42 }
 0x844   : > { %4394 = vmatprep.subr.bf16.mxu1 %v5113_v0  ;;  %4292 = vmatprep.subr.bf16.mxu0 %v4748_v43 }
 0x847   : > { %4395 = vmatpush3.bf16.msra.mxu1 %v4749_v45  ;;  %4293 = vmatpush3.bf16.msra.mxu0 %v4750_v46 }
 0x848   : > { %4396 = vmatprep.subr.bf16.mxu1 %v5113_v0  ;;  %4294 = vmatprep.subr.bf16.mxu0 %v4751_v49 }
 0x84b   : > { %4397 = vmatpush3.bf16.msra.mxu1 %v4752_v51  ;;  %4295 = vmatpush3.bf16.msra.mxu0 %v4753_v52 }
 0x84c   : > { %4398 = vmatprep.subr.bf16.mxu1 %v5113_v0  ;;  %4296 = vmatprep.subr.bf16.mxu0 %v4754_v54 }
 0x84f   : > { %4399 = vmatpush3.bf16.msra.mxu1 %v4755_v56  ;;  %4297 = vmatpush3.bf16.msra.mxu0 %v4756_v57 }
 0x850   : > { %4400 = vmatprep.subr.bf16.mxu1 %v5113_v0  ;;  %4298 = vmatprep.subr.bf16.mxu0 %v4757_v59  ;;  %v3638_v0 = vunpack.c.l.bf16 %v6264_v15 }
 0x852   : > { %v3646_v8 = vadd.f32 %v3642_v21, %v3638_v0 }
 0x853   : > { %4401 = vmatpush3.bf16.msra.mxu1 %v4758_v62  ;;  %4299 = vmatpush3.bf16.msra.mxu0 %v4759_v61 }
 0x854   : > { %v3647_v47 = vrot.slane %v3646_v8, 4 }
 0x856   : > { %4403 = vmatmul.mubr.msk.bf16.vlgmr.msra.gmra.mrb[36].mxu1 %vm5651_vm14, %v2971_v11  ;;  %3627 = vmatmul.mubr.bf16.vlgmr.msra.gmra.mrb[24].mxu0 %v3457_v7  ;;  %v3648_v28 = vadd.f32 %v3647_v47, %v3646_v8  ;;  %v4112_v7 = vld [vmem:[#allocation18] ss:$0 sm:$0xff] }
 0x858   : > { %v3649_v30 = vrot.slane %v3648_v28, 2 }
 0x85a   : > { %v3650_v19 = vadd.f32 %v3649_v30, %v3648_v28 }
 0x85c   : > { %v3651_v38 = vrot.slane %v3650_v19, 1 }
 0x85e   : > { %v3652_v26 = vadd.f32 %v3651_v38, %v3650_v19  ;;  %v5120_v19 = vmov 1966171168  }
 0x860   : > { %v6443_v42 = vmul.f32 0.0625, %v3652_v26 }
 0x8e9   : > { %v4216_v33 = vpop.f32.mrb[28].mxu1  ;;  %v2938_v6 = vpop.f32.mrb[16].mxu0 }
 0x8ea   : > { %v4217_v22 = vpop.f32.mrb[29].mxu1  ;;  %v4384_v13 = vpop.f32.mrb[17].mxu0 }
 0x8eb   : > { %v4218_v14 = vadd.f32 %v4217_v22, %v4216_v33  ;;  %v4219_v37 = vpop.f32.mrb[30].mxu1  ;;  %v2941_v16 = vpop.f32.mrb[18].mxu0 }
 0x8ec   : > { %v4220_v17 = vpop.f32.mrb[31].mxu1  ;;  %v4385_v4 = vpop.f32.mrb[19].mxu0 }
 0x8ed   : > { %v2898_v18 = vadd.f32 %v4218_v14, %v4040_v12  ;;  %v4221_v20 = vadd.f32 %v4220_v17, %v4219_v37 }
 0x8ef   : > { %v2939_v23 = vadd.f32 %v2938_v6, %v2898_v18  ;;  %v2901_v24 = vadd.f32 %v4221_v20, %v4040_v12 }
 0x8f1   : > { %v2942_v25 = vadd.f32 %v2941_v16, %v2901_v24  ;;  %v2945_v29 = vmax.f32 %v2939_v23, 0.0 }
 0x8f3   : > { %v2946_v15 = vmax.f32 %v2942_v25, 0.0 }
 0x8f5   : > { %v2947_v3 = vpack.c.bf16 %v2946_v15, %v2945_v29 }
 0x8f7   : > { %v3639_v32 = vunpack.c.l.bf16 %v2947_v3  ;;  %v3643_v34 = vunpack.c.h.bf16 %v2947_v3 }
 0x8f9   : > { %v3653_v35 = vadd.f32 %v3643_v34, %v3639_v32 }
 0x8fb   : > { %v3654_v36 = vrot.slane %v3653_v35, 4 }
 0x8fd   : > { %v3655_v39 = vadd.f32 %v3654_v36, %v3653_v35  ;;  %v3685_v36 = vunpack.c.l.s4 %v5120_v19 }
 0x8ff   : > { %v3656_v31 = vrot.slane %v3655_v39, 2 }
 0x901   : > { %v3657_v27 = vadd.f32 %v3656_v31, %v3655_v39 }
 0x903   : > { %v3658_v40 = vrot.slane %v3657_v27, 1 }
 0x905   : > { %v3659_v41 = vadd.f32 %v3658_v40, %v3657_v27  ;;  %v3686_v27 = vunpack.c.0.s8 %v3685_v36 }
 0x907   : > { %v6445_v43 = vmul.f32 0.0625, %v3659_v41 }
 0x909   : > { %v3682_v44 = vcombine.low %v6443_v42, %v6445_v43  ;;  %v4247_v45 = vpop.f32.mrb[32].mxu1  ;;  %v4269_v46 = vpop.f32.mrb[20].mxu0 }
 0x90a   : > { %v4248_v49 = vpop.f32.mrb[33].mxu1  ;;  %v4270_v50 = vpop.f32.mrb[21].mxu0 }
 0x90b   : > { %v4249_v51 = vadd.f32 %v4248_v49, %v4247_v45  ;;  %v4271_v52 = vadd.f32 %v4270_v50, %v4269_v46  ;;  %v4250_v53 = vpop.f32.mrb[34].mxu1  ;;  %v4272_v54 = vpop.f32.mrb[22].mxu0  ;;  %v3689_v45 = vsub.s32 %v3686_v27, %v5596_v10 }
 0x90c   : > { %v4251_v55 = vpop.f32.mrb[35].mxu1  ;;  %v4273_v56 = vpop.f32.mrb[23].mxu0 }
 0x90d   : > { %v3336_v57 = vadd.f32 %v4249_v51, %v4067_v48  ;;  %v4252_v58 = vadd.f32 %v4251_v55, %v4250_v53  ;;  %v4274_v59 = vadd.f32 %v4273_v56, %v4272_v54  ;;  %v3690_v50 = vrot.slane %v3682_v44, %v3689_v45 }
 0x90f   : > { %v3339_v60 = vadd.f32 %v4252_v58, %v4067_v48  ;;  %v3377_v62 = vadd.f32 %v4271_v52, %v3336_v57 }
 0x911   : > { %v3380_v61 = vadd.f32 %v4274_v59, %v3339_v60 }
 0x929   : > { %v3417_v63 = vpop.f32.mrb[36].mxu1  ;;  %v4300_v1 = vpop.f32.mrb[24].mxu0 }
 0x92a   : > { %v3418_v5 = vadd.f32 %v3417_v63, %v3377_v62  ;;  %v4404_v2 = vpop.f32.mrb[37].mxu1  ;;  %v4301_v11 = vpop.f32.mrb[25].mxu0 }
 0x92b   : > { %v4302_v0 = vadd.f32 %v4301_v11, %v4300_v1  ;;  %v3420_v21 = vpop.f32.mrb[38].mxu1  ;;  %v4303_v33 = vpop.f32.mrb[26].mxu0 }
 0x92c   : > { %v3421_v6 = vadd.f32 %v3420_v21, %v3380_v61  ;;  %v4405_v12 = vpop.f32.mrb[39].mxu1  ;;  %v4304_v22 = vpop.f32.mrb[27].mxu0  ;;  %v3424_v14 = vmax.f32 %v3418_v5, 0.0 }
 0x92d   : > { %v3629_v13 = vadd.f32 %v4302_v0, %v4112_v7  ;;  %v4305_v8 = vadd.f32 %v4304_v22, %v4303_v33 }
 0x92e   : > { %v3425_v37 = vmax.f32 %v3421_v6, 0.0 }
 0x92f   : > { %v3632_v16 = vadd.f32 %v4305_v8, %v4112_v7  ;;  %v3635_v4 = vmax.f32 %v3629_v13, 0.0 }
 0x930   : > { %v3426_v17 = vpack.c.bf16 %v3425_v37, %v3424_v14 }
 0x931   : > { %v3636_v18 = vmax.f32 %v3632_v16, 0.0 }
 0x932   : > { %v3640_v20 = vunpack.c.l.bf16 %v3426_v17  ;;  %v3644_v47 = vunpack.c.h.bf16 %v3426_v17 }
 0x933   : > { %v3637_v23 = vpack.c.bf16 %v3636_v18, %v3635_v4 }
 0x934   : > { %v3660_v24 = vadd.f32 %v3644_v47, %v3640_v20 }
 0x935   : > { %v3641_v25 = vunpack.c.l.bf16 %v3637_v23  ;;  %v3645_v28 = vunpack.c.h.bf16 %v3637_v23 }
 0x936   : > { %v3661_v29 = vrot.slane %v3660_v24, 4 }
 0x937   : > { %v3667_v15 = vadd.f32 %v3645_v28, %v3641_v25 }
 0x938   : > { %v3662_v3 = vadd.f32 %v3661_v29, %v3660_v24 }
 0x939   : > { %v3668_v30 = vrot.slane %v3667_v15, 4 }
 0x93a   : > { %v3663_v32 = vrot.slane %v3662_v3, 2 }
 0x93b   : > { %v3669_v34 = vadd.f32 %v3668_v30, %v3667_v15 }
 0x93c   : > { %v3664_v35 = vadd.f32 %v3663_v32, %v3662_v3 }
 0x93d   : > { %v3670_v39 = vrot.slane %v3669_v34, 2 }
 0x93e   : > { %v3665_v38 = vrot.slane %v3664_v35, 1 }
 0x93f   : > { %v3671_v31 = vadd.f32 %v3670_v39, %v3669_v34 }
 0x940   : > { %v3666_v26 = vadd.f32 %v3665_v38, %v3664_v35 }
 0x941   : > { %v3672_v40 = vrot.slane %v3671_v31, 1 }
 0x942   : > { %v3676_v46 = vmul.f32 0.0625, %v3666_v26 }
 0x943   : > { %v3673_v41 = vadd.f32 %v3672_v40, %v3671_v31 }
 0x945   : > { %v3677_v48 = vmul.f32 0.0625, %v3673_v41 }
 0x947   : > { %v3683_v49 = vcombine.low %v3676_v46, %v3677_v48 }
 0x949   : > { %v3697_v51 = vrot.slane %v3683_v49, %v3689_v45 }
 0x94b   : > { %v3698_v52 = vcombine.low %v3690_v50, %v3697_v51 }
 0x94d   : > { %v3705_v53 = vrot.slane %v3698_v52, %v3689_v45 }
 0x94f   : > { %3711 = vst.msk [vmem:[%s904_s2] sm:$0xf] %vm3709_vm0, %v3705_v53 }
 0x950 PF: > { %s6557_s3 = sld [smem:[#allocation25_spill]] }
 0x956   : > { %s41_s29 = sadd.s32 1, %s6557_s3  }
 0x957   : > { %p38_p7 = scmp.ge.s32.totalorder %s41_s29, 4  }
 0x959   :  { %40 = sbr.rel (!%p38_p7) target bundleno = 21 (0x15), region = 195 }
 0x960   :  { %3731 = vsyncpa [#allocation3], 1 }
 0x961   :  { %3733 = vsyncpa [#allocation3 + $0x1], 1 }
 0x962   :  { %3734 = vsyncpa [#allocation5], 1 }
 0x963   :  { %3735 = vsyncpa [#allocation8], 1 }
 0x964   :  { %3736 = vsyncpa [#allocation11], 1 }
 0x965   :  { %3737 = vsyncpa [#allocation14], 1 }
 0x966   :  { %3738 = vsyncpa [#allocation17], 1 }

</bundles_post_ra>
